<compile_context>
chip_gen: v7x
topology: tpu7x:2x2x1
jax: 0.10.0
libtpu: 0.0.40
codegen_flags: <defaults>
</compile_context>

<pallas_src>
import math
from functools import partial

import jax
import jax.numpy as jnp
from jax import lax
from jax.experimental import pallas as pl
from jax.experimental.pallas import tpu as pltpu

# Large-but-finite mask value (flash-attention convention). A row that attends at
# least one real key matches the reference exactly (masked contributions wash out
# to 0 via the running-max rescale); fully-masked rows (NaN in the reference)
# become a finite mean-of-values here.
_MASK_VALUE = -0.7 * 3.4028235e38

# Flipped to False at runtime if this jax build rejects pl.Buffered(1) on a
# pallas_call BlockSpec (the kernels then fall back to default double buffering).
_SINGLE_BUFFER_WEIGHTS = [True]


def _round_up(x, m):
    return ((x + m - 1) // m) * m


def _vmem_limit_bytes():
    """Generation-aware scoped-VMEM budget (v7x: 64 MiB/TC, v5e/v6e: 128 MiB)."""
    try:
        cap = int(pltpu.get_tpu_info().vmem_capacity_bytes)
    except Exception:
        cap = 64 * 1024 * 1024          # conservative (v7x-sized) fallback
    # Leave ~25% headroom for Mosaic-internal scratch, cap at 100 MiB.
    return max(32 << 20, min(100 << 20, cap - cap // 4))


def _pick_block(seq_len, vmem_limit):
    # Bigger tiles amortize the ~0.35us per-grid-step overhead; use 256 only when
    # the chip has VMEM to spare (v5e/v6e), 128 on 64 MiB parts (v7x).
    return 256 if (vmem_limit >= (90 << 20) and seq_len >= 256) else 128


def _resident_spec(block_shape, index_map, single_buffer):
    """BlockSpec for weights/biases whose block index never changes.

    Double-buffering a constant block doubles its VMEM footprint with zero overlap
    benefit, so request a single buffer when supported.
    """
    if single_buffer:
        return pl.BlockSpec(block_shape, index_map, pipeline_mode=pl.Buffered(1))
    return pl.BlockSpec(block_shape, index_map)


# --------------------------- Kernel 1: QKV projection ---------------------------

def _qkv_proj_kernel(x_ref, wqkv_ref, bqkv_ref, q_ref, k_ref, v_ref, *,
                     num_heads, head_dim, hidden_dim, scale):
    """Fused QKV projection: one (ts,H)@(H,3H) MXU pass; head-major outputs."""
    x = x_ref[0].astype(wqkv_ref.dtype)                         # (ts, H)
    y = jnp.dot(x, wqkv_ref[...], preferred_element_type=jnp.float32)
    y = y + bqkv_ref[...]                                       # (ts, 3H) f32
    # TODO(synk): when head_dim < 128 these per-head column slices / stores are not
    # lane-aligned (vst.msk); padding head_dim to 128 with zero weight columns (or
    # emitting lane-dense (ts,H) slabs) would remove that overhead.
    for h in range(num_heads):
        q0 = h * head_dim
        k0 = hidden_dim + h * head_dim
        v0 = 2 * hidden_dim + h * head_dim
        # Fold 1/sqrt(head_dim) into q once (cheaper than scaling every score tile).
        q_ref[0, h] = (y[:, q0:q0 + head_dim] * scale).astype(q_ref.dtype)
        k_ref[0, h] = y[:, k0:k0 + head_dim].astype(k_ref.dtype)
        v_ref[0, h] = y[:, v0:v0 + head_dim].astype(v_ref.dtype)


# ---------------- Kernel 2: flash attention + output projection -----------------

def _flash_attn_kernel(q_ref, k_ref, v_ref, mask_ref, wo_ref, bo_ref, out_ref,
                       m_sc, l_sc, acc_sc, *, num_heads, head_dim,
                       block_q, block_kv, has_mask):
    ki = pl.program_id(2)
    q_start = pl.program_id(1) * block_q
    k_start = ki * block_kv

    @pl.when(ki == 0)
    def _init():
        m_sc[...] = jnp.full_like(m_sc, -jnp.inf)
        l_sc[...] = jnp.zeros_like(l_sc)
        acc_sc[...] = jnp.zeros_like(acc_sc)

    def _tile(on_diagonal):
        q = q_ref[0]                                            # (nh, tq, hd)
        k = k_ref[0]                                            # (nh, tk, hd)
        v = v_ref[0]
        # Heads batched in one dot_general contracting the last dims (no k.T relayout).
        s = jnp.einsum('hqd,hkd->hqk', q, k,
                       preferred_element_type=jnp.float32)      # (nh, tq, tk) f32
        if on_diagonal or has_mask:
            if on_diagonal:
                rows = q_start + lax.broadcasted_iota(jnp.int32, (block_q, block_kv), 0)
                cols = k_start + lax.broadcasted_iota(jnp.int32, (block_q, block_kv), 1)
                masked = cols > rows
                if has_mask:
                    masked = masked | (mask_ref[0] == 0)
            else:
                masked = mask_ref[0] == 0                       # (1, tk)
            s = s + jnp.where(masked, _MASK_VALUE, 0.0).astype(jnp.float32)[None]
        # Online softmax (f32 math).
        # TODO(synk): on v6e/v7x p=exp(.) could run in bf16 (keep m/l in f32) to
        # halve the EUP-bound portion; not done here to keep v5e numerics safe.
        m_prev = m_sc[...]
        m_new = jnp.maximum(m_prev, jnp.max(s, axis=-1, keepdims=True))
        alpha = jnp.exp(m_prev - m_new)
        p = jnp.exp(s - m_new)
        l_sc[...] = alpha * l_sc[...] + jnp.sum(p, axis=-1, keepdims=True)
        acc_sc[...] = alpha * acc_sc[...] + jnp.einsum(
            'hqk,hkd->hqd', p.astype(v.dtype), v, preferred_element_type=jnp.float32)
        m_sc[...] = m_new

    # Interior tiles (entirely below the causal diagonal): no causal iota/compare,
    # and no masking at all when mask is None (specialized at trace time).
    interior = k_start + block_kv <= q_start
    diagonal = jnp.logical_and(k_start < q_start + block_q,
                               k_start + block_kv > q_start)

    @pl.when(interior)
    def _interior():
        _tile(False)

    @pl.when(diagonal)
    def _diagonal():
        _tile(True)

    @pl.when(ki == pl.num_programs(2) - 1)
    def _finalize():
        # Exact divide: runs only once per q tile, so it is essentially free.
        o = (acc_sc[...] / l_sc[...]).astype(wo_ref.dtype)      # (nh, tq, hd)
        w = wo_ref[...]                                         # (nh, hd, H)
        if head_dim % 128 == 0:
            # Lane-aligned heads: one (tq, H) @ (H, H) matmul (full-K MXU fill).
            o2d = jnp.transpose(o, (1, 0, 2)).reshape(block_q, num_heads * head_dim)
            res = jnp.dot(o2d, w.reshape(num_heads * head_dim, w.shape[-1]),
                          preferred_element_type=jnp.float32)
        else:
            # One batched contraction + vector sum over heads (no serialized
            # per-head res+= chain; robust for tiny, unaligned head_dim).
            res = jnp.sum(jnp.einsum('hqd,hdf->hqf', o, w,
                                     preferred_element_type=jnp.float32), axis=0)
        out_ref[0] = (res + bo_ref[...]).astype(out_ref.dtype)


# ------------------------------------ Wrapper -----------------------------------

def _forward(x, params, mask, *, matmul_dtype, block, single_buffer_weights):
    B, S, H = x.shape
    nh = int(params["num_heads"])
    assert H % nh == 0
    hd = H // nh
    mdt = matmul_dtype

    vmem_limit = _vmem_limit_bytes()
    blk = _pick_block(S, vmem_limit) if block is None else block
    S_pad = _round_up(S, blk)
    bq = bkv = blk

    # Pad the sequence to an aligned tile multiple instead of using odd full-length
    # blocks: keeps per-step score/bias tensors bounded at O(bq*bkv) and (8,128)-aligned.
    if S_pad != S:
        x = jnp.pad(x, ((0, 0), (0, S_pad - S), (0, 0)))
    has_mask = mask is not None
    if has_mask:
        mask_i32 = jnp.pad(mask.astype(jnp.int32),
                           ((0, 0), (0, S_pad - S))).reshape(B, 1, S_pad)
    else:
        # Never read by the kernel (has_mask=False specializes the compute); padded
        # key columns are already excluded by the causal mask.
        mask_i32 = jnp.ones((B, 1, S_pad), jnp.int32)

    # Fused QKV weights: [Wq.T | Wk.T | Wv.T] -> (H, 3H), layout [in, out].
    wqkv = jnp.concatenate(
        [params["Wq"].T, params["Wk"].T, params["Wv"].T], axis=1).astype(mdt)
    bqkv = jnp.concatenate(
        [params["bq"], params["bk"], params["bv"]]).reshape(1, 3 * H).astype(jnp.float32)
    # Output projection, head-blocked view of Wo.T (host reshape = free).
    wo_heads = params["Wo"].T.reshape(nh, hd, H).astype(mdt)
    bo = params["bo"].reshape(1, H).astype(jnp.float32)

    # TODO(synk): for very large hidden_dim (>= ~2048) the resident (H,3H)/(nh,hd,H)
    # weights exceed VMEM; add a grid axis over the 3H output dim so Wqkv streams as
    # (H, tn) blocks instead of being fully resident.
    sbw = single_buffer_weights
    scale = 1.0 / math.sqrt(hd)

    # ---- Kernel 1: fused QKV projection -> head-major q/k/v ------------------
    q, k, v = pl.pallas_call(
        partial(_qkv_proj_kernel, num_heads=nh, head_dim=hd, hidden_dim=H,
                scale=scale),
        out_shape=tuple(jax.ShapeDtypeStruct((B, nh, S_pad, hd), mdt) for _ in range(3)),
        grid=(B, S_pad // bq),
        in_specs=[
            pl.BlockSpec((1, bq, H), lambda b, si: (b, si, 0)),          # x tile
            _resident_spec((H, 3 * H), lambda b, si: (0, 0), sbw),       # Wqkv
            _resident_spec((1, 3 * H), lambda b, si: (0, 0), sbw),       # bqkv
        ],
        out_specs=tuple(
            pl.BlockSpec((1, nh, bq, hd), lambda b, si: (b, 0, si, 0))
            for _ in range(3)),
        compiler_params=pltpu.CompilerParams(
            dimension_semantics=("parallel", "parallel"),
            vmem_limit_bytes=vmem_limit),
    )(x, wqkv, bqkv)

    # Causal DMA clamp: kv blocks past the last one needed by q tile qi reuse the
    # previous block index, so Pallas skips their HBM->VMEM DMA entirely (pl.when
    # only gates compute, not the BlockSpec fetch).
    def _kv_block(b, qi, ki):
        last_needed = (qi * bq + (bq - 1)) // bkv
        return (b, 0, jnp.minimum(ki, last_needed), 0)

    def _mask_block(b, qi, ki):
        last_needed = (qi * bq + (bq - 1)) // bkv
        return (b, 0, jnp.minimum(ki, last_needed))

    # ---- Kernel 2: flash attention (online softmax) + output projection ------
    out = pl.pallas_call(
        partial(_flash_attn_kernel, num_heads=nh, head_dim=hd,
                block_q=bq, block_kv=bkv, has_mask=has_mask),
        out_shape=jax.ShapeDtypeStruct((B, S_pad, H), jnp.float32),
        grid=(B, S_pad // bq, S_pad // bkv),
        in_specs=[
            pl.BlockSpec((1, nh, bq, hd), lambda b, qi, ki: (b, 0, qi, 0)),   # q
            pl.BlockSpec((1, nh, bkv, hd), _kv_block),                        # k
            pl.BlockSpec((1, nh, bkv, hd), _kv_block),                        # v
            pl.BlockSpec((1, 1, bkv), _mask_block),                           # padding mask
            _resident_spec((nh, hd, H), lambda b, qi, ki: (0, 0, 0), sbw),    # Wo
            _resident_spec((1, H), lambda b, qi, ki: (0, 0), sbw),            # bo
        ],
        out_specs=pl.BlockSpec((1, bq, H), lambda b, qi, ki: (b, qi, 0)),
        scratch_shapes=[
            pltpu.VMEM((nh, bq, 1), jnp.float32),    # running max m
            pltpu.VMEM((nh, bq, 1), jnp.float32),    # running denom l
            pltpu.VMEM((nh, bq, hd), jnp.float32),   # running output acc
        ],
        compiler_params=pltpu.CompilerParams(
            dimension_semantics=("parallel", "parallel", "arbitrary"),
            vmem_limit_bytes=vmem_limit),
    )(q, k, v, mask_i32, wo_heads, bo)

    return out[:, :S, :] if S_pad != S else out


def causal_attention_block(x, params, mask=None, *, matmul_dtype=jnp.float32,
                           block=None):
    """x: (B, S, H) float32; mask: optional (B, S) bool (True = attend).

    matmul_dtype=jnp.bfloat16 is the recommended perf config on v5e/v6e/v7x
    (bf16-native MXU, half the weight/activation HBM traffic); softmax math stays f32.
    """
    kwargs = dict(matmul_dtype=matmul_dtype, block=block)
    if _SINGLE_BUFFER_WEIGHTS[0]:
        try:
            return _forward(x, params, mask, single_buffer_weights=True, **kwargs)
        except Exception:
            # This jax build does not accept pl.Buffered(1) on pallas_call BlockSpecs;
            # fall back to default double-buffered resident weights.
            _SINGLE_BUFFER_WEIGHTS[0] = False
    return _forward(x, params, mask, single_buffer_weights=False, **kwargs)


# --------------------------------- Test harness ---------------------------------

def init_params(key, hidden_dim, num_heads):
    """Deterministic init mirroring nn.Linear default U(-1/sqrt(fan_in), 1/sqrt(fan_in))."""
    bound = 1.0 / math.sqrt(hidden_dim)
    keys = jax.random.split(key, 8)
    u = lambda k, shape: jax.random.uniform(k, shape, jnp.float32, -bound, bound)
    return {
        "num_heads": num_heads,
        "Wq": u(keys[0], (hidden_dim, hidden_dim)), "bq": u(keys[1], (hidden_dim,)),
        "Wk": u(keys[2], (hidden_dim, hidden_dim)), "bk": u(keys[3], (hidden_dim,)),
        "Wv": u(keys[4], (hidden_dim, hidden_dim)), "bv": u(keys[5], (hidden_dim,)),
        "Wo": u(keys[6], (hidden_dim, hidden_dim)), "bo": u(keys[7], (hidden_dim,)),
    }


def reference_attention(x, params, mask=None):
    """Pure-JAX transcription of the PyTorch forward (correctness check)."""
    B, S, H = x.shape
    nh = params["num_heads"]
    hd = H // nh
    q = x @ params["Wq"].T + params["bq"]
    k = x @ params["Wk"].T + params["bk"]
    v = x @ params["Wv"].T + params["bv"]
    q = q.reshape(B, S, nh, hd).transpose(0, 2, 1, 3)
    k = k.reshape(B, S, nh, hd).transpose(0, 2, 1, 3)
    v = v.reshape(B, S, nh, hd).transpose(0, 2, 1, 3)
    attn = (q @ k.transpose(0, 1, 3, 2)) / math.sqrt(hd)
    causal = jnp.triu(jnp.ones((S, S), bool), k=1)
    attn = jnp.where(causal[None, None], -jnp.inf, attn)
    if mask is not None:
        attn = jnp.where(~mask[:, None, None, :], -jnp.inf, attn)
    attn = jax.nn.softmax(attn, axis=-1)
    out = (attn @ v).transpose(0, 2, 1, 3).reshape(B, S, H)
    return out @ params["Wo"].T + params["bo"]


if __name__ == "__main__":
    B, S, H, NH = 2, 8, 32, 4

    key = jax.random.PRNGKey(0)
    k_param, k_x = jax.random.split(key)
    params = init_params(k_param, H, NH)
    x = jax.random.normal(k_x, (B, S, H), jnp.float32)

    # Padding mask: True = attended. Mask out the last token of batch 1.
    mask = jnp.ones((B, S), bool).at[1, S - 1].set(False)
    ref = reference_attention(x, params, mask)

    # f32 matmul path (tight check; exact softmax divide in the kernel).
    out = jax.block_until_ready(causal_attention_block(x, params, mask))
    assert out.shape == (B, S, H)
    err = float(jnp.max(jnp.abs(out - ref)))
    assert err < 2e-3, f"f32 path max abs err {err}"

    # mask=None path (masking compute is specialized away at trace time).
    out_nm = jax.block_until_ready(causal_attention_block(x, params, None))
    ref_nm = reference_attention(x, params, None)
    err_nm = float(jnp.max(jnp.abs(out_nm - ref_nm)))
    assert err_nm < 2e-3, f"no-mask path max abs err {err_nm}"

    # bf16 MXU-operand path (recommended perf config), looser tolerance.
    out_bf = jax.block_until_ready(
        causal_attention_block(x, params, mask, matmul_dtype=jnp.bfloat16))
    err_bf = float(jnp.max(jnp.abs(out_bf - ref)))
    assert err_bf < 7.5e-2, f"bf16 path max abs err {err_bf}"

    print("KERNEL_OK")
</pallas_src>

<mosaic_0001>
module attributes {stable_mosaic.version = 11 : i64} {
  func.func @_qkv_proj_kernel(%arg0: i32, %arg1: i32, %arg2: memref<1x128x32xf32, #tpu.memory_space<vmem>>, %arg3: memref<32x96xf32, #tpu.memory_space<vmem>>, %arg4: memref<1x96xf32, #tpu.memory_space<vmem>>, %arg5: memref<1x4x128x8xf32, #tpu.memory_space<vmem>>, %arg6: memref<1x4x128x8xf32, #tpu.memory_space<vmem>>, %arg7: memref<1x4x128x8xf32, #tpu.memory_space<vmem>>) attributes {dimension_semantics = [#tpu.dimension_semantics<parallel>, #tpu.dimension_semantics<parallel>], iteration_bounds = array<i64: 2, 1>, scalar_prefetch = 0 : i64, scratch_operands = 0 : i64, tpu.core_type = #tpu.core_type<tc>, window_params = [{transform_indices = @transform_0, window_bounds = array<i64: 1, 128, 32>}, {pipeline_mode = #tpu.pipeline_mode<synchronous>, transform_indices = @transform_1, window_bounds = array<i64: 32, 96>}, {pipeline_mode = #tpu.pipeline_mode<synchronous>, transform_indices = @transform_2, window_bounds = array<i64: 1, 96>}, {transform_indices = @transform_3, window_bounds = array<i64: 1, 4, 128, 8>}, {transform_indices = @transform_4, window_bounds = array<i64: 1, 4, 128, 8>}, {transform_indices = @transform_5, window_bounds = array<i64: 1, 4, 128, 8>}]} {
    %c0 = arith.constant 0 : index
    %c0_0 = arith.constant 0 : index
    %c0_1 = arith.constant 0 : index
    %0 = vector.load %arg2[%c0, %c0_0, %c0_1] : memref<1x128x32xf32, #tpu.memory_space<vmem>>, vector<1x128x32xf32>
    %1 = vector.shape_cast %0 : vector<1x128x32xf32> to vector<128x32xf32>
    %c0_2 = arith.constant 0 : index
    %c0_3 = arith.constant 0 : index
    %2 = vector.load %arg3[%c0_2, %c0_3] : memref<32x96xf32, #tpu.memory_space<vmem>>, vector<32x96xf32>
    %cst = arith.constant dense<0.000000e+00> : vector<128x96xf32>
    %3 = tpu.matmul %1, %2, %cst {dimension_numbers = #tpu.dot_dimension_numbers<[1], [0], [0], [1], [0, 0, 1, 1], [], []>} : vector<128x32xf32>, vector<32x96xf32>, vector<128x96xf32> -> vector<128x96xf32>
    %c0_4 = arith.constant 0 : index
    %c0_5 = arith.constant 0 : index
    %4 = vector.load %arg4[%c0_4, %c0_5] : memref<1x96xf32, #tpu.memory_space<vmem>>, vector<1x96xf32>
    %5 = vector.broadcast %4 : vector<1x96xf32> to vector<128x96xf32>
    %6 = arith.addf %3, %5 : vector<128x96xf32>
    %7 = vector.extract_strided_slice %6 {offsets = [0, 0], sizes = [128, 8], strides = [1, 1]} : vector<128x96xf32> to vector<128x8xf32>
    %cst_6 = arith.constant 0.353553385 : f32
    %8 = vector.broadcast %cst_6 : f32 to vector<128x8xf32>
    %9 = arith.mulf %7, %8 : vector<128x8xf32>
    %c0_7 = arith.constant 0 : index
    %c0_8 = arith.constant 0 : index
    %c0_9 = arith.constant 0 : index
    %c0_10 = arith.constant 0 : index
    %10 = vector.load %arg5[%c0_7, %c0_8, %c0_9, %c0_10] : memref<1x4x128x8xf32, #tpu.memory_space<vmem>>, vector<1x1x128x8xf32>
    %11 = vector.shape_cast %10 : vector<1x1x128x8xf32> to vector<128x8xf32>
    %12 = vector.shape_cast %9 : vector<128x8xf32> to vector<1x1x128x8xf32>
    tpu.vector_store %arg5[%c0_7, %c0_8, %c0_9, %c0_10], %12 {strides = array<i32>} : memref<1x4x128x8xf32, #tpu.memory_space<vmem>>, vector<1x1x128x8xf32>,
    %13 = vector.extract_strided_slice %6 {offsets = [0, 32], sizes = [128, 8], strides = [1, 1]} : vector<128x96xf32> to vector<128x8xf32>
    %c0_11 = arith.constant 0 : index
    %c0_12 = arith.constant 0 : index
    %c0_13 = arith.constant 0 : index
    %c0_14 = arith.constant 0 : index
    %14 = vector.load %arg6[%c0_11, %c0_12, %c0_13, %c0_14] : memref<1x4x128x8xf32, #tpu.memory_space<vmem>>, vector<1x1x128x8xf32>
    %15 = vector.shape_cast %14 : vector<1x1x128x8xf32> to vector<128x8xf32>
    %16 = vector.shape_cast %13 : vector<128x8xf32> to vector<1x1x128x8xf32>
    tpu.vector_store %arg6[%c0_11, %c0_12, %c0_13, %c0_14], %16 {strides = array<i32>} : memref<1x4x128x8xf32, #tpu.memory_space<vmem>>, vector<1x1x128x8xf32>,
    %17 = vector.extract_strided_slice %6 {offsets = [0, 64], sizes = [128, 8], strides = [1, 1]} : vector<128x96xf32> to vector<128x8xf32>
    %c0_15 = arith.constant 0 : index
    %c0_16 = arith.constant 0 : index
    %c0_17 = arith.constant 0 : index
    %c0_18 = arith.constant 0 : index
    %18 = vector.load %arg7[%c0_15, %c0_16, %c0_17, %c0_18] : memref<1x4x128x8xf32, #tpu.memory_space<vmem>>, vector<1x1x128x8xf32>
    %19 = vector.shape_cast %18 : vector<1x1x128x8xf32> to vector<128x8xf32>
    %20 = vector.shape_cast %17 : vector<128x8xf32> to vector<1x1x128x8xf32>
    tpu.vector_store %arg7[%c0_15, %c0_16, %c0_17, %c0_18], %20 {strides = array<i32>} : memref<1x4x128x8xf32, #tpu.memory_space<vmem>>, vector<1x1x128x8xf32>,
    %21 = vector.extract_strided_slice %6 {offsets = [0, 8], sizes = [128, 8], strides = [1, 1]} : vector<128x96xf32> to vector<128x8xf32>
    %cst_19 = arith.constant 0.353553385 : f32
    %22 = vector.broadcast %cst_19 : f32 to vector<128x8xf32>
    %23 = arith.mulf %21, %22 : vector<128x8xf32>
    %c0_20 = arith.constant 0 : index
    %c1 = arith.constant 1 : index
    %c0_21 = arith.constant 0 : index
    %c0_22 = arith.constant 0 : index
    %24 = vector.load %arg5[%c0_20, %c1, %c0_21, %c0_22] : memref<1x4x128x8xf32, #tpu.memory_space<vmem>>, vector<1x1x128x8xf32>
    %25 = vector.shape_cast %24 : vector<1x1x128x8xf32> to vector<128x8xf32>
    %26 = vector.shape_cast %23 : vector<128x8xf32> to vector<1x1x128x8xf32>
    tpu.vector_store %arg5[%c0_20, %c1, %c0_21, %c0_22], %26 {strides = array<i32>} : memref<1x4x128x8xf32, #tpu.memory_space<vmem>>, vector<1x1x128x8xf32>,
    %27 = vector.extract_strided_slice %6 {offsets = [0, 40], sizes = [128, 8], strides = [1, 1]} : vector<128x96xf32> to vector<128x8xf32>
    %c0_23 = arith.constant 0 : index
    %c1_24 = arith.constant 1 : index
    %c0_25 = arith.constant 0 : index
    %c0_26 = arith.constant 0 : index
    %28 = vector.load %arg6[%c0_23, %c1_24, %c0_25, %c0_26] : memref<1x4x128x8xf32, #tpu.memory_space<vmem>>, vector<1x1x128x8xf32>
    %29 = vector.shape_cast %28 : vector<1x1x128x8xf32> to vector<128x8xf32>
    %30 = vector.shape_cast %27 : vector<128x8xf32> to vector<1x1x128x8xf32>
    tpu.vector_store %arg6[%c0_23, %c1_24, %c0_25, %c0_26], %30 {strides = array<i32>} : memref<1x4x128x8xf32, #tpu.memory_space<vmem>>, vector<1x1x128x8xf32>,
    %31 = vector.extract_strided_slice %6 {offsets = [0, 72], sizes = [128, 8], strides = [1, 1]} : vector<128x96xf32> to vector<128x8xf32>
    %c0_27 = arith.constant 0 : index
    %c1_28 = arith.constant 1 : index
    %c0_29 = arith.constant 0 : index
    %c0_30 = arith.constant 0 : index
    %32 = vector.load %arg7[%c0_27, %c1_28, %c0_29, %c0_30] : memref<1x4x128x8xf32, #tpu.memory_space<vmem>>, vector<1x1x128x8xf32>
    %33 = vector.shape_cast %32 : vector<1x1x128x8xf32> to vector<128x8xf32>
    %34 = vector.shape_cast %31 : vector<128x8xf32> to vector<1x1x128x8xf32>
    tpu.vector_store %arg7[%c0_27, %c1_28, %c0_29, %c0_30], %34 {strides = array<i32>} : memref<1x4x128x8xf32, #tpu.memory_space<vmem>>, vector<1x1x128x8xf32>,
    %35 = vector.extract_strided_slice %6 {offsets = [0, 16], sizes = [128, 8], strides = [1, 1]} : vector<128x96xf32> to vector<128x8xf32>
    %cst_31 = arith.constant 0.353553385 : f32
    %36 = vector.broadcast %cst_31 : f32 to vector<128x8xf32>
    %37 = arith.mulf %35, %36 : vector<128x8xf32>
    %c0_32 = arith.constant 0 : index
    %c2 = arith.constant 2 : index
    %c0_33 = arith.constant 0 : index
    %c0_34 = arith.constant 0 : index
    %38 = vector.load %arg5[%c0_32, %c2, %c0_33, %c0_34] : memref<1x4x128x8xf32, #tpu.memory_space<vmem>>, vector<1x1x128x8xf32>
    %39 = vector.shape_cast %38 : vector<1x1x128x8xf32> to vector<128x8xf32>
    %40 = vector.shape_cast %37 : vector<128x8xf32> to vector<1x1x128x8xf32>
    tpu.vector_store %arg5[%c0_32, %c2, %c0_33, %c0_34], %40 {strides = array<i32>} : memref<1x4x128x8xf32, #tpu.memory_space<vmem>>, vector<1x1x128x8xf32>,
    %41 = vector.extract_strided_slice %6 {offsets = [0, 48], sizes = [128, 8], strides = [1, 1]} : vector<128x96xf32> to vector<128x8xf32>
    %c0_35 = arith.constant 0 : index
    %c2_36 = arith.constant 2 : index
    %c0_37 = arith.constant 0 : index
    %c0_38 = arith.constant 0 : index
    %42 = vector.load %arg6[%c0_35, %c2_36, %c0_37, %c0_38] : memref<1x4x128x8xf32, #tpu.memory_space<vmem>>, vector<1x1x128x8xf32>
    %43 = vector.shape_cast %42 : vector<1x1x128x8xf32> to vector<128x8xf32>
    %44 = vector.shape_cast %41 : vector<128x8xf32> to vector<1x1x128x8xf32>
    tpu.vector_store %arg6[%c0_35, %c2_36, %c0_37, %c0_38], %44 {strides = array<i32>} : memref<1x4x128x8xf32, #tpu.memory_space<vmem>>, vector<1x1x128x8xf32>,
    %45 = vector.extract_strided_slice %6 {offsets = [0, 80], sizes = [128, 8], strides = [1, 1]} : vector<128x96xf32> to vector<128x8xf32>
    %c0_39 = arith.constant 0 : index
    %c2_40 = arith.constant 2 : index
    %c0_41 = arith.constant 0 : index
    %c0_42 = arith.constant 0 : index
    %46 = vector.load %arg7[%c0_39, %c2_40, %c0_41, %c0_42] : memref<1x4x128x8xf32, #tpu.memory_space<vmem>>, vector<1x1x128x8xf32>
    %47 = vector.shape_cast %46 : vector<1x1x128x8xf32> to vector<128x8xf32>
    %48 = vector.shape_cast %45 : vector<128x8xf32> to vector<1x1x128x8xf32>
    tpu.vector_store %arg7[%c0_39, %c2_40, %c0_41, %c0_42], %48 {strides = array<i32>} : memref<1x4x128x8xf32, #tpu.memory_space<vmem>>, vector<1x1x128x8xf32>,
    %49 = vector.extract_strided_slice %6 {offsets = [0, 24], sizes = [128, 8], strides = [1, 1]} : vector<128x96xf32> to vector<128x8xf32>
    %cst_43 = arith.constant 0.353553385 : f32
    %50 = vector.broadcast %cst_43 : f32 to vector<128x8xf32>
    %51 = arith.mulf %49, %50 : vector<128x8xf32>
    %c0_44 = arith.constant 0 : index
    %c3 = arith.constant 3 : index
    %c0_45 = arith.constant 0 : index
    %c0_46 = arith.constant 0 : index
    %52 = vector.load %arg5[%c0_44, %c3, %c0_45, %c0_46] : memref<1x4x128x8xf32, #tpu.memory_space<vmem>>, vector<1x1x128x8xf32>
    %53 = vector.shape_cast %52 : vector<1x1x128x8xf32> to vector<128x8xf32>
    %54 = vector.shape_cast %51 : vector<128x8xf32> to vector<1x1x128x8xf32>
    tpu.vector_store %arg5[%c0_44, %c3, %c0_45, %c0_46], %54 {strides = array<i32>} : memref<1x4x128x8xf32, #tpu.memory_space<vmem>>, vector<1x1x128x8xf32>,
    %55 = vector.extract_strided_slice %6 {offsets = [0, 56], sizes = [128, 8], strides = [1, 1]} : vector<128x96xf32> to vector<128x8xf32>
    %c0_47 = arith.constant 0 : index
    %c3_48 = arith.constant 3 : index
    %c0_49 = arith.constant 0 : index
    %c0_50 = arith.constant 0 : index
    %56 = vector.load %arg6[%c0_47, %c3_48, %c0_49, %c0_50] : memref<1x4x128x8xf32, #tpu.memory_space<vmem>>, vector<1x1x128x8xf32>
    %57 = vector.shape_cast %56 : vector<1x1x128x8xf32> to vector<128x8xf32>
    %58 = vector.shape_cast %55 : vector<128x8xf32> to vector<1x1x128x8xf32>
    tpu.vector_store %arg6[%c0_47, %c3_48, %c0_49, %c0_50], %58 {strides = array<i32>} : memref<1x4x128x8xf32, #tpu.memory_space<vmem>>, vector<1x1x128x8xf32>,
    %59 = vector.extract_strided_slice %6 {offsets = [0, 88], sizes = [128, 8], strides = [1, 1]} : vector<128x96xf32> to vector<128x8xf32>
    %c0_51 = arith.constant 0 : index
    %c3_52 = arith.constant 3 : index
    %c0_53 = arith.constant 0 : index
    %c0_54 = arith.constant 0 : index
    %60 = vector.load %arg7[%c0_51, %c3_52, %c0_53, %c0_54] : memref<1x4x128x8xf32, #tpu.memory_space<vmem>>, vector<1x1x128x8xf32>
    %61 = vector.shape_cast %60 : vector<1x1x128x8xf32> to vector<128x8xf32>
    %62 = vector.shape_cast %59 : vector<128x8xf32> to vector<1x1x128x8xf32>
    tpu.vector_store %arg7[%c0_51, %c3_52, %c0_53, %c0_54], %62 {strides = array<i32>} : memref<1x4x128x8xf32, #tpu.memory_space<vmem>>, vector<1x1x128x8xf32>,
    return
  }
  func.func @transform_0(%arg0: i32, %arg1: i32) -> (i32, i32, i32) {
    %c0_i32 = arith.constant 0 : i32
    %c0_i32_0 = arith.constant 0 : i32
    return %arg0, %arg1, %c0_i32 : i32, i32, i32
  }
  func.func @transform_1(%arg0: i32, %arg1: i32) -> (i32, i32) {
    %c0_i32 = arith.constant 0 : i32
    %c0_i32_0 = arith.constant 0 : i32
    %c0_i32_1 = arith.constant 0 : i32
    return %c0_i32, %c0_i32_0 : i32, i32
  }
  func.func @transform_2(%arg0: i32, %arg1: i32) -> (i32, i32) {
    %c0_i32 = arith.constant 0 : i32
    %c0_i32_0 = arith.constant 0 : i32
    %c0_i32_1 = arith.constant 0 : i32
    return %c0_i32, %c0_i32_0 : i32, i32
  }
  func.func @transform_3(%arg0: i32, %arg1: i32) -> (i32, i32, i32, i32) {
    %c0_i32 = arith.constant 0 : i32
    %c0_i32_0 = arith.constant 0 : i32
    %c0_i32_1 = arith.constant 0 : i32
    return %arg0, %c0_i32, %arg1, %c0_i32_0 : i32, i32, i32, i32
  }
  func.func @transform_4(%arg0: i32, %arg1: i32) -> (i32, i32, i32, i32) {
    %c0_i32 = arith.constant 0 : i32
    %c0_i32_0 = arith.constant 0 : i32
    %c0_i32_1 = arith.constant 0 : i32
    return %arg0, %c0_i32, %arg1, %c0_i32_0 : i32, i32, i32, i32
  }
  func.func @transform_5(%arg0: i32, %arg1: i32) -> (i32, i32, i32, i32) {
    %c0_i32 = arith.constant 0 : i32
    %c0_i32_0 = arith.constant 0 : i32
    %c0_i32_1 = arith.constant 0 : i32
    return %arg0, %c0_i32, %arg1, %c0_i32_0 : i32, i32, i32, i32
  }
}

module attributes {stable_mosaic.version = 11 : i64} {
  func.func @_qkv_proj_kernel(%arg0: i32, %arg1: i32, %arg2: memref<1x128x32xf32, #tpu.memory_space<vmem>>, %arg3: memref<32x96xf32, #tpu.memory_space<vmem>>, %arg4: memref<1x96xf32, #tpu.memory_space<vmem>>, %arg5: memref<1x4x128x8xf32, #tpu.memory_space<vmem>>, %arg6: memref<1x4x128x8xf32, #tpu.memory_space<vmem>>, %arg7: memref<1x4x128x8xf32, #tpu.memory_space<vmem>>) attributes {dimension_semantics = [#tpu.dimension_semantics<parallel>, #tpu.dimension_semantics<parallel>], iteration_bounds = array<i64: 2, 1>, scalar_prefetch = 0 : i64, scratch_operands = 0 : i64, tpu.core_type = #tpu.core_type<tc>, window_params = [{transform_indices = @transform_0, window_bounds = array<i64: 1, 128, 32>}, {pipeline_mode = #tpu.pipeline_mode<synchronous>, transform_indices = @transform_1, window_bounds = array<i64: 32, 96>}, {pipeline_mode = #tpu.pipeline_mode<synchronous>, transform_indices = @transform_2, window_bounds = array<i64: 1, 96>}, {transform_indices = @transform_3, window_bounds = array<i64: 1, 4, 128, 8>}, {transform_indices = @transform_4, window_bounds = array<i64: 1, 4, 128, 8>}, {transform_indices = @transform_5, window_bounds = array<i64: 1, 4, 128, 8>}]} {
    %c0 = arith.constant 0 : index
    %c0_0 = arith.constant 0 : index
    %c0_1 = arith.constant 0 : index
    %0 = vector.load %arg2[%c0, %c0_0, %c0_1] : memref<1x128x32xf32, #tpu.memory_space<vmem>>, vector<1x128x32xf32>
    %1 = vector.shape_cast %0 : vector<1x128x32xf32> to vector<128x32xf32>
    %c0_2 = arith.constant 0 : index
    %c0_3 = arith.constant 0 : index
    %2 = vector.load %arg3[%c0_2, %c0_3] : memref<32x96xf32, #tpu.memory_space<vmem>>, vector<32x96xf32>
    %cst = arith.constant dense<0.000000e+00> : vector<128x96xf32>
    %3 = tpu.matmul %1, %2, %cst {dimension_numbers = #tpu.dot_dimension_numbers<[1], [0], [0], [1], [0, 0, 1, 1], [], []>} : vector<128x32xf32>, vector<32x96xf32>, vector<128x96xf32> -> vector<128x96xf32>
    %c0_4 = arith.constant 0 : index
    %c0_5 = arith.constant 0 : index
    %4 = vector.load %arg4[%c0_4, %c0_5] : memref<1x96xf32, #tpu.memory_space<vmem>>, vector<1x96xf32>
    %5 = vector.broadcast %4 : vector<1x96xf32> to vector<128x96xf32>
    %6 = arith.addf %3, %5 : vector<128x96xf32>
    %7 = vector.extract_strided_slice %6 {offsets = [0, 0], sizes = [128, 8], strides = [1, 1]} : vector<128x96xf32> to vector<128x8xf32>
    %cst_6 = arith.constant 0.353553385 : f32
    %8 = vector.broadcast %cst_6 : f32 to vector<128x8xf32>
    %9 = arith.mulf %7, %8 : vector<128x8xf32>
    %c0_7 = arith.constant 0 : index
    %c0_8 = arith.constant 0 : index
    %c0_9 = arith.constant 0 : index
    %c0_10 = arith.constant 0 : index
    %10 = vector.load %arg5[%c0_7, %c0_8, %c0_9, %c0_10] : memref<1x4x128x8xf32, #tpu.memory_space<vmem>>, vector<1x1x128x8xf32>
    %11 = vector.shape_cast %10 : vector<1x1x128x8xf32> to vector<128x8xf32>
    %12 = vector.shape_cast %9 : vector<128x8xf32> to vector<1x1x128x8xf32>
    tpu.vector_store %arg5[%c0_7, %c0_8, %c0_9, %c0_10], %12 {strides = array<i32>} : memref<1x4x128x8xf32, #tpu.memory_space<vmem>>, vector<1x1x128x8xf32>,
    %13 = vector.extract_strided_slice %6 {offsets = [0, 32], sizes = [128, 8], strides = [1, 1]} : vector<128x96xf32> to vector<128x8xf32>
    %c0_11 = arith.constant 0 : index
    %c0_12 = arith.constant 0 : index
    %c0_13 = arith.constant 0 : index
    %c0_14 = arith.constant 0 : index
    %14 = vector.load %arg6[%c0_11, %c0_12, %c0_13, %c0_14] : memref<1x4x128x8xf32, #tpu.memory_space<vmem>>, vector<1x1x128x8xf32>
    %15 = vector.shape_cast %14 : vector<1x1x128x8xf32> to vector<128x8xf32>
    %16 = vector.shape_cast %13 : vector<128x8xf32> to vector<1x1x128x8xf32>
    tpu.vector_store %arg6[%c0_11, %c0_12, %c0_13, %c0_14], %16 {strides = array<i32>} : memref<1x4x128x8xf32, #tpu.memory_space<vmem>>, vector<1x1x128x8xf32>,
    %17 = vector.extract_strided_slice %6 {offsets = [0, 64], sizes = [128, 8], strides = [1, 1]} : vector<128x96xf32> to vector<128x8xf32>
    %c0_15 = arith.constant 0 : index
    %c0_16 = arith.constant 0 : index
    %c0_17 = arith.constant 0 : index
    %c0_18 = arith.constant 0 : index
    %18 = vector.load %arg7[%c0_15, %c0_16, %c0_17, %c0_18] : memref<1x4x128x8xf32, #tpu.memory_space<vmem>>, vector<1x1x128x8xf32>
    %19 = vector.shape_cast %18 : vector<1x1x128x8xf32> to vector<128x8xf32>
    %20 = vector.shape_cast %17 : vector<128x8xf32> to vector<1x1x128x8xf32>
    tpu.vector_store %arg7[%c0_15, %c0_16, %c0_17, %c0_18], %20 {strides = array<i32>} : memref<1x4x128x8xf32, #tpu.memory_space<vmem>>, vector<1x1x128x8xf32>,
    %21 = vector.extract_strided_slice %6 {offsets = [0, 8], sizes = [128, 8], strides = [1, 1]} : vector<128x96xf32> to vector<128x8xf32>
    %cst_19 = arith.constant 0.353553385 : f32
    %22 = vector.broadcast %cst_19 : f32 to vector<128x8xf32>
    %23 = arith.mulf %21, %22 : vector<128x8xf32>
    %c0_20 = arith.constant 0 : index
    %c1 = arith.constant 1 : index
    %c0_21 = arith.constant 0 : index
    %c0_22 = arith.constant 0 : index
    %24 = vector.load %arg5[%c0_20, %c1, %c0_21, %c0_22] : memref<1x4x128x8xf32, #tpu.memory_space<vmem>>, vector<1x1x128x8xf32>
    %25 = vector.shape_cast %24 : vector<1x1x128x8xf32> to vector<128x8xf32>
    %26 = vector.shape_cast %23 : vector<128x8xf32> to vector<1x1x128x8xf32>
    tpu.vector_store %arg5[%c0_20, %c1, %c0_21, %c0_22], %26 {strides = array<i32>} : memref<1x4x128x8xf32, #tpu.memory_space<vmem>>, vector<1x1x128x8xf32>,
    %27 = vector.extract_strided_slice %6 {offsets = [0, 40], sizes = [128, 8], strides = [1, 1]} : vector<128x96xf32> to vector<128x8xf32>
    %c0_23 = arith.constant 0 : index
    %c1_24 = arith.constant 1 : index
    %c0_25 = arith.constant 0 : index
    %c0_26 = arith.constant 0 : index
    %28 = vector.load %arg6[%c0_23, %c1_24, %c0_25, %c0_26] : memref<1x4x128x8xf32, #tpu.memory_space<vmem>>, vector<1x1x128x8xf32>
    %29 = vector.shape_cast %28 : vector<1x1x128x8xf32> to vector<128x8xf32>
    %30 = vector.shape_cast %27 : vector<128x8xf32> to vector<1x1x128x8xf32>
    tpu.vector_store %arg6[%c0_23, %c1_24, %c0_25, %c0_26], %30 {strides = array<i32>} : memref<1x4x128x8xf32, #tpu.memory_space<vmem>>, vector<1x1x128x8xf32>,
    %31 = vector.extract_strided_slice %6 {offsets = [0, 72], sizes = [128, 8], strides = [1, 1]} : vector<128x96xf32> to vector<128x8xf32>
    %c0_27 = arith.constant 0 : index
    %c1_28 = arith.constant 1 : index
    %c0_29 = arith.constant 0 : index
    %c0_30 = arith.constant 0 : index
    %32 = vector.load %arg7[%c0_27, %c1_28, %c0_29, %c0_30] : memref<1x4x128x8xf32, #tpu.memory_space<vmem>>, vector<1x1x128x8xf32>
    %33 = vector.shape_cast %32 : vector<1x1x128x8xf32> to vector<128x8xf32>
    %34 = vector.shape_cast %31 : vector<128x8xf32> to vector<1x1x128x8xf32>
    tpu.vector_store %arg7[%c0_27, %c1_28, %c0_29, %c0_30], %34 {strides = array<i32>} : memref<1x4x128x8xf32, #tpu.memory_space<vmem>>, vector<1x1x128x8xf32>,
    %35 = vector.extract_strided_slice %6 {offsets = [0, 16], sizes = [128, 8], strides = [1, 1]} : vector<128x96xf32> to vector<128x8xf32>
    %cst_31 = arith.constant 0.353553385 : f32
    %36 = vector.broadcast %cst_31 : f32 to vector<128x8xf32>
    %37 = arith.mulf %35, %36 : vector<128x8xf32>
    %c0_32 = arith.constant 0 : index
    %c2 = arith.constant 2 : index
    %c0_33 = arith.constant 0 : index
    %c0_34 = arith.constant 0 : index
    %38 = vector.load %arg5[%c0_32, %c2, %c0_33, %c0_34] : memref<1x4x128x8xf32, #tpu.memory_space<vmem>>, vector<1x1x128x8xf32>
    %39 = vector.shape_cast %38 : vector<1x1x128x8xf32> to vector<128x8xf32>
    %40 = vector.shape_cast %37 : vector<128x8xf32> to vector<1x1x128x8xf32>
    tpu.vector_store %arg5[%c0_32, %c2, %c0_33, %c0_34], %40 {strides = array<i32>} : memref<1x4x128x8xf32, #tpu.memory_space<vmem>>, vector<1x1x128x8xf32>,
    %41 = vector.extract_strided_slice %6 {offsets = [0, 48], sizes = [128, 8], strides = [1, 1]} : vector<128x96xf32> to vector<128x8xf32>
    %c0_35 = arith.constant 0 : index
    %c2_36 = arith.constant 2 : index
    %c0_37 = arith.constant 0 : index
    %c0_38 = arith.constant 0 : index
    %42 = vector.load %arg6[%c0_35, %c2_36, %c0_37, %c0_38] : memref<1x4x128x8xf32, #tpu.memory_space<vmem>>, vector<1x1x128x8xf32>
    %43 = vector.shape_cast %42 : vector<1x1x128x8xf32> to vector<128x8xf32>
    %44 = vector.shape_cast %41 : vector<128x8xf32> to vector<1x1x128x8xf32>
    tpu.vector_store %arg6[%c0_35, %c2_36, %c0_37, %c0_38], %44 {strides = array<i32>} : memref<1x4x128x8xf32, #tpu.memory_space<vmem>>, vector<1x1x128x8xf32>,
    %45 = vector.extract_strided_slice %6 {offsets = [0, 80], sizes = [128, 8], strides = [1, 1]} : vector<128x96xf32> to vector<128x8xf32>
    %c0_39 = arith.constant 0 : index
    %c2_40 = arith.constant 2 : index
    %c0_41 = arith.constant 0 : index
    %c0_42 = arith.constant 0 : index
    %46 = vector.load %arg7[%c0_39, %c2_40, %c0_41, %c0_42] : memref<1x4x128x8xf32, #tpu.memory_space<vmem>>, vector<1x1x128x8xf32>
    %47 = vector.shape_cast %46 : vector<1x1x128x8xf32> to vector<128x8xf32>
    %48 = vector.shape_cast %45 : vector<128x8xf32> to vector<1x1x128x8xf32>
    tpu.vector_store %arg7[%c0_39, %c2_40, %c0_41, %c0_42], %48 {strides = array<i32>} : memref<1x4x128x8xf32, #tpu.memory_space<vmem>>, vector<1x1x128x8xf32>,
    %49 = vector.extract_strided_slice %6 {offsets = [0, 24], sizes = [128, 8], strides = [1, 1]} : vector<128x96xf32> to vector<128x8xf32>
    %cst_43 = arith.constant 0.353553385 : f32
    %50 = vector.broadcast %cst_43 : f32 to vector<128x8xf32>
    %51 = arith.mulf %49, %50 : vector<128x8xf32>
    %c0_44 = arith.constant 0 : index
    %c3 = arith.constant 3 : index
    %c0_45 = arith.constant 0 : index
    %c0_46 = arith.constant 0 : index
    %52 = vector.load %arg5[%c0_44, %c3, %c0_45, %c0_46] : memref<1x4x128x8xf32, #tpu.memory_space<vmem>>, vector<1x1x128x8xf32>
    %53 = vector.shape_cast %52 : vector<1x1x128x8xf32> to vector<128x8xf32>
    %54 = vector.shape_cast %51 : vector<128x8xf32> to vector<1x1x128x8xf32>
    tpu.vector_store %arg5[%c0_44, %c3, %c0_45, %c0_46], %54 {strides = array<i32>} : memref<1x4x128x8xf32, #tpu.memory_space<vmem>>, vector<1x1x128x8xf32>,
    %55 = vector.extract_strided_slice %6 {offsets = [0, 56], sizes = [128, 8], strides = [1, 1]} : vector<128x96xf32> to vector<128x8xf32>
    %c0_47 = arith.constant 0 : index
    %c3_48 = arith.constant 3 : index
    %c0_49 = arith.constant 0 : index
    %c0_50 = arith.constant 0 : index
    %56 = vector.load %arg6[%c0_47, %c3_48, %c0_49, %c0_50] : memref<1x4x128x8xf32, #tpu.memory_space<vmem>>, vector<1x1x128x8xf32>
    %57 = vector.shape_cast %56 : vector<1x1x128x8xf32> to vector<128x8xf32>
    %58 = vector.shape_cast %55 : vector<128x8xf32> to vector<1x1x128x8xf32>
    tpu.vector_store %arg6[%c0_47, %c3_48, %c0_49, %c0_50], %58 {strides = array<i32>} : memref<1x4x128x8xf32, #tpu.memory_space<vmem>>, vector<1x1x128x8xf32>,
    %59 = vector.extract_strided_slice %6 {offsets = [0, 88], sizes = [128, 8], strides = [1, 1]} : vector<128x96xf32> to vector<128x8xf32>
    %c0_51 = arith.constant 0 : index
    %c3_52 = arith.constant 3 : index
    %c0_53 = arith.constant 0 : index
    %c0_54 = arith.constant 0 : index
    %60 = vector.load %arg7[%c0_51, %c3_52, %c0_53, %c0_54] : memref<1x4x128x8xf32, #tpu.memory_space<vmem>>, vector<1x1x128x8xf32>
    %61 = vector.shape_cast %60 : vector<1x1x128x8xf32> to vector<128x8xf32>
    %62 = vector.shape_cast %59 : vector<128x8xf32> to vector<1x1x128x8xf32>
    tpu.vector_store %arg7[%c0_51, %c3_52, %c0_53, %c0_54], %62 {strides = array<i32>} : memref<1x4x128x8xf32, #tpu.memory_space<vmem>>, vector<1x1x128x8xf32>,
    return
  }
  func.func @transform_0(%arg0: i32, %arg1: i32) -> (i32, i32, i32) {
    %c0_i32 = arith.constant 0 : i32
    %c0_i32_0 = arith.constant 0 : i32
    return %arg0, %arg1, %c0_i32 : i32, i32, i32
  }
  func.func @transform_1(%arg0: i32, %arg1: i32) -> (i32, i32) {
    %c0_i32 = arith.constant 0 : i32
    %c0_i32_0 = arith.constant 0 : i32
    %c0_i32_1 = arith.constant 0 : i32
    return %c0_i32, %c0_i32_0 : i32, i32
  }
  func.func @transform_2(%arg0: i32, %arg1: i32) -> (i32, i32) {
    %c0_i32 = arith.constant 0 : i32
    %c0_i32_0 = arith.constant 0 : i32
    %c0_i32_1 = arith.constant 0 : i32
    return %c0_i32, %c0_i32_0 : i32, i32
  }
  func.func @transform_3(%arg0: i32, %arg1: i32) -> (i32, i32, i32, i32) {
    %c0_i32 = arith.constant 0 : i32
    %c0_i32_0 = arith.constant 0 : i32
    %c0_i32_1 = arith.constant 0 : i32
    return %arg0, %c0_i32, %arg1, %c0_i32_0 : i32, i32, i32, i32
  }
  func.func @transform_4(%arg0: i32, %arg1: i32) -> (i32, i32, i32, i32) {
    %c0_i32 = arith.constant 0 : i32
    %c0_i32_0 = arith.constant 0 : i32
    %c0_i32_1 = arith.constant 0 : i32
    return %arg0, %c0_i32, %arg1, %c0_i32_0 : i32, i32, i32, i32
  }
  func.func @transform_5(%arg0: i32, %arg1: i32) -> (i32, i32, i32, i32) {
    %c0_i32 = arith.constant 0 : i32
    %c0_i32_0 = arith.constant 0 : i32
    %c0_i32_1 = arith.constant 0 : i32
    return %arg0, %c0_i32, %arg1, %c0_i32_0 : i32, i32, i32, i32
  }
}

</mosaic_0001>

<bundles_post_ra>
// kernel: tpu_custom_call.1
= control target key start
LH: loop header
LB: loop body
LE: loop exit
PB: predicated region body
PF: predicated region fallthrough
CT: control target
= control target key end

     0   :  { %s1841_s18 = smov 0   ;;  %s1843_s19 = smov 0   ;;  %s2794_s0 = inlined_call_operand.vmem [shape: f32[2,128,32], index: 0, kind: input, shape index: {}]   ;;  %s2795_s1 = inlined_call_operand.vmem [shape: f32[32,96], index: 1, kind: input, shape index: {}]   ;;  %s2796_s2 = inlined_call_operand.vmem [shape: f32[1,96], index: 2, kind: input, shape index: {}]   ;;  %s2797_s3 = inlined_call_operand.vmem [shape: f32[2,4,128,8], index: 3, kind: output, shape index: {0}]   ;;  %s2798_s4 = inlined_call_operand.vmem [shape: f32[2,4,128,8], index: 4, kind: output, shape index: {1}]   ;;  %s2799_s5 = inlined_call_operand.vmem [shape: f32[2,4,128,8], index: 5, kind: output, shape index: {2}]  }
   0x1   :  { %s1845_s20 = smov 0  }
   0x2 LB: > { %s28_s21 = sadd.s32 1, %s1794_s19  ;;  %p1501_p0 = scmp.ge.s32.totalorder %s1798_s20, 1  ;;  %s1798_s20 = sphi %s1845_s20, %s16_s20   ;;  %s1794_s19 = sphi %s1843_s19, %s2801_s19   ;;  %s1790_s18 = sphi %s1841_s18, %s2800_s18  }
   0x3   : > { %p30_p1 = scmp.ge.s32.totalorder %s28_s21, 2  ;;  %p217_p2 = scmp.lt.s32.totalorder %s1798_s20, 3 }
   0x5   : > { %s2803_s21 = smov (%p30_p1, %s28_s21), 0  ;;  %p218_p3 = pnand %p1501_p0, %p217_p2 }
   0x6   : > { %v327_v0 = vld [vmem:[%s2795_s1] sm:$0xff] (!%p218_p3)  ;;  %v328_v1 = vld [vmem:[%s2795_s1 + $0x8] sm:$0xff] (!%p218_p3)  ;;  %v329_v2 = vld [vmem:[%s2795_s1 + $0x10] sm:$0xff] (!%p218_p3)  ;;  %p272_p4 = scmp.lt.s32.totalorder (!%p218_p3), %s1790_s18, 1  ;;  %vm338_vm0 = vcmask (!%p218_p3), 261120   ;;  %vm548_vm1 = vcmask (!%p218_p3), 64512  }
   0x7   : > { %221 = sbr.rel (%p218_p3) target bundleno = 698 (0x2ba), region = 32  ;;  %v1729_v3 = vpack.c.bf16 (!%p218_p3), %v328_v1, %v327_v0  ;;  %v330_v4 = vld [vmem:[%s2795_s1 + $0x18] sm:$0xff] (!%p218_p3)  ;;  %v1914_v22 = vld [vmem:[%s2796_s2] ss:$0 sm:$0xff] (!%p218_p3)  ;;  %s1800_s15 = smov (!%p218_p3), 96  }
   0x8   : > { %v1733_v5 = vpack.c.bf16 (!%p218_p3), %v330_v4, %v329_v2  ;;  %s1801_s16 = smov (!%p218_p3), 64   ;;  %s1802_s17 = smov (!%p218_p3), 88  }
   0x9   : > { %1730 = vmatprep.subr.bf16.mxu0 (!%p218_p3), %v1729_v3  ;;  %1737 = vmatprep.subr.bf16.mxu1 (!%p218_p3), %v1729_v3  ;;  %s1804_s22 = smov (!%p218_p3), 80   ;;  %s1805_s23 = smov (!%p218_p3), 48  }
   0xa   : > { %1732 = vmatpush3.bf16.msra.mxu0 (!%p218_p3), %v1729_v3  ;;  %1739 = vmatpush3.bf16.msra.mxu1 (!%p218_p3), %v1729_v3  ;;  %s1806_s24 = smov (!%p218_p3), 120   ;;  %s1807_s25 = smov (!%p218_p3), 112  }
   0xb   : > { %1734 = vmatprep.subr.bf16.mxu0 (!%p218_p3), %v1733_v5  ;;  %1738 = vmatprep.subr.bf16.mxu1 (!%p218_p3), %v1733_v5  ;;  %s1808_s7 = smov (!%p218_p3), 104   ;;  %s1810_s9 = smov (!%p218_p3), 40  }
   0xe   : > { %s2805_s18 = smov (!%p272_p4, %s1790_s18), 1  ;;  %1736 = vmatpush3.bf16.msra.mxu0 %v1733_v5  ;;  %1740 = vmatpush3.bf16.msra.mxu1 %v1733_v5 }
   0xf   : > { %s1673_s30 = sshll.u32 %s2805_s18, 7  ;;  %s1917_s11 = sshll.u32 %s2805_s18, 9 }
  0x10   : > { %s1877_s8 = scalar_lea.vmem %s2794_s0, %s1673_s30  ;;  %s1935_s14 = scalar_lea.vmem %s2797_s3, %s1917_s11 }
  0x11   : > { %v311_v6 = vld [vmem:[%s1877_s8] sm:$0xff]  ;;  %v312_v8 = vld [vmem:[%s1877_s8 + $0x8] sm:$0xff]  ;;  %v313_v10 = vld [vmem:[%s1877_s8 + $0x10] sm:$0xff]  ;;  %s1803_s18 = smov 56   ;;  %s2189_s28 = scalar_lea.vmem %s2798_s4, %s1917_s11 }
  0x12   : > { %v319_v7 = vld [vmem:[%s1877_s8 + $0x40] sm:$0xff]  ;;  %1705 = vmatprep.mubr.msk.f32.mxu0 %vm338_vm0, %v311_v6  ;;  %v320_v9 = vld [vmem:[%s1877_s8 + $0x48] sm:$0xff]  ;;  %v321_v11 = vld [vmem:[%s1877_s8 + $0x50] sm:$0xff]  ;;  %s2203_s6 = scalar_lea.vmem %s2799_s5, %s1917_s11 }
  0x13   : > { %1717 = vmatprep.mubr.msk.f32.mxu1 %vm338_vm0, %v319_v7  ;;  %1706 = vmatmul.mubr.msk.f32.vlgmr.msra.gmra.mrb[0].mxu0 %vm338_vm0, %v312_v8  ;;  %v314_v12 = vld [vmem:[%s1877_s8 + $0x18] sm:$0xff]  ;;  %v315_v14 = vld [vmem:[%s1877_s8 + $0x20] sm:$0xff]  ;;  %v316_v16 = vld [vmem:[%s1877_s8 + $0x28] sm:$0xff] }
  0x14   : > { %1718 = vmatmul.mubr.msk.f32.vlgmr.msra.gmra.mrb[0].mxu1 %vm338_vm0, %v320_v9  ;;  %1708 = vmatprep.mubr.msk.f32.mxu0 %vm338_vm0, %v313_v10  ;;  %v322_v13 = vld [vmem:[%s1877_s8 + $0x58] sm:$0xff]  ;;  %v323_v15 = vld [vmem:[%s1877_s8 + $0x60] sm:$0xff]  ;;  %v324_v17 = vld [vmem:[%s1877_s8 + $0x68] sm:$0xff] }
  0x15   : > { %1720 = vmatprep.mubr.msk.f32.mxu1 %vm338_vm0, %v321_v11  ;;  %v317_v18 = vld [vmem:[%s1877_s8 + $0x30] sm:$0xff]  ;;  %v318_v20 = vld [vmem:[%s1877_s8 + $0x38] sm:$0xff] }
  0x16   : > { %v325_v19 = vld [vmem:[%s1877_s8 + $0x70] sm:$0xff]  ;;  %v326_v21 = vld [vmem:[%s1877_s8 + $0x78] sm:$0xff]  ;;  %s1809_s8 = smov 72  }
  0x17   : > { %1709 = vmatmul.mubr.msk.f32.gmra.mrb[2].mxu0 %vm338_vm0, %v314_v12 }
  0x18   : > { %1721 = vmatmul.mubr.msk.f32.gmra.mrb[2].mxu1 %vm338_vm0, %v322_v13  ;;  %1711 = vmatprep.mubr.msk.f32.mxu0 %vm338_vm0, %v315_v14 }
  0x19   : > { %1723 = vmatprep.mubr.msk.f32.mxu1 %vm338_vm0, %v323_v15 }
  0x1b   : > { %1712 = vmatmul.mubr.msk.f32.gmra.mrb[4].mxu0 %vm338_vm0, %v316_v16 }
  0x1c   : > { %1724 = vmatmul.mubr.msk.f32.gmra.mrb[4].mxu1 %vm338_vm0, %v324_v17  ;;  %1714 = vmatprep.mubr.msk.f32.mxu0 %vm338_vm0, %v317_v18 }
  0x1d   : > { %1726 = vmatprep.mubr.msk.f32.mxu1 %vm338_vm0, %v325_v19 }
  0x1f   : > { %1715 = vmatmul.mubr.msk.f32.gmra.mrb[6].mxu0 %vm338_vm0, %v318_v20 }
  0x20   : > { %1727 = vmatmul.mubr.msk.f32.gmra.mrb[6].mxu1 %vm338_vm0, %v326_v21 }
  0xe6   : > { %v1707_v23 = vpop.f32.mrb[0].mxu0 }
  0xe7   : > { %v1719_v24 = vpop.f32.mrb[0].mxu1  ;;  %v1920_v25 = vadd.f32 %v1707_v23, %v1914_v22  ;;  %v453_v27 = vpop.f32.mrb[1].mxu0 }
  0xe8   : > { %v1923_v26 = vadd.f32 %v1719_v24, %v1914_v22  ;;  %v493_v28 = vpop.f32.mrb[1].mxu1  ;;  %v1926_v29 = vadd.f32 %v1914_v22, %v453_v27 }
  0xe9   : > { %v1929_v30 = vadd.f32 %v1914_v22, %v493_v28  ;;  %583 = vrot.lane.b32.xlu0 %v1920_v25, %s1800_s15  ;;  %v1942_v31 = vmul.f32 0.35355338, %v1920_v25 }
  0xea   : > { %599 = vrot.lane.b32.xlu1 %v1923_v26, %s1800_s15  ;;  %v1945_v32 = vmul.f32 0.35355338, %v1923_v26  ;;  %v1710_v33 = vpop.f32.mrb[2].mxu0  ;;  %v1948_v34 = vmul.f32 0.35355338, %v1926_v29 }
  0xeb   : > { %v1722_v35 = vpop.f32.mrb[2].mxu1  ;;  %v1951_v36 = vmul.f32 0.35355338, %v1929_v30  ;;  %550 = vst.msk [vmem:[%s1935_s14 + $0x8] sm:$0xff] %vm548_vm1, %v1942_v31  ;;  %v1960_v37 = vadd.f32 %v1710_v33, %v1914_v22  ;;  %v463_v38 = vpop.f32.mrb[3].mxu0 }
  0xec   : > { %558 = vst.msk [vmem:[%s1935_s14 + $0x48] sm:$0xff] %vm548_vm1, %v1945_v32  ;;  %v1963_v39 = vadd.f32 %v1722_v35, %v1914_v22  ;;  %v503_v40 = vpop.f32.mrb[3].mxu1  ;;  %549 = vst.msk [vmem:[%s1935_s14] sm:$0xff] %vm548_vm1, %v1948_v34  ;;  %v1969_v41 = vadd.f32 %v1914_v22, %v463_v38 }
  0xed   : > { %557 = vst.msk [vmem:[%s1935_s14 + $0x40] sm:$0xff] %vm548_vm1, %v1951_v36  ;;  %v1975_v42 = vadd.f32 %v1914_v22, %v503_v40  ;;  %581 = vrot.lane.b32.xlu0 %v1926_v29, %s1800_s15  ;;  %v1982_v43 = vmul.f32 0.35355338, %v1960_v37 }
  0xee   : > { %647 = vrot.lane.b32.xlu1 %v1920_v25, %s1801_s16  ;;  %v1985_v44 = vmul.f32 0.35355338, %v1963_v39  ;;  %v1988_v45 = vmul.f32 0.35355338, %v1969_v41  ;;  %v1713_v47 = vpop.f32.mrb[4].mxu0 }
  0xef   : > { %v1991_v46 = vmul.f32 0.35355338, %v1975_v42  ;;  %v1725_v48 = vpop.f32.mrb[4].mxu1  ;;  %552 = vst.msk [vmem:[%s1935_s14 + $0x18] sm:$0xff] %vm548_vm1, %v1982_v43  ;;  %v2000_v49 = vadd.f32 %v1713_v47, %v1914_v22  ;;  %v473_v50 = vpop.f32.mrb[5].mxu0 }
  0xf0   : > { %560 = vst.msk [vmem:[%s1935_s14 + $0x58] sm:$0xff] %vm548_vm1, %v1985_v44  ;;  %v2003_v51 = vadd.f32 %v1725_v48, %v1914_v22  ;;  %v513_v52 = vpop.f32.mrb[5].mxu1  ;;  %551 = vst.msk [vmem:[%s1935_s14 + $0x10] sm:$0xff] %vm548_vm1, %v1988_v45  ;;  %v2012_v53 = vadd.f32 %v1914_v22, %v473_v50 }
  0xf1   : > { %559 = vst.msk [vmem:[%s1935_s14 + $0x50] sm:$0xff] %vm548_vm1, %v1991_v46  ;;  %v2015_v54 = vadd.f32 %v1914_v22, %v513_v52  ;;  %597 = vrot.lane.b32.xlu0 %v1929_v30, %s1800_s15  ;;  %v2022_v55 = vmul.f32 0.35355338, %v2000_v49 }
  0xf2   : > { %663 = vrot.lane.b32.xlu1 %v1923_v26, %s1801_s16  ;;  %v2025_v56 = vmul.f32 0.35355338, %v2003_v51  ;;  %v2028_v57 = vmul.f32 0.35355338, %v2012_v53  ;;  %v1716_v59 = vpop.f32.mrb[6].mxu0 }
  0xf3   : > { %v2031_v58 = vmul.f32 0.35355338, %v2015_v54  ;;  %554 = vst.msk [vmem:[%s1935_s14 + $0x28] sm:$0xff] %vm548_vm1, %v2022_v55  ;;  %v2086_v60 = vadd.f32 %v1716_v59, %v1914_v22  ;;  %v483_v61 = vpop.f32.mrb[7].mxu0  ;;  %v1728_v63 = vpop.f32.mrb[6].mxu1 }
  0xf4   : > { %562 = vst.msk [vmem:[%s1935_s14 + $0x68] sm:$0xff] %vm548_vm1, %v2025_v56  ;;  %553 = vst.msk [vmem:[%s1935_s14 + $0x20] sm:$0xff] %vm548_vm1, %v2028_v57  ;;  %v2089_v62 = vadd.f32 %v1914_v22, %v483_v61  ;;  %v2096_v0 = vadd.f32 %v1728_v63, %v1914_v22  ;;  %v523_v1 = vpop.f32.mrb[7].mxu1 }
  0xf5   : > { %561 = vst.msk [vmem:[%s1935_s14 + $0x60] sm:$0xff] %vm548_vm1, %v2031_v58  ;;  %645 = vrot.lane.b32.xlu0 %v1926_v29, %s1801_s16  ;;  %v2099_v2 = vmul.f32 0.35355338, %v2086_v60  ;;  %v2105_v4 = vadd.f32 %v1914_v22, %v523_v1 }
  0xf6   : > { %792 = vrot.lane.b32.xlu1 %v1920_v25, %s1802_s17  ;;  %v2102_v3 = vmul.f32 0.35355338, %v2089_v62  ;;  %v2118_v5 = vmul.f32 0.35355338, %v2096_v0 }
  0xf7   : > { %556 = vst.msk [vmem:[%s1935_s14 + $0x38] sm:$0xff] %vm548_vm1, %v2099_v2  ;;  %v2121_v6 = vmul.f32 0.35355338, %v2105_v4 }
  0xf8   : > { %555 = vst.msk [vmem:[%s1935_s14 + $0x30] sm:$0xff] %vm548_vm1, %v2102_v3  ;;  %564 = vst.msk [vmem:[%s1935_s14 + $0x78] sm:$0xff] %vm548_vm1, %v2118_v5 }
  0xf9   : > { %661 = vrot.lane.b32.xlu0 %v1929_v30, %s1801_s16  ;;  %563 = vst.msk [vmem:[%s1935_s14 + $0x70] sm:$0xff] %vm548_vm1, %v2121_v6 }
  0xfa   : > { %808 = vrot.lane.b32.xlu1 %v1923_v26, %s1802_s17 }
  0xfd   : > { %790 = vrot.lane.b32.xlu0 %v1926_v29, %s1802_s17 }
  0xfe   : > { %857 = vrot.lane.b32.xlu1 %v1920_v25, %s1803_s18 }
 0x101   : > { %806 = vrot.lane.b32.xlu0 %v1929_v30, %s1802_s17 }
 0x102   : > { %873 = vrot.lane.b32.xlu1 %v1923_v26, %s1803_s18 }
 0x105   : > { %855 = vrot.lane.b32.xlu0 %v1926_v29, %s1803_s18 }
 0x106   : > { %987 = vrot.lane.b32.xlu1 %v1920_v25, %s1804_s22 }
 0x109   : > { %871 = vrot.lane.b32.xlu0 %v1929_v30, %s1803_s18 }
 0x10a   : > { %1003 = vrot.lane.b32.xlu1 %v1923_v26, %s1804_s22 }
 0x10d   : > { %985 = vrot.lane.b32.xlu0 %v1926_v29, %s1804_s22 }
 0x10e   : > { %1052 = vrot.lane.b32.xlu1 %v1920_v25, %s1805_s23 }
 0x111   : > { %1001 = vrot.lane.b32.xlu0 %v1929_v30, %s1804_s22 }
 0x112   : > { %727 = vrot.lane.b32.xlu1 %v1942_v31, %s1806_s24 }
 0x115   : > { %1050 = vrot.lane.b32.xlu0 %v1926_v29, %s1805_s23 }
 0x116   : > { %743 = vrot.lane.b32.xlu1 %v1945_v32, %s1806_s24 }
 0x119   : > { %1066 = vrot.lane.b32.xlu0 %v1929_v30, %s1805_s23 }
 0x11a   : > { %922 = vrot.lane.b32.xlu1 %v1942_v31, %s1807_s25 }
 0x11d   : > { %725 = vrot.lane.b32.xlu0 %v1948_v34, %s1806_s24 }
 0x11e   : > { %938 = vrot.lane.b32.xlu1 %v1945_v32, %s1807_s25 }
 0x121   : > { %741 = vrot.lane.b32.xlu0 %v1951_v36, %s1806_s24 }
 0x122   : > { %587 = vrot.lane.b32.xlu1 %v1960_v37, %s1800_s15 }
 0x125   : > { %920 = vrot.lane.b32.xlu0 %v1948_v34, %s1807_s25 }
 0x126   : > { %603 = vrot.lane.b32.xlu1 %v1963_v39, %s1800_s15 }
 0x129   : > { %936 = vrot.lane.b32.xlu0 %v1951_v36, %s1807_s25 }
 0x12a   : > { %651 = vrot.lane.b32.xlu1 %v1960_v37, %s1801_s16 }
 0x12d   : > { %601 = vrot.lane.b32.xlu0 %v1975_v42, %s1800_s15 }
 0x12e   : > { %667 = vrot.lane.b32.xlu1 %v1963_v39, %s1801_s16 }
 0x131   : > { %649 = vrot.lane.b32.xlu0 %v1969_v41, %s1801_s16 }
 0x132   : > { %796 = vrot.lane.b32.xlu1 %v1960_v37, %s1802_s17 }
 0x135   : > { %665 = vrot.lane.b32.xlu0 %v1975_v42, %s1801_s16 }
 0x136   : > { %812 = vrot.lane.b32.xlu1 %v1963_v39, %s1802_s17 }
 0x139   : > { %794 = vrot.lane.b32.xlu0 %v1969_v41, %s1802_s17 }
 0x13a   : > { %861 = vrot.lane.b32.xlu1 %v1960_v37, %s1803_s18 }
 0x13d   : > { %810 = vrot.lane.b32.xlu0 %v1975_v42, %s1802_s17 }
 0x13e   : > { %877 = vrot.lane.b32.xlu1 %v1963_v39, %s1803_s18 }
 0x141   : > { %859 = vrot.lane.b32.xlu0 %v1969_v41, %s1803_s18 }
 0x142   : > { %991 = vrot.lane.b32.xlu1 %v1960_v37, %s1804_s22 }
 0x145   : > { %875 = vrot.lane.b32.xlu0 %v1975_v42, %s1803_s18 }
 0x146   : > { %1007 = vrot.lane.b32.xlu1 %v1963_v39, %s1804_s22 }
 0x149   : > { %989 = vrot.lane.b32.xlu0 %v1969_v41, %s1804_s22 }
 0x14a   : > { %1056 = vrot.lane.b32.xlu1 %v1960_v37, %s1805_s23 }
 0x14d   : > { %1005 = vrot.lane.b32.xlu0 %v1975_v42, %s1804_s22 }
 0x14e   : > { %585 = vrot.lane.b32.xlu1 %v1969_v41, %s1800_s15 }
 0x151   : > { %1054 = vrot.lane.b32.xlu0 %v1969_v41, %s1805_s23 }
 0x152   : > { %731 = vrot.lane.b32.xlu1 %v1982_v43, %s1806_s24 }
 0x155   : > { %729 = vrot.lane.b32.xlu0 %v1988_v45, %s1806_s24 }
 0x156   : > { %747 = vrot.lane.b32.xlu1 %v1985_v44, %s1806_s24 }
 0x159   : > { %745 = vrot.lane.b32.xlu0 %v1991_v46, %s1806_s24 }
 0x15a   : > { %926 = vrot.lane.b32.xlu1 %v1982_v43, %s1807_s25 }
 0x15b   : > { %v584_v8 = vpop.permute.xlu0 %583 }
 0x15c   : > { %v600_v7 = vpop.permute.xlu1 %599  ;;  %630 = vst.msk [vmem:[%s2189_s28 + $0x8] sm:$0xff] %vm548_vm1, %v584_v8 }
 0x15d   : > { %638 = vst.msk [vmem:[%s2189_s28 + $0x48] sm:$0xff] %vm548_vm1, %v600_v7  ;;  %924 = vrot.lane.b32.xlu0 %v1988_v45, %s1807_s25 }
 0x15e   : > { %942 = vrot.lane.b32.xlu1 %v1985_v44, %s1807_s25 }
 0x15f   : > { %v582_v10 = vpop.permute.xlu0 %581 }
 0x160   : > { %v648_v9 = vpop.permute.xlu1 %647  ;;  %629 = vst.msk [vmem:[%s2189_s28] sm:$0xff] %vm548_vm1, %v582_v10 }
 0x161   : > { %694 = vst.msk [vmem:[%s2203_s6 + $0x8] sm:$0xff] %vm548_vm1, %v648_v9  ;;  %940 = vrot.lane.b32.xlu0 %v1991_v46, %s1807_s25 }
 0x162   : > { %591 = vrot.lane.b32.xlu1 %v2000_v49, %s1800_s15 }
 0x163   : > { %v598_v12 = vpop.permute.xlu0 %597 }
 0x164   : > { %v664_v11 = vpop.permute.xlu1 %663  ;;  %637 = vst.msk [vmem:[%s2189_s28 + $0x40] sm:$0xff] %vm548_vm1, %v598_v12 }
 0x165   : > { %702 = vst.msk [vmem:[%s2203_s6 + $0x48] sm:$0xff] %vm548_vm1, %v664_v11  ;;  %589 = vrot.lane.b32.xlu0 %v2012_v53, %s1800_s15 }
 0x166   : > { %607 = vrot.lane.b32.xlu1 %v2003_v51, %s1800_s15 }
 0x167   : > { %v646_v14 = vpop.permute.xlu0 %645 }
 0x168   : > { %v793_v13 = vpop.permute.xlu1 %792  ;;  %693 = vst.msk [vmem:[%s2203_s6] sm:$0xff] %vm548_vm1, %v646_v14 }
 0x169   : > { %1544 = vst.msk [vmem:[%s2189_s28 + $0x88] sm:$0xff] %vm548_vm1, %v793_v13  ;;  %605 = vrot.lane.b32.xlu0 %v2015_v54, %s1800_s15 }
 0x16a   : > { %655 = vrot.lane.b32.xlu1 %v2000_v49, %s1801_s16 }
 0x16b   : > { %v662_v16 = vpop.permute.xlu0 %661 }
 0x16c   : > { %v809_v15 = vpop.permute.xlu1 %808  ;;  %701 = vst.msk [vmem:[%s2203_s6 + $0x40] sm:$0xff] %vm548_vm1, %v662_v16 }
 0x16d   : > { %1552 = vst.msk [vmem:[%s2189_s28 + $0xc8] sm:$0xff] %vm548_vm1, %v809_v15  ;;  %653 = vrot.lane.b32.xlu0 %v2012_v53, %s1801_s16 }
 0x16e   : > { %671 = vrot.lane.b32.xlu1 %v2003_v51, %s1801_s16 }
 0x16f   : > { %v791_v18 = vpop.permute.xlu0 %790 }
 0x170   : > { %v858_v17 = vpop.permute.xlu1 %857  ;;  %1543 = vst.msk [vmem:[%s2189_s28 + $0x80] sm:$0xff] %vm548_vm1, %v791_v18 }
 0x171   : > { %1560 = vst.msk [vmem:[%s2203_s6 + $0x88] sm:$0xff] %vm548_vm1, %v858_v17  ;;  %669 = vrot.lane.b32.xlu0 %v2015_v54, %s1801_s16 }
 0x172   : > { %800 = vrot.lane.b32.xlu1 %v2000_v49, %s1802_s17 }
 0x173   : > { %v807_v20 = vpop.permute.xlu0 %806 }
 0x174   : > { %v874_v19 = vpop.permute.xlu1 %873  ;;  %1551 = vst.msk [vmem:[%s2189_s28 + $0xc0] sm:$0xff] %vm548_vm1, %v807_v20 }
 0x175   : > { %1568 = vst.msk [vmem:[%s2203_s6 + $0xc8] sm:$0xff] %vm548_vm1, %v874_v19  ;;  %798 = vrot.lane.b32.xlu0 %v2012_v53, %s1802_s17 }
 0x176   : > { %816 = vrot.lane.b32.xlu1 %v2003_v51, %s1802_s17 }
 0x177   : > { %v856_v22 = vpop.permute.xlu0 %855 }
 0x178   : > { %v988_v21 = vpop.permute.xlu1 %987  ;;  %1559 = vst.msk [vmem:[%s2203_s6 + $0x80] sm:$0xff] %vm548_vm1, %v856_v22 }
 0x179   : > { %1592 = vst.msk [vmem:[%s2189_s28 + $0x108] sm:$0xff] %vm548_vm1, %v988_v21  ;;  %814 = vrot.lane.b32.xlu0 %v2015_v54, %s1802_s17 }
 0x17a   : > { %865 = vrot.lane.b32.xlu1 %v2000_v49, %s1803_s18 }
 0x17b   : > { %v872_v24 = vpop.permute.xlu0 %871 }
 0x17c   : > { %v1004_v23 = vpop.permute.xlu1 %1003  ;;  %1567 = vst.msk [vmem:[%s2203_s6 + $0xc0] sm:$0xff] %vm548_vm1, %v872_v24 }
 0x17d   : > { %1600 = vst.msk [vmem:[%s2189_s28 + $0x148] sm:$0xff] %vm548_vm1, %v1004_v23  ;;  %863 = vrot.lane.b32.xlu0 %v2012_v53, %s1803_s18 }
 0x17e   : > { %881 = vrot.lane.b32.xlu1 %v2003_v51, %s1803_s18 }
 0x17f   : > { %v986_v28 = vpop.permute.xlu0 %985 }
 0x180   : > { %v1053_v27 = vpop.permute.xlu1 %1052  ;;  %1591 = vst.msk [vmem:[%s2189_s28 + $0x100] sm:$0xff] %vm548_vm1, %v986_v28 }
 0x181   : > { %1608 = vst.msk [vmem:[%s2203_s6 + $0x108] sm:$0xff] %vm548_vm1, %v1053_v27  ;;  %879 = vrot.lane.b32.xlu0 %v2015_v54, %s1803_s18 }
 0x182   : > { %995 = vrot.lane.b32.xlu1 %v2000_v49, %s1804_s22 }
 0x183   : > { %v1002_v35 = vpop.permute.xlu0 %1001 }
 0x184   : > { %v728_v33 = vpop.permute.xlu1 %727  ;;  %1599 = vst.msk [vmem:[%s2189_s28 + $0x140] sm:$0xff] %vm548_vm1, %v1002_v35 }
 0x185   : > { %1528 = vst.msk [vmem:[%s1935_s14 + $0x88] sm:$0xff] %vm548_vm1, %v728_v33  ;;  %993 = vrot.lane.b32.xlu0 %v2012_v53, %s1804_s22 }
 0x186   : > { %1011 = vrot.lane.b32.xlu1 %v2003_v51, %s1804_s22 }
 0x187   : > { %v1051_v40 = vpop.permute.xlu0 %1050 }
 0x188   : > { %v744_v38 = vpop.permute.xlu1 %743  ;;  %1607 = vst.msk [vmem:[%s2203_s6 + $0x100] sm:$0xff] %vm548_vm1, %v1051_v40 }
 0x189   : > { %1536 = vst.msk [vmem:[%s1935_s14 + $0xc8] sm:$0xff] %vm548_vm1, %v744_v38  ;;  %1009 = vrot.lane.b32.xlu0 %v2015_v54, %s1804_s22 }
 0x18a   : > { %1060 = vrot.lane.b32.xlu1 %v2000_v49, %s1805_s23 }
 0x18b   : > { %v1067_v48 = vpop.permute.xlu0 %1066 }
 0x18c   : > { %v923_v47 = vpop.permute.xlu1 %922  ;;  %1615 = vst.msk [vmem:[%s2203_s6 + $0x140] sm:$0xff] %vm548_vm1, %v1067_v48 }
 0x18d   : > { %1576 = vst.msk [vmem:[%s1935_s14 + $0x108] sm:$0xff] %vm548_vm1, %v923_v47  ;;  %1058 = vrot.lane.b32.xlu0 %v2012_v53, %s1805_s23 }
 0x18e   : > { %735 = vrot.lane.b32.xlu1 %v2022_v55, %s1806_s24 }
 0x18f   : > { %v726_v52 = vpop.permute.xlu0 %725 }
 0x190   : > { %v939_v50 = vpop.permute.xlu1 %938  ;;  %1527 = vst.msk [vmem:[%s1935_s14 + $0x80] sm:$0xff] %vm548_vm1, %v726_v52 }
 0x191   : > { %1584 = vst.msk [vmem:[%s1935_s14 + $0x148] sm:$0xff] %vm548_vm1, %v939_v50  ;;  %733 = vrot.lane.b32.xlu0 %v2028_v57, %s1806_s24 }
 0x192   : > { %751 = vrot.lane.b32.xlu1 %v2025_v56, %s1806_s24 }
 0x193   : > { %v742_v61 = vpop.permute.xlu0 %741 }
 0x194   : > { %v588_v59 = vpop.permute.xlu1 %587  ;;  %1535 = vst.msk [vmem:[%s1935_s14 + $0xc0] sm:$0xff] %vm548_vm1, %v742_v61 }
 0x195   : > { %632 = vst.msk [vmem:[%s2189_s28 + $0x18] sm:$0xff] %vm548_vm1, %v588_v59  ;;  %749 = vrot.lane.b32.xlu0 %v2031_v58, %s1806_s24 }
 0x196   : > { %930 = vrot.lane.b32.xlu1 %v2022_v55, %s1807_s25 }
 0x197   : > { %v921_v1 = vpop.permute.xlu0 %920 }
 0x198   : > { %v604_v63 = vpop.permute.xlu1 %603  ;;  %1575 = vst.msk [vmem:[%s1935_s14 + $0x100] sm:$0xff] %vm548_vm1, %v921_v1 }
 0x199   : > { %640 = vst.msk [vmem:[%s2189_s28 + $0x58] sm:$0xff] %vm548_vm1, %v604_v63  ;;  %928 = vrot.lane.b32.xlu0 %v2028_v57, %s1807_s25 }
 0x19a   : > { %946 = vrot.lane.b32.xlu1 %v2025_v56, %s1807_s25 }
 0x19b   : > { %v937_v8 = vpop.permute.xlu0 %936 }
 0x19c   : > { %v652_v7 = vpop.permute.xlu1 %651  ;;  %1583 = vst.msk [vmem:[%s1935_s14 + $0x140] sm:$0xff] %vm548_vm1, %v937_v8 }
 0x19d   : > { %696 = vst.msk [vmem:[%s2203_s6 + $0x18] sm:$0xff] %vm548_vm1, %v652_v7  ;;  %944 = vrot.lane.b32.xlu0 %v2031_v58, %s1807_s25 }
 0x19e   : > { %595 = vrot.lane.b32.xlu1 %v2086_v60, %s1800_s15 }
 0x19f   : > { %v602_v10 = vpop.permute.xlu0 %601 }
 0x1a0   : > { %v668_v9 = vpop.permute.xlu1 %667  ;;  %639 = vst.msk [vmem:[%s2189_s28 + $0x50] sm:$0xff] %vm548_vm1, %v602_v10 }
 0x1a1   : > { %704 = vst.msk [vmem:[%s2203_s6 + $0x58] sm:$0xff] %vm548_vm1, %v668_v9  ;;  %593 = vrot.lane.b32.xlu0 %v2089_v62, %s1800_s15 }
 0x1a2   : > { %611 = vrot.lane.b32.xlu1 %v2096_v0, %s1800_s15 }
 0x1a3   : > { %v650_v12 = vpop.permute.xlu0 %649 }
 0x1a4   : > { %v797_v11 = vpop.permute.xlu1 %796  ;;  %695 = vst.msk [vmem:[%s2203_s6 + $0x10] sm:$0xff] %vm548_vm1, %v650_v12 }
 0x1a5   : > { %1546 = vst.msk [vmem:[%s2189_s28 + $0x98] sm:$0xff] %vm548_vm1, %v797_v11  ;;  %609 = vrot.lane.b32.xlu0 %v2105_v4, %s1800_s15 }
 0x1a6   : > { %659 = vrot.lane.b32.xlu1 %v2086_v60, %s1801_s16 }
 0x1a7   : > { %v666_v14 = vpop.permute.xlu0 %665 }
 0x1a8   : > { %v813_v13 = vpop.permute.xlu1 %812  ;;  %703 = vst.msk [vmem:[%s2203_s6 + $0x50] sm:$0xff] %vm548_vm1, %v666_v14 }
 0x1a9   : > { %1554 = vst.msk [vmem:[%s2189_s28 + $0xd8] sm:$0xff] %vm548_vm1, %v813_v13  ;;  %657 = vrot.lane.b32.xlu0 %v2089_v62, %s1801_s16 }
 0x1aa   : > { %675 = vrot.lane.b32.xlu1 %v2096_v0, %s1801_s16 }
 0x1ab   : > { %v795_v16 = vpop.permute.xlu0 %794 }
 0x1ac   : > { %v862_v15 = vpop.permute.xlu1 %861  ;;  %1545 = vst.msk [vmem:[%s2189_s28 + $0x90] sm:$0xff] %vm548_vm1, %v795_v16 }
 0x1ad   : > { %1562 = vst.msk [vmem:[%s2203_s6 + $0x98] sm:$0xff] %vm548_vm1, %v862_v15  ;;  %673 = vrot.lane.b32.xlu0 %v2105_v4, %s1801_s16 }
 0x1ae   : > { %804 = vrot.lane.b32.xlu1 %v2086_v60, %s1802_s17 }
 0x1af   : > { %v811_v18 = vpop.permute.xlu0 %810 }
 0x1b0   : > { %v878_v17 = vpop.permute.xlu1 %877  ;;  %1553 = vst.msk [vmem:[%s2189_s28 + $0xd0] sm:$0xff] %vm548_vm1, %v811_v18 }
 0x1b1   : > { %1570 = vst.msk [vmem:[%s2203_s6 + $0xd8] sm:$0xff] %vm548_vm1, %v878_v17  ;;  %802 = vrot.lane.b32.xlu0 %v2089_v62, %s1802_s17 }
 0x1b2   : > { %820 = vrot.lane.b32.xlu1 %v2096_v0, %s1802_s17 }
 0x1b3   : > { %v860_v20 = vpop.permute.xlu0 %859 }
 0x1b4   : > { %v992_v19 = vpop.permute.xlu1 %991  ;;  %1561 = vst.msk [vmem:[%s2203_s6 + $0x90] sm:$0xff] %vm548_vm1, %v860_v20 }
 0x1b5   : > { %1594 = vst.msk [vmem:[%s2189_s28 + $0x118] sm:$0xff] %vm548_vm1, %v992_v19  ;;  %818 = vrot.lane.b32.xlu0 %v2105_v4, %s1802_s17 }
 0x1b6   : > { %869 = vrot.lane.b32.xlu1 %v2086_v60, %s1803_s18 }
 0x1b7   : > { %v876_v22 = vpop.permute.xlu0 %875 }
 0x1b8   : > { %v1008_v21 = vpop.permute.xlu1 %1007  ;;  %1569 = vst.msk [vmem:[%s2203_s6 + $0xd0] sm:$0xff] %vm548_vm1, %v876_v22 }
 0x1b9   : > { %1602 = vst.msk [vmem:[%s2189_s28 + $0x158] sm:$0xff] %vm548_vm1, %v1008_v21  ;;  %867 = vrot.lane.b32.xlu0 %v2089_v62, %s1803_s18 }
 0x1ba   : > { %885 = vrot.lane.b32.xlu1 %v2096_v0, %s1803_s18 }
 0x1bb   : > { %v990_v24 = vpop.permute.xlu0 %989 }
 0x1bc   : > { %v1057_v23 = vpop.permute.xlu1 %1056  ;;  %1593 = vst.msk [vmem:[%s2189_s28 + $0x110] sm:$0xff] %vm548_vm1, %v990_v24 }
 0x1bd   : > { %1610 = vst.msk [vmem:[%s2203_s6 + $0x118] sm:$0xff] %vm548_vm1, %v1057_v23  ;;  %883 = vrot.lane.b32.xlu0 %v2105_v4, %s1803_s18 }
 0x1be   : > { %999 = vrot.lane.b32.xlu1 %v2086_v60, %s1804_s22 }
 0x1bf   : > { %v1006_v28 = vpop.permute.xlu0 %1005 }
 0x1c0   : > { %v586_v27 = vpop.permute.xlu1 %585  ;;  %1601 = vst.msk [vmem:[%s2189_s28 + $0x150] sm:$0xff] %vm548_vm1, %v1006_v28 }
 0x1c1   : > { %631 = vst.msk [vmem:[%s2189_s28 + $0x10] sm:$0xff] %vm548_vm1, %v586_v27  ;;  %997 = vrot.lane.b32.xlu0 %v2089_v62, %s1804_s22 }
 0x1c2   : > { %1015 = vrot.lane.b32.xlu1 %v2096_v0, %s1804_s22 }
 0x1c3   : > { %v1055_v35 = vpop.permute.xlu0 %1054 }
 0x1c4   : > { %v732_v33 = vpop.permute.xlu1 %731  ;;  %1609 = vst.msk [vmem:[%s2203_s6 + $0x110] sm:$0xff] %vm548_vm1, %v1055_v35 }
 0x1c5   : > { %1530 = vst.msk [vmem:[%s1935_s14 + $0x98] sm:$0xff] %vm548_vm1, %v732_v33  ;;  %1013 = vrot.lane.b32.xlu0 %v2105_v4, %s1804_s22 }
 0x1c6   : > { %1064 = vrot.lane.b32.xlu1 %v2086_v60, %s1805_s23 }
 0x1c7   : > { %v730_v40 = vpop.permute.xlu0 %729 }
 0x1c8   : > { %v748_v38 = vpop.permute.xlu1 %747  ;;  %1529 = vst.msk [vmem:[%s1935_s14 + $0x90] sm:$0xff] %vm548_vm1, %v730_v40 }
 0x1c9   : > { %1538 = vst.msk [vmem:[%s1935_s14 + $0xd8] sm:$0xff] %vm548_vm1, %v748_v38  ;;  %1062 = vrot.lane.b32.xlu0 %v2089_v62, %s1805_s23 }
 0x1ca   : > { %739 = vrot.lane.b32.xlu1 %v2099_v2, %s1806_s24 }
 0x1cb   : > { %v746_v48 = vpop.permute.xlu0 %745 }
 0x1cc   : > { %v927_v47 = vpop.permute.xlu1 %926  ;;  %1537 = vst.msk [vmem:[%s1935_s14 + $0xd0] sm:$0xff] %vm548_vm1, %v746_v48 }
 0x1cd   : > { %1578 = vst.msk [vmem:[%s1935_s14 + $0x118] sm:$0xff] %vm548_vm1, %v927_v47  ;;  %737 = vrot.lane.b32.xlu0 %v2102_v3, %s1806_s24 }
 0x1ce   : > { %755 = vrot.lane.b32.xlu1 %v2118_v5, %s1806_s24 }
 0x1cf   : > { %v925_v52 = vpop.permute.xlu0 %924 }
 0x1d0   : > { %v943_v50 = vpop.permute.xlu1 %942  ;;  %1577 = vst.msk [vmem:[%s1935_s14 + $0x110] sm:$0xff] %vm548_vm1, %v925_v52 }
 0x1d1   : > { %1586 = vst.msk [vmem:[%s1935_s14 + $0x158] sm:$0xff] %vm548_vm1, %v943_v50  ;;  %753 = vrot.lane.b32.xlu0 %v2121_v6, %s1806_s24 }
 0x1d2   : > { %934 = vrot.lane.b32.xlu1 %v2099_v2, %s1807_s25 }
 0x1d3   : > { %v941_v61 = vpop.permute.xlu0 %940 }
 0x1d4   : > { %v592_v59 = vpop.permute.xlu1 %591  ;;  %1585 = vst.msk [vmem:[%s1935_s14 + $0x150] sm:$0xff] %vm548_vm1, %v941_v61 }
 0x1d5   : > { %634 = vst.msk [vmem:[%s2189_s28 + $0x28] sm:$0xff] %vm548_vm1, %v592_v59  ;;  %932 = vrot.lane.b32.xlu0 %v2102_v3, %s1807_s25 }
 0x1d6   : > { %950 = vrot.lane.b32.xlu1 %v2118_v5, %s1807_s25 }
 0x1d7   : > { %v590_v1 = vpop.permute.xlu0 %589 }
 0x1d8   : > { %v608_v63 = vpop.permute.xlu1 %607  ;;  %633 = vst.msk [vmem:[%s2189_s28 + $0x20] sm:$0xff] %vm548_vm1, %v590_v1 }
 0x1d9   : > { %642 = vst.msk [vmem:[%s2189_s28 + $0x68] sm:$0xff] %vm548_vm1, %v608_v63  ;;  %948 = vrot.lane.b32.xlu0 %v2121_v6, %s1807_s25 }
 0x1da   : > { %1068 = vrot.lane.b32.xlu1 %v1923_v26, %s1805_s23 }
 0x1db   : > { %v606_v8 = vpop.permute.xlu0 %605 }
 0x1dc   : > { %v656_v7 = vpop.permute.xlu1 %655  ;;  %641 = vst.msk [vmem:[%s2189_s28 + $0x60] sm:$0xff] %vm548_vm1, %v606_v8 }
 0x1dd   : > { %698 = vst.msk [vmem:[%s2203_s6 + $0x28] sm:$0xff] %vm548_vm1, %v656_v7  ;;  %1070 = vrot.lane.b32.xlu0 %v1975_v42, %s1805_s23 }
 0x1de   : > { %1072 = vrot.lane.b32.xlu1 %v1963_v39, %s1805_s23 }
 0x1df   : > { %v654_v10 = vpop.permute.xlu0 %653 }
 0x1e0   : > { %v672_v9 = vpop.permute.xlu1 %671  ;;  %697 = vst.msk [vmem:[%s2203_s6 + $0x20] sm:$0xff] %vm548_vm1, %v654_v10 }
 0x1e1   : > { %706 = vst.msk [vmem:[%s2203_s6 + $0x68] sm:$0xff] %vm548_vm1, %v672_v9  ;;  %1074 = vrot.lane.b32.xlu0 %v2015_v54, %s1805_s23 }
 0x1e2   : > { %1076 = vrot.lane.b32.xlu1 %v2003_v51, %s1805_s23 }
 0x1e3   : > { %v670_v12 = vpop.permute.xlu0 %669 }
 0x1e4   : > { %v801_v11 = vpop.permute.xlu1 %800  ;;  %705 = vst.msk [vmem:[%s2203_s6 + $0x60] sm:$0xff] %vm548_vm1, %v670_v12 }
 0x1e5   : > { %1548 = vst.msk [vmem:[%s2189_s28 + $0xa8] sm:$0xff] %vm548_vm1, %v801_v11  ;;  %1078 = vrot.lane.b32.xlu0 %v2105_v4, %s1805_s23 }
 0x1e6   : > { %1080 = vrot.lane.b32.xlu1 %v2096_v0, %s1805_s23 }
 0x1e7   : > { %v799_v14 = vpop.permute.xlu0 %798 }
 0x1e8   : > { %v817_v13 = vpop.permute.xlu1 %816  ;;  %1547 = vst.msk [vmem:[%s2189_s28 + $0xa0] sm:$0xff] %vm548_vm1, %v799_v14 }
 0x1e9   : > { %1556 = vst.msk [vmem:[%s2189_s28 + $0xe8] sm:$0xff] %vm548_vm1, %v817_v13  ;;  %1115 = vrot.lane.b32.xlu0 %v1948_v34, %s1808_s7 }
 0x1ea   : > { %1117 = vrot.lane.b32.xlu1 %v1942_v31, %s1808_s7 }
 0x1eb   : > { %v815_v16 = vpop.permute.xlu0 %814 }
 0x1ec   : > { %v866_v15 = vpop.permute.xlu1 %865  ;;  %1555 = vst.msk [vmem:[%s2189_s28 + $0xe0] sm:$0xff] %vm548_vm1, %v815_v16 }
 0x1ed   : > { %1564 = vst.msk [vmem:[%s2203_s6 + $0xa8] sm:$0xff] %vm548_vm1, %v866_v15  ;;  %1119 = vrot.lane.b32.xlu0 %v1988_v45, %s1808_s7 }
 0x1ee   : > { %1121 = vrot.lane.b32.xlu1 %v1982_v43, %s1808_s7 }
 0x1ef   : > { %v864_v17 = vpop.permute.xlu0 %863 }
 0x1f0   : > { %v882_v31 = vpop.permute.xlu1 %881  ;;  %1563 = vst.msk [vmem:[%s2203_s6 + $0xa0] sm:$0xff] %vm548_vm1, %v864_v17 }
 0x1f1   : > { %1572 = vst.msk [vmem:[%s2203_s6 + $0xe8] sm:$0xff] %vm548_vm1, %v882_v31  ;;  %1123 = vrot.lane.b32.xlu0 %v2028_v57, %s1808_s7 }
 0x1f2   : > { %1125 = vrot.lane.b32.xlu1 %v2022_v55, %s1808_s7 }
 0x1f3   : > { %v880_v43 = vpop.permute.xlu0 %879 }
 0x1f4   : > { %v996_v34 = vpop.permute.xlu1 %995  ;;  %1571 = vst.msk [vmem:[%s2203_s6 + $0xe0] sm:$0xff] %vm548_vm1, %v880_v43 }
 0x1f5   : > { %1596 = vst.msk [vmem:[%s2189_s28 + $0x128] sm:$0xff] %vm548_vm1, %v996_v34  ;;  %1127 = vrot.lane.b32.xlu0 %v2102_v3, %s1808_s7 }
 0x1f6   : > { %1129 = vrot.lane.b32.xlu1 %v2099_v2, %s1808_s7 }
 0x1f7   : > { %v994_v55 = vpop.permute.xlu0 %993 }
 0x1f8   : > { %v1012_v45 = vpop.permute.xlu1 %1011  ;;  %1595 = vst.msk [vmem:[%s2189_s28 + $0x120] sm:$0xff] %vm548_vm1, %v994_v55 }
 0x1f9   : > { %1604 = vst.msk [vmem:[%s2189_s28 + $0x168] sm:$0xff] %vm548_vm1, %v1012_v45  ;;  %1131 = vrot.lane.b32.xlu0 %v1951_v36, %s1808_s7 }
 0x1fa   : > { %1133 = vrot.lane.b32.xlu1 %v1945_v32, %s1808_s7 }
 0x1fb   : > { %v1010_v2 = vpop.permute.xlu0 %1009 }
 0x1fc   : > { %v1061_v57 = vpop.permute.xlu1 %1060  ;;  %1603 = vst.msk [vmem:[%s2189_s28 + $0x160] sm:$0xff] %vm548_vm1, %v1010_v2 }
 0x1fd   : > { %1612 = vst.msk [vmem:[%s2203_s6 + $0x128] sm:$0xff] %vm548_vm1, %v1061_v57  ;;  %1135 = vrot.lane.b32.xlu0 %v1991_v46, %s1808_s7 }
 0x1fe   : > { %1137 = vrot.lane.b32.xlu1 %v1985_v44, %s1808_s7 }
 0x1ff   : > { %v1059_v3 = vpop.permute.xlu0 %1058 }
 0x200   : > { %v736_v32 = vpop.permute.xlu1 %735  ;;  %1611 = vst.msk [vmem:[%s2203_s6 + $0x120] sm:$0xff] %vm548_vm1, %v1059_v3 }
 0x201   : > { %1532 = vst.msk [vmem:[%s1935_s14 + $0xa8] sm:$0xff] %vm548_vm1, %v736_v32  ;;  %1139 = vrot.lane.b32.xlu0 %v2031_v58, %s1808_s7 }
 0x202   : > { %1141 = vrot.lane.b32.xlu1 %v2025_v56, %s1808_s7 }
 0x203   : > { %v734_v44 = vpop.permute.xlu0 %733 }
 0x204   : > { %v752_v36 = vpop.permute.xlu1 %751  ;;  %1531 = vst.msk [vmem:[%s1935_s14 + $0xa0] sm:$0xff] %vm548_vm1, %v734_v44 }
 0x205   : > { %1540 = vst.msk [vmem:[%s1935_s14 + $0xe8] sm:$0xff] %vm548_vm1, %v752_v36  ;;  %1143 = vrot.lane.b32.xlu0 %v2121_v6, %s1808_s7 }
 0x206   : > { %1145 = vrot.lane.b32.xlu1 %v2118_v5, %s1808_s7 }
 0x207   : > { %v750_v56 = vpop.permute.xlu0 %749 }
 0x208   : > { %v931_v46 = vpop.permute.xlu1 %930  ;;  %1539 = vst.msk [vmem:[%s1935_s14 + $0xe0] sm:$0xff] %vm548_vm1, %v750_v56 }
 0x209   : > { %1580 = vst.msk [vmem:[%s1935_s14 + $0x128] sm:$0xff] %vm548_vm1, %v931_v46  ;;  %1180 = vrot.lane.b32.xlu0 %v1926_v29, %s1809_s8 }
 0x20a   : > { %1182 = vrot.lane.b32.xlu1 %v1920_v25, %s1809_s8 }
 0x20b   : > { %v929_v5 = vpop.permute.xlu0 %928 }
 0x20c   : > { %v947_v58 = vpop.permute.xlu1 %946  ;;  %1579 = vst.msk [vmem:[%s1935_s14 + $0x120] sm:$0xff] %vm548_vm1, %v929_v5 }
 0x20d   : > { %1588 = vst.msk [vmem:[%s1935_s14 + $0x168] sm:$0xff] %vm548_vm1, %v947_v58  ;;  %1184 = vrot.lane.b32.xlu0 %v1969_v41, %s1809_s8 }
 0x20e   : > { %1186 = vrot.lane.b32.xlu1 %v1960_v37, %s1809_s8 }
 0x20f   : > { %v945_v18 = vpop.permute.xlu0 %944 }
 0x210   : > { %v596_v6 = vpop.permute.xlu1 %595  ;;  %1587 = vst.msk [vmem:[%s1935_s14 + $0x160] sm:$0xff] %vm548_vm1, %v945_v18 }
 0x211   : > { %636 = vst.msk [vmem:[%s2189_s28 + $0x38] sm:$0xff] %vm548_vm1, %v596_v6  ;;  %1188 = vrot.lane.b32.xlu0 %v2012_v53, %s1809_s8 }
 0x212   : > { %1190 = vrot.lane.b32.xlu1 %v2000_v49, %s1809_s8 }
 0x213   : > { %v594_v20 = vpop.permute.xlu0 %593 }
 0x214   : > { %v612_v19 = vpop.permute.xlu1 %611  ;;  %635 = vst.msk [vmem:[%s2189_s28 + $0x30] sm:$0xff] %vm548_vm1, %v594_v20 }
 0x215   : > { %644 = vst.msk [vmem:[%s2189_s28 + $0x78] sm:$0xff] %vm548_vm1, %v612_v19  ;;  %1192 = vrot.lane.b32.xlu0 %v2089_v62, %s1809_s8 }
 0x216   : > { %1194 = vrot.lane.b32.xlu1 %v2086_v60, %s1809_s8 }
 0x217   : > { %v610_v22 = vpop.permute.xlu0 %609 }
 0x218   : > { %v660_v21 = vpop.permute.xlu1 %659  ;;  %643 = vst.msk [vmem:[%s2189_s28 + $0x70] sm:$0xff] %vm548_vm1, %v610_v22 }
 0x219   : > { %700 = vst.msk [vmem:[%s2203_s6 + $0x38] sm:$0xff] %vm548_vm1, %v660_v21  ;;  %1196 = vrot.lane.b32.xlu0 %v1929_v30, %s1809_s8 }
 0x21a   : > { %1198 = vrot.lane.b32.xlu1 %v1923_v26, %s1809_s8 }
 0x21b   : > { %v658_v24 = vpop.permute.xlu0 %657 }
 0x21c   : > { %v676_v23 = vpop.permute.xlu1 %675  ;;  %699 = vst.msk [vmem:[%s2203_s6 + $0x30] sm:$0xff] %vm548_vm1, %v658_v24 }
 0x21d   : > { %708 = vst.msk [vmem:[%s2203_s6 + $0x78] sm:$0xff] %vm548_vm1, %v676_v23  ;;  %1200 = vrot.lane.b32.xlu0 %v1975_v42, %s1809_s8 }
 0x21e   : > { %1202 = vrot.lane.b32.xlu1 %v1963_v39, %s1809_s8 }
 0x21f   : > { %v674_v28 = vpop.permute.xlu0 %673 }
 0x220   : > { %v805_v27 = vpop.permute.xlu1 %804  ;;  %707 = vst.msk [vmem:[%s2203_s6 + $0x70] sm:$0xff] %vm548_vm1, %v674_v28 }
 0x221   : > { %1550 = vst.msk [vmem:[%s2189_s28 + $0xb8] sm:$0xff] %vm548_vm1, %v805_v27  ;;  %1204 = vrot.lane.b32.xlu0 %v2015_v54, %s1809_s8 }
 0x222   : > { %1206 = vrot.lane.b32.xlu1 %v2003_v51, %s1809_s8 }
 0x223   : > { %v803_v35 = vpop.permute.xlu0 %802 }
 0x224   : > { %v821_v33 = vpop.permute.xlu1 %820  ;;  %1549 = vst.msk [vmem:[%s2189_s28 + $0xb0] sm:$0xff] %vm548_vm1, %v803_v35 }
 0x225   : > { %1558 = vst.msk [vmem:[%s2189_s28 + $0xf8] sm:$0xff] %vm548_vm1, %v821_v33  ;;  %1208 = vrot.lane.b32.xlu0 %v2105_v4, %s1809_s8 }
 0x226   : > { %1210 = vrot.lane.b32.xlu1 %v2096_v0, %s1809_s8 }
 0x227   : > { %v819_v40 = vpop.permute.xlu0 %818 }
 0x228   : > { %v870_v38 = vpop.permute.xlu1 %869  ;;  %1557 = vst.msk [vmem:[%s2189_s28 + $0xf0] sm:$0xff] %vm548_vm1, %v819_v40 }
 0x229   : > { %1566 = vst.msk [vmem:[%s2203_s6 + $0xb8] sm:$0xff] %vm548_vm1, %v870_v38  ;;  %1245 = vrot.lane.b32.xlu0 %v1926_v29, %s1810_s9 }
 0x22a   : > { %1247 = vrot.lane.b32.xlu1 %v1920_v25, %s1810_s9 }
 0x22b   : > { %v868_v48 = vpop.permute.xlu0 %867 }
 0x22c   : > { %v886_v47 = vpop.permute.xlu1 %885  ;;  %1565 = vst.msk [vmem:[%s2203_s6 + $0xb0] sm:$0xff] %vm548_vm1, %v868_v48 }
 0x22d   : > { %1574 = vst.msk [vmem:[%s2203_s6 + $0xf8] sm:$0xff] %vm548_vm1, %v886_v47  ;;  %1249 = vrot.lane.b32.xlu0 %v1969_v41, %s1810_s9 }
 0x22e   : > { %1251 = vrot.lane.b32.xlu1 %v1960_v37, %s1810_s9 }
 0x22f   : > { %v884_v50 = vpop.permute.xlu0 %883 }
 0x230   : > { %v1000_v25 = vpop.permute.xlu1 %999  ;;  %1573 = vst.msk [vmem:[%s2203_s6 + $0xf0] sm:$0xff] %vm548_vm1, %v884_v50 }
 0x231   : > { %1598 = vst.msk [vmem:[%s2189_s28 + $0x138] sm:$0xff] %vm548_vm1, %v1000_v25  ;;  %1253 = vrot.lane.b32.xlu0 %v2012_v53, %s1810_s9 }
 0x232   : > { %1255 = vrot.lane.b32.xlu1 %v2000_v49, %s1810_s9 }
 0x233   : > { %v998_v37 = vpop.permute.xlu0 %997 }
 0x234   : > { %v1016_v29 = vpop.permute.xlu1 %1015  ;;  %1597 = vst.msk [vmem:[%s2189_s28 + $0x130] sm:$0xff] %vm548_vm1, %v998_v37 }
 0x235   : > { %1606 = vst.msk [vmem:[%s2189_s28 + $0x178] sm:$0xff] %vm548_vm1, %v1016_v29  ;;  %1257 = vrot.lane.b32.xlu0 %v2089_v62, %s1810_s9 }
 0x236   : > { %1259 = vrot.lane.b32.xlu1 %v2086_v60, %s1810_s9 }
 0x237   : > { %v1014_v49 = vpop.permute.xlu0 %1013 }
 0x238   : > { %v1065_v41 = vpop.permute.xlu1 %1064  ;;  %1605 = vst.msk [vmem:[%s2189_s28 + $0x170] sm:$0xff] %vm548_vm1, %v1014_v49 }
 0x239   : > { %1614 = vst.msk [vmem:[%s2203_s6 + $0x138] sm:$0xff] %vm548_vm1, %v1065_v41  ;;  %1261 = vrot.lane.b32.xlu0 %v1929_v30, %s1810_s9 }
 0x23a   : > { %1263 = vrot.lane.b32.xlu1 %v1923_v26, %s1810_s9 }
 0x23b   : > { %v1063_v60 = vpop.permute.xlu0 %1062 }
 0x23c   : > { %v740_v53 = vpop.permute.xlu1 %739  ;;  %1613 = vst.msk [vmem:[%s2203_s6 + $0x130] sm:$0xff] %vm548_vm1, %v1063_v60 }
 0x23d   : > { %1534 = vst.msk [vmem:[%s1935_s14 + $0xb8] sm:$0xff] %vm548_vm1, %v740_v53  ;;  %1265 = vrot.lane.b32.xlu0 %v1975_v42, %s1810_s9 }
 0x23e   : > { %1267 = vrot.lane.b32.xlu1 %v1963_v39, %s1810_s9 }
 0x23f   : > { %v738_v62 = vpop.permute.xlu0 %737 }
 0x240   : > { %v756_v26 = vpop.permute.xlu1 %755  ;;  %1533 = vst.msk [vmem:[%s1935_s14 + $0xb0] sm:$0xff] %vm548_vm1, %v738_v62 }
 0x241   : > { %1542 = vst.msk [vmem:[%s1935_s14 + $0xf8] sm:$0xff] %vm548_vm1, %v756_v26  ;;  %1269 = vrot.lane.b32.xlu0 %v2015_v54, %s1810_s9 }
 0x242   : > { %1271 = vrot.lane.b32.xlu1 %v2003_v51, %s1810_s9 }
 0x243   : > { %v754_v39 = vpop.permute.xlu0 %753 }
 0x244   : > { %v935_v30 = vpop.permute.xlu1 %934  ;;  %1541 = vst.msk [vmem:[%s1935_s14 + $0xf0] sm:$0xff] %vm548_vm1, %v754_v39 }
 0x245   : > { %1582 = vst.msk [vmem:[%s1935_s14 + $0x138] sm:$0xff] %vm548_vm1, %v935_v30  ;;  %1273 = vrot.lane.b32.xlu0 %v2105_v4, %s1810_s9 }
 0x246   : > { %1275 = vrot.lane.b32.xlu1 %v2096_v0, %s1810_s9 }
 0x247   : > { %v933_v51 = vpop.permute.xlu0 %932 }
 0x248   : > { %v951_v42 = vpop.permute.xlu1 %950  ;;  %1581 = vst.msk [vmem:[%s1935_s14 + $0x130] sm:$0xff] %vm548_vm1, %v933_v51 }
 0x249   : > { %1590 = vst.msk [vmem:[%s1935_s14 + $0x178] sm:$0xff] %vm548_vm1, %v951_v42 }
 0x24b   : > { %v949_v52 = vpop.permute.xlu0 %948 }
 0x24c   : > { %v1069_v54 = vpop.permute.xlu1 %1068  ;;  %1589 = vst.msk [vmem:[%s1935_s14 + $0x170] sm:$0xff] %vm548_vm1, %v949_v52 }
 0x24d   : > { %1616 = vst.msk [vmem:[%s2203_s6 + $0x148] sm:$0xff] %vm548_vm1, %v1069_v54 }
 0x24f   : > { %v1071_v59 = vpop.permute.xlu0 %1070 }
 0x250   : > { %v1073_v0 = vpop.permute.xlu1 %1072  ;;  %1617 = vst.msk [vmem:[%s2203_s6 + $0x150] sm:$0xff] %vm548_vm1, %v1071_v59 }
 0x251   : > { %1618 = vst.msk [vmem:[%s2203_s6 + $0x158] sm:$0xff] %vm548_vm1, %v1073_v0 }
 0x253   : > { %v1075_v61 = vpop.permute.xlu0 %1074 }
 0x254   : > { %v1077_v4 = vpop.permute.xlu1 %1076  ;;  %1619 = vst.msk [vmem:[%s2203_s6 + $0x160] sm:$0xff] %vm548_vm1, %v1075_v61 }
 0x255   : > { %1620 = vst.msk [vmem:[%s2203_s6 + $0x168] sm:$0xff] %vm548_vm1, %v1077_v4 }
 0x257   : > { %v1079_v1 = vpop.permute.xlu0 %1078 }
 0x258   : > { %v1081_v63 = vpop.permute.xlu1 %1080  ;;  %1621 = vst.msk [vmem:[%s2203_s6 + $0x170] sm:$0xff] %vm548_vm1, %v1079_v1 }
 0x259   : > { %1622 = vst.msk [vmem:[%s2203_s6 + $0x178] sm:$0xff] %vm548_vm1, %v1081_v63 }
 0x25b   : > { %v1116_v8 = vpop.permute.xlu0 %1115 }
 0x25c   : > { %v1118_v7 = vpop.permute.xlu1 %1117  ;;  %1623 = vst.msk [vmem:[%s1935_s14 + $0x180] sm:$0xff] %vm548_vm1, %v1116_v8 }
 0x25d   : > { %1624 = vst.msk [vmem:[%s1935_s14 + $0x188] sm:$0xff] %vm548_vm1, %v1118_v7 }
 0x25f   : > { %v1120_v10 = vpop.permute.xlu0 %1119 }
 0x260   : > { %v1122_v9 = vpop.permute.xlu1 %1121  ;;  %1625 = vst.msk [vmem:[%s1935_s14 + $0x190] sm:$0xff] %vm548_vm1, %v1120_v10 }
 0x261   : > { %1626 = vst.msk [vmem:[%s1935_s14 + $0x198] sm:$0xff] %vm548_vm1, %v1122_v9 }
 0x263   : > { %v1124_v12 = vpop.permute.xlu0 %1123 }
 0x264   : > { %v1126_v11 = vpop.permute.xlu1 %1125  ;;  %1627 = vst.msk [vmem:[%s1935_s14 + $0x1a0] sm:$0xff] %vm548_vm1, %v1124_v12 }
 0x265   : > { %1628 = vst.msk [vmem:[%s1935_s14 + $0x1a8] sm:$0xff] %vm548_vm1, %v1126_v11 }
 0x267   : > { %v1128_v14 = vpop.permute.xlu0 %1127 }
 0x268   : > { %v1130_v13 = vpop.permute.xlu1 %1129  ;;  %1629 = vst.msk [vmem:[%s1935_s14 + $0x1b0] sm:$0xff] %vm548_vm1, %v1128_v14 }
 0x269   : > { %1630 = vst.msk [vmem:[%s1935_s14 + $0x1b8] sm:$0xff] %vm548_vm1, %v1130_v13 }
 0x26b   : > { %v1132_v16 = vpop.permute.xlu0 %1131 }
 0x26c   : > { %v1134_v15 = vpop.permute.xlu1 %1133  ;;  %1631 = vst.msk [vmem:[%s1935_s14 + $0x1c0] sm:$0xff] %vm548_vm1, %v1132_v16 }
 0x26d   : > { %1632 = vst.msk [vmem:[%s1935_s14 + $0x1c8] sm:$0xff] %vm548_vm1, %v1134_v15 }
 0x26f   : > { %v1136_v17 = vpop.permute.xlu0 %1135 }
 0x270   : > { %v1138_v31 = vpop.permute.xlu1 %1137  ;;  %1633 = vst.msk [vmem:[%s1935_s14 + $0x1d0] sm:$0xff] %vm548_vm1, %v1136_v17 }
 0x271   : > { %1634 = vst.msk [vmem:[%s1935_s14 + $0x1d8] sm:$0xff] %vm548_vm1, %v1138_v31 }
 0x273   : > { %v1140_v43 = vpop.permute.xlu0 %1139 }
 0x274   : > { %v1142_v34 = vpop.permute.xlu1 %1141  ;;  %1635 = vst.msk [vmem:[%s1935_s14 + $0x1e0] sm:$0xff] %vm548_vm1, %v1140_v43 }
 0x275   : > { %1636 = vst.msk [vmem:[%s1935_s14 + $0x1e8] sm:$0xff] %vm548_vm1, %v1142_v34 }
 0x277   : > { %v1144_v55 = vpop.permute.xlu0 %1143 }
 0x278   : > { %v1146_v45 = vpop.permute.xlu1 %1145  ;;  %1637 = vst.msk [vmem:[%s1935_s14 + $0x1f0] sm:$0xff] %vm548_vm1, %v1144_v55 }
 0x279   : > { %1638 = vst.msk [vmem:[%s1935_s14 + $0x1f8] sm:$0xff] %vm548_vm1, %v1146_v45 }
 0x27b   : > { %v1181_v2 = vpop.permute.xlu0 %1180 }
 0x27c   : > { %v1183_v57 = vpop.permute.xlu1 %1182  ;;  %1639 = vst.msk [vmem:[%s2189_s28 + $0x180] sm:$0xff] %vm548_vm1, %v1181_v2 }
 0x27d   : > { %1640 = vst.msk [vmem:[%s2189_s28 + $0x188] sm:$0xff] %vm548_vm1, %v1183_v57 }
 0x27f   : > { %v1185_v3 = vpop.permute.xlu0 %1184 }
 0x280   : > { %v1187_v32 = vpop.permute.xlu1 %1186  ;;  %1641 = vst.msk [vmem:[%s2189_s28 + $0x190] sm:$0xff] %vm548_vm1, %v1185_v3 }
 0x281   : > { %1642 = vst.msk [vmem:[%s2189_s28 + $0x198] sm:$0xff] %vm548_vm1, %v1187_v32 }
 0x283   : > { %v1189_v44 = vpop.permute.xlu0 %1188 }
 0x284   : > { %v1191_v36 = vpop.permute.xlu1 %1190  ;;  %1643 = vst.msk [vmem:[%s2189_s28 + $0x1a0] sm:$0xff] %vm548_vm1, %v1189_v44 }
 0x285   : > { %1644 = vst.msk [vmem:[%s2189_s28 + $0x1a8] sm:$0xff] %vm548_vm1, %v1191_v36 }
 0x287   : > { %v1193_v56 = vpop.permute.xlu0 %1192 }
 0x288   : > { %v1195_v46 = vpop.permute.xlu1 %1194  ;;  %1645 = vst.msk [vmem:[%s2189_s28 + $0x1b0] sm:$0xff] %vm548_vm1, %v1193_v56 }
 0x289   : > { %1646 = vst.msk [vmem:[%s2189_s28 + $0x1b8] sm:$0xff] %vm548_vm1, %v1195_v46 }
 0x28b   : > { %v1197_v5 = vpop.permute.xlu0 %1196 }
 0x28c   : > { %v1199_v58 = vpop.permute.xlu1 %1198  ;;  %1647 = vst.msk [vmem:[%s2189_s28 + $0x1c0] sm:$0xff] %vm548_vm1, %v1197_v5 }
 0x28d   : > { %1648 = vst.msk [vmem:[%s2189_s28 + $0x1c8] sm:$0xff] %vm548_vm1, %v1199_v58 }
 0x28f   : > { %v1201_v18 = vpop.permute.xlu0 %1200 }
 0x290   : > { %v1203_v6 = vpop.permute.xlu1 %1202  ;;  %1649 = vst.msk [vmem:[%s2189_s28 + $0x1d0] sm:$0xff] %vm548_vm1, %v1201_v18 }
 0x291   : > { %1650 = vst.msk [vmem:[%s2189_s28 + $0x1d8] sm:$0xff] %vm548_vm1, %v1203_v6 }
 0x293   : > { %v1205_v20 = vpop.permute.xlu0 %1204 }
 0x294   : > { %v1207_v19 = vpop.permute.xlu1 %1206  ;;  %1651 = vst.msk [vmem:[%s2189_s28 + $0x1e0] sm:$0xff] %vm548_vm1, %v1205_v20 }
 0x295   : > { %1652 = vst.msk [vmem:[%s2189_s28 + $0x1e8] sm:$0xff] %vm548_vm1, %v1207_v19 }
 0x297   : > { %v1209_v22 = vpop.permute.xlu0 %1208 }
 0x298   : > { %v1211_v21 = vpop.permute.xlu1 %1210  ;;  %1653 = vst.msk [vmem:[%s2189_s28 + $0x1f0] sm:$0xff] %vm548_vm1, %v1209_v22 }
 0x299   : > { %1654 = vst.msk [vmem:[%s2189_s28 + $0x1f8] sm:$0xff] %vm548_vm1, %v1211_v21 }
 0x29b   : > { %v1246_v24 = vpop.permute.xlu0 %1245 }
 0x29c   : > { %v1248_v23 = vpop.permute.xlu1 %1247  ;;  %1655 = vst.msk [vmem:[%s2203_s6 + $0x180] sm:$0xff] %vm548_vm1, %v1246_v24 }
 0x29d   : > { %1656 = vst.msk [vmem:[%s2203_s6 + $0x188] sm:$0xff] %vm548_vm1, %v1248_v23 }
 0x29f   : > { %v1250_v28 = vpop.permute.xlu0 %1249 }
 0x2a0   : > { %v1252_v27 = vpop.permute.xlu1 %1251  ;;  %1657 = vst.msk [vmem:[%s2203_s6 + $0x190] sm:$0xff] %vm548_vm1, %v1250_v28 }
 0x2a1   : > { %1658 = vst.msk [vmem:[%s2203_s6 + $0x198] sm:$0xff] %vm548_vm1, %v1252_v27 }
 0x2a3   : > { %v1254_v35 = vpop.permute.xlu0 %1253 }
 0x2a4   : > { %v1256_v33 = vpop.permute.xlu1 %1255  ;;  %1659 = vst.msk [vmem:[%s2203_s6 + $0x1a0] sm:$0xff] %vm548_vm1, %v1254_v35 }
 0x2a5   : > { %1660 = vst.msk [vmem:[%s2203_s6 + $0x1a8] sm:$0xff] %vm548_vm1, %v1256_v33 }
 0x2a7   : > { %v1258_v40 = vpop.permute.xlu0 %1257 }
 0x2a8   : > { %v1260_v38 = vpop.permute.xlu1 %1259  ;;  %1661 = vst.msk [vmem:[%s2203_s6 + $0x1b0] sm:$0xff] %vm548_vm1, %v1258_v40 }
 0x2a9   : > { %1662 = vst.msk [vmem:[%s2203_s6 + $0x1b8] sm:$0xff] %vm548_vm1, %v1260_v38 }
 0x2ab   : > { %v1262_v48 = vpop.permute.xlu0 %1261 }
 0x2ac   : > { %v1264_v47 = vpop.permute.xlu1 %1263  ;;  %1663 = vst.msk [vmem:[%s2203_s6 + $0x1c0] sm:$0xff] %vm548_vm1, %v1262_v48 }
 0x2ad   : > { %1664 = vst.msk [vmem:[%s2203_s6 + $0x1c8] sm:$0xff] %vm548_vm1, %v1264_v47 }
 0x2af   : > { %v1266_v50 = vpop.permute.xlu0 %1265 }
 0x2b0   : > { %v1268_v25 = vpop.permute.xlu1 %1267  ;;  %1665 = vst.msk [vmem:[%s2203_s6 + $0x1d0] sm:$0xff] %vm548_vm1, %v1266_v50 }
 0x2b1   : > { %1666 = vst.msk [vmem:[%s2203_s6 + $0x1d8] sm:$0xff] %vm548_vm1, %v1268_v25 }
 0x2b3   : > { %v1270_v37 = vpop.permute.xlu0 %1269 }
 0x2b4   : > { %v1272_v29 = vpop.permute.xlu1 %1271  ;;  %1667 = vst.msk [vmem:[%s2203_s6 + $0x1e0] sm:$0xff] %vm548_vm1, %v1270_v37 }
 0x2b5   : > { %1668 = vst.msk [vmem:[%s2203_s6 + $0x1e8] sm:$0xff] %vm548_vm1, %v1272_v29 }
 0x2b7   : > { %v1274_v49 = vpop.permute.xlu0 %1273 }
 0x2b8   : > { %v1276_v41 = vpop.permute.xlu1 %1275  ;;  %1669 = vst.msk [vmem:[%s2203_s6 + $0x1f0] sm:$0xff] %vm548_vm1, %v1274_v49 }
 0x2b9   : > { %1670 = vst.msk [vmem:[%s2203_s6 + $0x1f8] sm:$0xff] %vm548_vm1, %v1276_v41 }
 0x2ba PF: > { %s16_s20 = sadd.s32 1, %s1798_s20   ;;  %s2800_s18 = smov %s1794_s19 }
 0x2bb   : > { %p13_p5 = scmp.ge.s32.totalorder %s16_s20, 4   ;;  %s2801_s19 = smov %s2803_s21 }
 0x2bd   :  { %15 = sbr.rel (!%p13_p5) target bundleno = 2 (0x2), region = 95 }

// kernel: tpu_custom_call.1
= control target key start
LH: loop header
LB: loop body
LE: loop exit
PB: predicated region body
PF: predicated region fallthrough
CT: control target
= control target key end

     0   :  { %s1841_s18 = smov 0   ;;  %s1843_s19 = smov 0   ;;  %s2794_s0 = inlined_call_operand.vmem [shape: f32[2,128,32], index: 0, kind: input, shape index: {}]   ;;  %s2795_s1 = inlined_call_operand.vmem [shape: f32[32,96], index: 1, kind: input, shape index: {}]   ;;  %s2796_s2 = inlined_call_operand.vmem [shape: f32[1,96], index: 2, kind: input, shape index: {}]   ;;  %s2797_s3 = inlined_call_operand.vmem [shape: f32[2,4,128,8], index: 3, kind: output, shape index: {0}]   ;;  %s2798_s4 = inlined_call_operand.vmem [shape: f32[2,4,128,8], index: 4, kind: output, shape index: {1}]   ;;  %s2799_s5 = inlined_call_operand.vmem [shape: f32[2,4,128,8], index: 5, kind: output, shape index: {2}]  }
   0x1   :  { %s1845_s20 = smov 0  }
   0x2 LB: > { %s28_s21 = sadd.s32 1, %s1794_s19  ;;  %p1501_p0 = scmp.ge.s32.totalorder %s1798_s20, 1  ;;  %s1798_s20 = sphi %s1845_s20, %s16_s20   ;;  %s1794_s19 = sphi %s1843_s19, %s2801_s19   ;;  %s1790_s18 = sphi %s1841_s18, %s2800_s18  }
   0x3   : > { %p30_p1 = scmp.ge.s32.totalorder %s28_s21, 2  ;;  %p217_p2 = scmp.lt.s32.totalorder %s1798_s20, 3 }
   0x5   : > { %s2803_s21 = smov (%p30_p1, %s28_s21), 0  ;;  %p218_p3 = pnand %p1501_p0, %p217_p2 }
   0x6   : > { %v327_v0 = vld [vmem:[%s2795_s1] sm:$0xff] (!%p218_p3)  ;;  %v328_v1 = vld [vmem:[%s2795_s1 + $0x8] sm:$0xff] (!%p218_p3)  ;;  %v329_v2 = vld [vmem:[%s2795_s1 + $0x10] sm:$0xff] (!%p218_p3)  ;;  %p272_p4 = scmp.lt.s32.totalorder (!%p218_p3), %s1790_s18, 1  ;;  %vm338_vm0 = vcmask (!%p218_p3), 261120   ;;  %vm548_vm1 = vcmask (!%p218_p3), 64512  }
   0x7   : > { %221 = sbr.rel (%p218_p3) target bundleno = 698 (0x2ba), region = 32  ;;  %v1729_v3 = vpack.c.bf16 (!%p218_p3), %v328_v1, %v327_v0  ;;  %v330_v4 = vld [vmem:[%s2795_s1 + $0x18] sm:$0xff] (!%p218_p3)  ;;  %v1914_v22 = vld [vmem:[%s2796_s2] ss:$0 sm:$0xff] (!%p218_p3)  ;;  %s1800_s15 = smov (!%p218_p3), 96  }
   0x8   : > { %v1733_v5 = vpack.c.bf16 (!%p218_p3), %v330_v4, %v329_v2  ;;  %s1801_s16 = smov (!%p218_p3), 64   ;;  %s1802_s17 = smov (!%p218_p3), 88  }
   0x9   : > { %1730 = vmatprep.subr.bf16.mxu0 (!%p218_p3), %v1729_v3  ;;  %1737 = vmatprep.subr.bf16.mxu1 (!%p218_p3), %v1729_v3  ;;  %s1804_s22 = smov (!%p218_p3), 80   ;;  %s1805_s23 = smov (!%p218_p3), 48  }
   0xa   : > { %1732 = vmatpush3.bf16.msra.mxu0 (!%p218_p3), %v1729_v3  ;;  %1739 = vmatpush3.bf16.msra.mxu1 (!%p218_p3), %v1729_v3  ;;  %s1806_s24 = smov (!%p218_p3), 120   ;;  %s1807_s25 = smov (!%p218_p3), 112  }
   0xb   : > { %1734 = vmatprep.subr.bf16.mxu0 (!%p218_p3), %v1733_v5  ;;  %1738 = vmatprep.subr.bf16.mxu1 (!%p218_p3), %v1733_v5  ;;  %s1808_s7 = smov (!%p218_p3), 104   ;;  %s1810_s9 = smov (!%p218_p3), 40  }
   0xe   : > { %s2805_s18 = smov (!%p272_p4, %s1790_s18), 1  ;;  %1736 = vmatpush3.bf16.msra.mxu0 %v1733_v5  ;;  %1740 = vmatpush3.bf16.msra.mxu1 %v1733_v5 }
   0xf   : > { %s1673_s30 = sshll.u32 %s2805_s18, 7  ;;  %s1917_s11 = sshll.u32 %s2805_s18, 9 }
  0x10   : > { %s1877_s8 = scalar_lea.vmem %s2794_s0, %s1673_s30  ;;  %s1935_s14 = scalar_lea.vmem %s2797_s3, %s1917_s11 }
  0x11   : > { %v311_v6 = vld [vmem:[%s1877_s8] sm:$0xff]  ;;  %v312_v8 = vld [vmem:[%s1877_s8 + $0x8] sm:$0xff]  ;;  %v313_v10 = vld [vmem:[%s1877_s8 + $0x10] sm:$0xff]  ;;  %s1803_s18 = smov 56   ;;  %s2189_s28 = scalar_lea.vmem %s2798_s4, %s1917_s11 }
  0x12   : > { %v319_v7 = vld [vmem:[%s1877_s8 + $0x40] sm:$0xff]  ;;  %1705 = vmatprep.mubr.msk.f32.mxu0 %vm338_vm0, %v311_v6  ;;  %v320_v9 = vld [vmem:[%s1877_s8 + $0x48] sm:$0xff]  ;;  %v321_v11 = vld [vmem:[%s1877_s8 + $0x50] sm:$0xff]  ;;  %s2203_s6 = scalar_lea.vmem %s2799_s5, %s1917_s11 }
  0x13   : > { %1717 = vmatprep.mubr.msk.f32.mxu1 %vm338_vm0, %v319_v7  ;;  %1706 = vmatmul.mubr.msk.f32.vlgmr.msra.gmra.mrb[0].mxu0 %vm338_vm0, %v312_v8  ;;  %v314_v12 = vld [vmem:[%s1877_s8 + $0x18] sm:$0xff]  ;;  %v315_v14 = vld [vmem:[%s1877_s8 + $0x20] sm:$0xff]  ;;  %v316_v16 = vld [vmem:[%s1877_s8 + $0x28] sm:$0xff] }
  0x14   : > { %1718 = vmatmul.mubr.msk.f32.vlgmr.msra.gmra.mrb[0].mxu1 %vm338_vm0, %v320_v9  ;;  %1708 = vmatprep.mubr.msk.f32.mxu0 %vm338_vm0, %v313_v10  ;;  %v322_v13 = vld [vmem:[%s1877_s8 + $0x58] sm:$0xff]  ;;  %v323_v15 = vld [vmem:[%s1877_s8 + $0x60] sm:$0xff]  ;;  %v324_v17 = vld [vmem:[%s1877_s8 + $0x68] sm:$0xff] }
  0x15   : > { %1720 = vmatprep.mubr.msk.f32.mxu1 %vm338_vm0, %v321_v11  ;;  %v317_v18 = vld [vmem:[%s1877_s8 + $0x30] sm:$0xff]  ;;  %v318_v20 = vld [vmem:[%s1877_s8 + $0x38] sm:$0xff] }
  0x16   : > { %v325_v19 = vld [vmem:[%s1877_s8 + $0x70] sm:$0xff]  ;;  %v326_v21 = vld [vmem:[%s1877_s8 + $0x78] sm:$0xff]  ;;  %s1809_s8 = smov 72  }
  0x17   : > { %1709 = vmatmul.mubr.msk.f32.gmra.mrb[2].mxu0 %vm338_vm0, %v314_v12 }
  0x18   : > { %1721 = vmatmul.mubr.msk.f32.gmra.mrb[2].mxu1 %vm338_vm0, %v322_v13  ;;  %1711 = vmatprep.mubr.msk.f32.mxu0 %vm338_vm0, %v315_v14 }
  0x19   : > { %1723 = vmatprep.mubr.msk.f32.mxu1 %vm338_vm0, %v323_v15 }
  0x1b   : > { %1712 = vmatmul.mubr.msk.f32.gmra.mrb[4].mxu0 %vm338_vm0, %v316_v16 }
  0x1c   : > { %1724 = vmatmul.mubr.msk.f32.gmra.mrb[4].mxu1 %vm338_vm0, %v324_v17  ;;  %1714 = vmatprep.mubr.msk.f32.mxu0 %vm338_vm0, %v317_v18 }
  0x1d   : > { %1726 = vmatprep.mubr.msk.f32.mxu1 %vm338_vm0, %v325_v19 }
  0x1f   : > { %1715 = vmatmul.mubr.msk.f32.gmra.mrb[6].mxu0 %vm338_vm0, %v318_v20 }
  0x20   : > { %1727 = vmatmul.mubr.msk.f32.gmra.mrb[6].mxu1 %vm338_vm0, %v326_v21 }
  0xe6   : > { %v1707_v23 = vpop.f32.mrb[0].mxu0 }
  0xe7   : > { %v1719_v24 = vpop.f32.mrb[0].mxu1  ;;  %v1920_v25 = vadd.f32 %v1707_v23, %v1914_v22  ;;  %v453_v27 = vpop.f32.mrb[1].mxu0 }
  0xe8   : > { %v1923_v26 = vadd.f32 %v1719_v24, %v1914_v22  ;;  %v493_v28 = vpop.f32.mrb[1].mxu1  ;;  %v1926_v29 = vadd.f32 %v1914_v22, %v453_v27 }
  0xe9   : > { %v1929_v30 = vadd.f32 %v1914_v22, %v493_v28  ;;  %583 = vrot.lane.b32.xlu0 %v1920_v25, %s1800_s15  ;;  %v1942_v31 = vmul.f32 0.35355338, %v1920_v25 }
  0xea   : > { %599 = vrot.lane.b32.xlu1 %v1923_v26, %s1800_s15  ;;  %v1945_v32 = vmul.f32 0.35355338, %v1923_v26  ;;  %v1710_v33 = vpop.f32.mrb[2].mxu0  ;;  %v1948_v34 = vmul.f32 0.35355338, %v1926_v29 }
  0xeb   : > { %v1722_v35 = vpop.f32.mrb[2].mxu1  ;;  %v1951_v36 = vmul.f32 0.35355338, %v1929_v30  ;;  %550 = vst.msk [vmem:[%s1935_s14 + $0x8] sm:$0xff] %vm548_vm1, %v1942_v31  ;;  %v1960_v37 = vadd.f32 %v1710_v33, %v1914_v22  ;;  %v463_v38 = vpop.f32.mrb[3].mxu0 }
  0xec   : > { %558 = vst.msk [vmem:[%s1935_s14 + $0x48] sm:$0xff] %vm548_vm1, %v1945_v32  ;;  %v1963_v39 = vadd.f32 %v1722_v35, %v1914_v22  ;;  %v503_v40 = vpop.f32.mrb[3].mxu1  ;;  %549 = vst.msk [vmem:[%s1935_s14] sm:$0xff] %vm548_vm1, %v1948_v34  ;;  %v1969_v41 = vadd.f32 %v1914_v22, %v463_v38 }
  0xed   : > { %557 = vst.msk [vmem:[%s1935_s14 + $0x40] sm:$0xff] %vm548_vm1, %v1951_v36  ;;  %v1975_v42 = vadd.f32 %v1914_v22, %v503_v40  ;;  %581 = vrot.lane.b32.xlu0 %v1926_v29, %s1800_s15  ;;  %v1982_v43 = vmul.f32 0.35355338, %v1960_v37 }
  0xee   : > { %647 = vrot.lane.b32.xlu1 %v1920_v25, %s1801_s16  ;;  %v1985_v44 = vmul.f32 0.35355338, %v1963_v39  ;;  %v1988_v45 = vmul.f32 0.35355338, %v1969_v41  ;;  %v1713_v47 = vpop.f32.mrb[4].mxu0 }
  0xef   : > { %v1991_v46 = vmul.f32 0.35355338, %v1975_v42  ;;  %v1725_v48 = vpop.f32.mrb[4].mxu1  ;;  %552 = vst.msk [vmem:[%s1935_s14 + $0x18] sm:$0xff] %vm548_vm1, %v1982_v43  ;;  %v2000_v49 = vadd.f32 %v1713_v47, %v1914_v22  ;;  %v473_v50 = vpop.f32.mrb[5].mxu0 }
  0xf0   : > { %560 = vst.msk [vmem:[%s1935_s14 + $0x58] sm:$0xff] %vm548_vm1, %v1985_v44  ;;  %v2003_v51 = vadd.f32 %v1725_v48, %v1914_v22  ;;  %v513_v52 = vpop.f32.mrb[5].mxu1  ;;  %551 = vst.msk [vmem:[%s1935_s14 + $0x10] sm:$0xff] %vm548_vm1, %v1988_v45  ;;  %v2012_v53 = vadd.f32 %v1914_v22, %v473_v50 }
  0xf1   : > { %559 = vst.msk [vmem:[%s1935_s14 + $0x50] sm:$0xff] %vm548_vm1, %v1991_v46  ;;  %v2015_v54 = vadd.f32 %v1914_v22, %v513_v52  ;;  %597 = vrot.lane.b32.xlu0 %v1929_v30, %s1800_s15  ;;  %v2022_v55 = vmul.f32 0.35355338, %v2000_v49 }
  0xf2   : > { %663 = vrot.lane.b32.xlu1 %v1923_v26, %s1801_s16  ;;  %v2025_v56 = vmul.f32 0.35355338, %v2003_v51  ;;  %v2028_v57 = vmul.f32 0.35355338, %v2012_v53  ;;  %v1716_v59 = vpop.f32.mrb[6].mxu0 }
  0xf3   : > { %v2031_v58 = vmul.f32 0.35355338, %v2015_v54  ;;  %554 = vst.msk [vmem:[%s1935_s14 + $0x28] sm:$0xff] %vm548_vm1, %v2022_v55  ;;  %v2086_v60 = vadd.f32 %v1716_v59, %v1914_v22  ;;  %v483_v61 = vpop.f32.mrb[7].mxu0  ;;  %v1728_v63 = vpop.f32.mrb[6].mxu1 }
  0xf4   : > { %562 = vst.msk [vmem:[%s1935_s14 + $0x68] sm:$0xff] %vm548_vm1, %v2025_v56  ;;  %553 = vst.msk [vmem:[%s1935_s14 + $0x20] sm:$0xff] %vm548_vm1, %v2028_v57  ;;  %v2089_v62 = vadd.f32 %v1914_v22, %v483_v61  ;;  %v2096_v0 = vadd.f32 %v1728_v63, %v1914_v22  ;;  %v523_v1 = vpop.f32.mrb[7].mxu1 }
  0xf5   : > { %561 = vst.msk [vmem:[%s1935_s14 + $0x60] sm:$0xff] %vm548_vm1, %v2031_v58  ;;  %645 = vrot.lane.b32.xlu0 %v1926_v29, %s1801_s16  ;;  %v2099_v2 = vmul.f32 0.35355338, %v2086_v60  ;;  %v2105_v4 = vadd.f32 %v1914_v22, %v523_v1 }
  0xf6   : > { %792 = vrot.lane.b32.xlu1 %v1920_v25, %s1802_s17  ;;  %v2102_v3 = vmul.f32 0.35355338, %v2089_v62  ;;  %v2118_v5 = vmul.f32 0.35355338, %v2096_v0 }
  0xf7   : > { %556 = vst.msk [vmem:[%s1935_s14 + $0x38] sm:$0xff] %vm548_vm1, %v2099_v2  ;;  %v2121_v6 = vmul.f32 0.35355338, %v2105_v4 }
  0xf8   : > { %555 = vst.msk [vmem:[%s1935_s14 + $0x30] sm:$0xff] %vm548_vm1, %v2102_v3  ;;  %564 = vst.msk [vmem:[%s1935_s14 + $0x78] sm:$0xff] %vm548_vm1, %v2118_v5 }
  0xf9   : > { %661 = vrot.lane.b32.xlu0 %v1929_v30, %s1801_s16  ;;  %563 = vst.msk [vmem:[%s1935_s14 + $0x70] sm:$0xff] %vm548_vm1, %v2121_v6 }
  0xfa   : > { %808 = vrot.lane.b32.xlu1 %v1923_v26, %s1802_s17 }
  0xfd   : > { %790 = vrot.lane.b32.xlu0 %v1926_v29, %s1802_s17 }
  0xfe   : > { %857 = vrot.lane.b32.xlu1 %v1920_v25, %s1803_s18 }
 0x101   : > { %806 = vrot.lane.b32.xlu0 %v1929_v30, %s1802_s17 }
 0x102   : > { %873 = vrot.lane.b32.xlu1 %v1923_v26, %s1803_s18 }
 0x105   : > { %855 = vrot.lane.b32.xlu0 %v1926_v29, %s1803_s18 }
 0x106   : > { %987 = vrot.lane.b32.xlu1 %v1920_v25, %s1804_s22 }
 0x109   : > { %871 = vrot.lane.b32.xlu0 %v1929_v30, %s1803_s18 }
 0x10a   : > { %1003 = vrot.lane.b32.xlu1 %v1923_v26, %s1804_s22 }
 0x10d   : > { %985 = vrot.lane.b32.xlu0 %v1926_v29, %s1804_s22 }
 0x10e   : > { %1052 = vrot.lane.b32.xlu1 %v1920_v25, %s1805_s23 }
 0x111   : > { %1001 = vrot.lane.b32.xlu0 %v1929_v30, %s1804_s22 }
 0x112   : > { %727 = vrot.lane.b32.xlu1 %v1942_v31, %s1806_s24 }
 0x115   : > { %1050 = vrot.lane.b32.xlu0 %v1926_v29, %s1805_s23 }
 0x116   : > { %743 = vrot.lane.b32.xlu1 %v1945_v32, %s1806_s24 }
 0x119   : > { %1066 = vrot.lane.b32.xlu0 %v1929_v30, %s1805_s23 }
 0x11a   : > { %922 = vrot.lane.b32.xlu1 %v1942_v31, %s1807_s25 }
 0x11d   : > { %725 = vrot.lane.b32.xlu0 %v1948_v34, %s1806_s24 }
 0x11e   : > { %938 = vrot.lane.b32.xlu1 %v1945_v32, %s1807_s25 }
 0x121   : > { %741 = vrot.lane.b32.xlu0 %v1951_v36, %s1806_s24 }
 0x122   : > { %587 = vrot.lane.b32.xlu1 %v1960_v37, %s1800_s15 }
 0x125   : > { %920 = vrot.lane.b32.xlu0 %v1948_v34, %s1807_s25 }
 0x126   : > { %603 = vrot.lane.b32.xlu1 %v1963_v39, %s1800_s15 }
 0x129   : > { %936 = vrot.lane.b32.xlu0 %v1951_v36, %s1807_s25 }
 0x12a   : > { %651 = vrot.lane.b32.xlu1 %v1960_v37, %s1801_s16 }
 0x12d   : > { %601 = vrot.lane.b32.xlu0 %v1975_v42, %s1800_s15 }
 0x12e   : > { %667 = vrot.lane.b32.xlu1 %v1963_v39, %s1801_s16 }
 0x131   : > { %649 = vrot.lane.b32.xlu0 %v1969_v41, %s1801_s16 }
 0x132   : > { %796 = vrot.lane.b32.xlu1 %v1960_v37, %s1802_s17 }
 0x135   : > { %665 = vrot.lane.b32.xlu0 %v1975_v42, %s1801_s16 }
 0x136   : > { %812 = vrot.lane.b32.xlu1 %v1963_v39, %s1802_s17 }
 0x139   : > { %794 = vrot.lane.b32.xlu0 %v1969_v41, %s1802_s17 }
 0x13a   : > { %861 = vrot.lane.b32.xlu1 %v1960_v37, %s1803_s18 }
 0x13d   : > { %810 = vrot.lane.b32.xlu0 %v1975_v42, %s1802_s17 }
 0x13e   : > { %877 = vrot.lane.b32.xlu1 %v1963_v39, %s1803_s18 }
 0x141   : > { %859 = vrot.lane.b32.xlu0 %v1969_v41, %s1803_s18 }
 0x142   : > { %991 = vrot.lane.b32.xlu1 %v1960_v37, %s1804_s22 }
 0x145   : > { %875 = vrot.lane.b32.xlu0 %v1975_v42, %s1803_s18 }
 0x146   : > { %1007 = vrot.lane.b32.xlu1 %v1963_v39, %s1804_s22 }
 0x149   : > { %989 = vrot.lane.b32.xlu0 %v1969_v41, %s1804_s22 }
 0x14a   : > { %1056 = vrot.lane.b32.xlu1 %v1960_v37, %s1805_s23 }
 0x14d   : > { %1005 = vrot.lane.b32.xlu0 %v1975_v42, %s1804_s22 }
 0x14e   : > { %585 = vrot.lane.b32.xlu1 %v1969_v41, %s1800_s15 }
 0x151   : > { %1054 = vrot.lane.b32.xlu0 %v1969_v41, %s1805_s23 }
 0x152   : > { %731 = vrot.lane.b32.xlu1 %v1982_v43, %s1806_s24 }
 0x155   : > { %729 = vrot.lane.b32.xlu0 %v1988_v45, %s1806_s24 }
 0x156   : > { %747 = vrot.lane.b32.xlu1 %v1985_v44, %s1806_s24 }
 0x159   : > { %745 = vrot.lane.b32.xlu0 %v1991_v46, %s1806_s24 }
 0x15a   : > { %926 = vrot.lane.b32.xlu1 %v1982_v43, %s1807_s25 }
 0x15b   : > { %v584_v8 = vpop.permute.xlu0 %583 }
 0x15c   : > { %v600_v7 = vpop.permute.xlu1 %599  ;;  %630 = vst.msk [vmem:[%s2189_s28 + $0x8] sm:$0xff] %vm548_vm1, %v584_v8 }
 0x15d   : > { %638 = vst.msk [vmem:[%s2189_s28 + $0x48] sm:$0xff] %vm548_vm1, %v600_v7  ;;  %924 = vrot.lane.b32.xlu0 %v1988_v45, %s1807_s25 }
 0x15e   : > { %942 = vrot.lane.b32.xlu1 %v1985_v44, %s1807_s25 }
 0x15f   : > { %v582_v10 = vpop.permute.xlu0 %581 }
 0x160   : > { %v648_v9 = vpop.permute.xlu1 %647  ;;  %629 = vst.msk [vmem:[%s2189_s28] sm:$0xff] %vm548_vm1, %v582_v10 }
 0x161   : > { %694 = vst.msk [vmem:[%s2203_s6 + $0x8] sm:$0xff] %vm548_vm1, %v648_v9  ;;  %940 = vrot.lane.b32.xlu0 %v1991_v46, %s1807_s25 }
 0x162   : > { %591 = vrot.lane.b32.xlu1 %v2000_v49, %s1800_s15 }
 0x163   : > { %v598_v12 = vpop.permute.xlu0 %597 }
 0x164   : > { %v664_v11 = vpop.permute.xlu1 %663  ;;  %637 = vst.msk [vmem:[%s2189_s28 + $0x40] sm:$0xff] %vm548_vm1, %v598_v12 }
 0x165   : > { %702 = vst.msk [vmem:[%s2203_s6 + $0x48] sm:$0xff] %vm548_vm1, %v664_v11  ;;  %589 = vrot.lane.b32.xlu0 %v2012_v53, %s1800_s15 }
 0x166   : > { %607 = vrot.lane.b32.xlu1 %v2003_v51, %s1800_s15 }
 0x167   : > { %v646_v14 = vpop.permute.xlu0 %645 }
 0x168   : > { %v793_v13 = vpop.permute.xlu1 %792  ;;  %693 = vst.msk [vmem:[%s2203_s6] sm:$0xff] %vm548_vm1, %v646_v14 }
 0x169   : > { %1544 = vst.msk [vmem:[%s2189_s28 + $0x88] sm:$0xff] %vm548_vm1, %v793_v13  ;;  %605 = vrot.lane.b32.xlu0 %v2015_v54, %s1800_s15 }
 0x16a   : > { %655 = vrot.lane.b32.xlu1 %v2000_v49, %s1801_s16 }
 0x16b   : > { %v662_v16 = vpop.permute.xlu0 %661 }
 0x16c   : > { %v809_v15 = vpop.permute.xlu1 %808  ;;  %701 = vst.msk [vmem:[%s2203_s6 + $0x40] sm:$0xff] %vm548_vm1, %v662_v16 }
 0x16d   : > { %1552 = vst.msk [vmem:[%s2189_s28 + $0xc8] sm:$0xff] %vm548_vm1, %v809_v15  ;;  %653 = vrot.lane.b32.xlu0 %v2012_v53, %s1801_s16 }
 0x16e   : > { %671 = vrot.lane.b32.xlu1 %v2003_v51, %s1801_s16 }
 0x16f   : > { %v791_v18 = vpop.permute.xlu0 %790 }
 0x170   : > { %v858_v17 = vpop.permute.xlu1 %857  ;;  %1543 = vst.msk [vmem:[%s2189_s28 + $0x80] sm:$0xff] %vm548_vm1, %v791_v18 }
 0x171   : > { %1560 = vst.msk [vmem:[%s2203_s6 + $0x88] sm:$0xff] %vm548_vm1, %v858_v17  ;;  %669 = vrot.lane.b32.xlu0 %v2015_v54, %s1801_s16 }
 0x172   : > { %800 = vrot.lane.b32.xlu1 %v2000_v49, %s1802_s17 }
 0x173   : > { %v807_v20 = vpop.permute.xlu0 %806 }
 0x174   : > { %v874_v19 = vpop.permute.xlu1 %873  ;;  %1551 = vst.msk [vmem:[%s2189_s28 + $0xc0] sm:$0xff] %vm548_vm1, %v807_v20 }
 0x175   : > { %1568 = vst.msk [vmem:[%s2203_s6 + $0xc8] sm:$0xff] %vm548_vm1, %v874_v19  ;;  %798 = vrot.lane.b32.xlu0 %v2012_v53, %s1802_s17 }
 0x176   : > { %816 = vrot.lane.b32.xlu1 %v2003_v51, %s1802_s17 }
 0x177   : > { %v856_v22 = vpop.permute.xlu0 %855 }
 0x178   : > { %v988_v21 = vpop.permute.xlu1 %987  ;;  %1559 = vst.msk [vmem:[%s2203_s6 + $0x80] sm:$0xff] %vm548_vm1, %v856_v22 }
 0x179   : > { %1592 = vst.msk [vmem:[%s2189_s28 + $0x108] sm:$0xff] %vm548_vm1, %v988_v21  ;;  %814 = vrot.lane.b32.xlu0 %v2015_v54, %s1802_s17 }
 0x17a   : > { %865 = vrot.lane.b32.xlu1 %v2000_v49, %s1803_s18 }
 0x17b   : > { %v872_v24 = vpop.permute.xlu0 %871 }
 0x17c   : > { %v1004_v23 = vpop.permute.xlu1 %1003  ;;  %1567 = vst.msk [vmem:[%s2203_s6 + $0xc0] sm:$0xff] %vm548_vm1, %v872_v24 }
 0x17d   : > { %1600 = vst.msk [vmem:[%s2189_s28 + $0x148] sm:$0xff] %vm548_vm1, %v1004_v23  ;;  %863 = vrot.lane.b32.xlu0 %v2012_v53, %s1803_s18 }
 0x17e   : > { %881 = vrot.lane.b32.xlu1 %v2003_v51, %s1803_s18 }
 0x17f   : > { %v986_v28 = vpop.permute.xlu0 %985 }
 0x180   : > { %v1053_v27 = vpop.permute.xlu1 %1052  ;;  %1591 = vst.msk [vmem:[%s2189_s28 + $0x100] sm:$0xff] %vm548_vm1, %v986_v28 }
 0x181   : > { %1608 = vst.msk [vmem:[%s2203_s6 + $0x108] sm:$0xff] %vm548_vm1, %v1053_v27  ;;  %879 = vrot.lane.b32.xlu0 %v2015_v54, %s1803_s18 }
 0x182   : > { %995 = vrot.lane.b32.xlu1 %v2000_v49, %s1804_s22 }
 0x183   : > { %v1002_v35 = vpop.permute.xlu0 %1001 }
 0x184   : > { %v728_v33 = vpop.permute.xlu1 %727  ;;  %1599 = vst.msk [vmem:[%s2189_s28 + $0x140] sm:$0xff] %vm548_vm1, %v1002_v35 }
 0x185   : > { %1528 = vst.msk [vmem:[%s1935_s14 + $0x88] sm:$0xff] %vm548_vm1, %v728_v33  ;;  %993 = vrot.lane.b32.xlu0 %v2012_v53, %s1804_s22 }
 0x186   : > { %1011 = vrot.lane.b32.xlu1 %v2003_v51, %s1804_s22 }
 0x187   : > { %v1051_v40 = vpop.permute.xlu0 %1050 }
 0x188   : > { %v744_v38 = vpop.permute.xlu1 %743  ;;  %1607 = vst.msk [vmem:[%s2203_s6 + $0x100] sm:$0xff] %vm548_vm1, %v1051_v40 }
 0x189   : > { %1536 = vst.msk [vmem:[%s1935_s14 + $0xc8] sm:$0xff] %vm548_vm1, %v744_v38  ;;  %1009 = vrot.lane.b32.xlu0 %v2015_v54, %s1804_s22 }
 0x18a   : > { %1060 = vrot.lane.b32.xlu1 %v2000_v49, %s1805_s23 }
 0x18b   : > { %v1067_v48 = vpop.permute.xlu0 %1066 }
 0x18c   : > { %v923_v47 = vpop.permute.xlu1 %922  ;;  %1615 = vst.msk [vmem:[%s2203_s6 + $0x140] sm:$0xff] %vm548_vm1, %v1067_v48 }
 0x18d   : > { %1576 = vst.msk [vmem:[%s1935_s14 + $0x108] sm:$0xff] %vm548_vm1, %v923_v47  ;;  %1058 = vrot.lane.b32.xlu0 %v2012_v53, %s1805_s23 }
 0x18e   : > { %735 = vrot.lane.b32.xlu1 %v2022_v55, %s1806_s24 }
 0x18f   : > { %v726_v52 = vpop.permute.xlu0 %725 }
 0x190   : > { %v939_v50 = vpop.permute.xlu1 %938  ;;  %1527 = vst.msk [vmem:[%s1935_s14 + $0x80] sm:$0xff] %vm548_vm1, %v726_v52 }
 0x191   : > { %1584 = vst.msk [vmem:[%s1935_s14 + $0x148] sm:$0xff] %vm548_vm1, %v939_v50  ;;  %733 = vrot.lane.b32.xlu0 %v2028_v57, %s1806_s24 }
 0x192   : > { %751 = vrot.lane.b32.xlu1 %v2025_v56, %s1806_s24 }
 0x193   : > { %v742_v61 = vpop.permute.xlu0 %741 }
 0x194   : > { %v588_v59 = vpop.permute.xlu1 %587  ;;  %1535 = vst.msk [vmem:[%s1935_s14 + $0xc0] sm:$0xff] %vm548_vm1, %v742_v61 }
 0x195   : > { %632 = vst.msk [vmem:[%s2189_s28 + $0x18] sm:$0xff] %vm548_vm1, %v588_v59  ;;  %749 = vrot.lane.b32.xlu0 %v2031_v58, %s1806_s24 }
 0x196   : > { %930 = vrot.lane.b32.xlu1 %v2022_v55, %s1807_s25 }
 0x197   : > { %v921_v1 = vpop.permute.xlu0 %920 }
 0x198   : > { %v604_v63 = vpop.permute.xlu1 %603  ;;  %1575 = vst.msk [vmem:[%s1935_s14 + $0x100] sm:$0xff] %vm548_vm1, %v921_v1 }
 0x199   : > { %640 = vst.msk [vmem:[%s2189_s28 + $0x58] sm:$0xff] %vm548_vm1, %v604_v63  ;;  %928 = vrot.lane.b32.xlu0 %v2028_v57, %s1807_s25 }
 0x19a   : > { %946 = vrot.lane.b32.xlu1 %v2025_v56, %s1807_s25 }
 0x19b   : > { %v937_v8 = vpop.permute.xlu0 %936 }
 0x19c   : > { %v652_v7 = vpop.permute.xlu1 %651  ;;  %1583 = vst.msk [vmem:[%s1935_s14 + $0x140] sm:$0xff] %vm548_vm1, %v937_v8 }
 0x19d   : > { %696 = vst.msk [vmem:[%s2203_s6 + $0x18] sm:$0xff] %vm548_vm1, %v652_v7  ;;  %944 = vrot.lane.b32.xlu0 %v2031_v58, %s1807_s25 }
 0x19e   : > { %595 = vrot.lane.b32.xlu1 %v2086_v60, %s1800_s15 }
 0x19f   : > { %v602_v10 = vpop.permute.xlu0 %601 }
 0x1a0   : > { %v668_v9 = vpop.permute.xlu1 %667  ;;  %639 = vst.msk [vmem:[%s2189_s28 + $0x50] sm:$0xff] %vm548_vm1, %v602_v10 }
 0x1a1   : > { %704 = vst.msk [vmem:[%s2203_s6 + $0x58] sm:$0xff] %vm548_vm1, %v668_v9  ;;  %593 = vrot.lane.b32.xlu0 %v2089_v62, %s1800_s15 }
 0x1a2   : > { %611 = vrot.lane.b32.xlu1 %v2096_v0, %s1800_s15 }
 0x1a3   : > { %v650_v12 = vpop.permute.xlu0 %649 }
 0x1a4   : > { %v797_v11 = vpop.permute.xlu1 %796  ;;  %695 = vst.msk [vmem:[%s2203_s6 + $0x10] sm:$0xff] %vm548_vm1, %v650_v12 }
 0x1a5   : > { %1546 = vst.msk [vmem:[%s2189_s28 + $0x98] sm:$0xff] %vm548_vm1, %v797_v11  ;;  %609 = vrot.lane.b32.xlu0 %v2105_v4, %s1800_s15 }
 0x1a6   : > { %659 = vrot.lane.b32.xlu1 %v2086_v60, %s1801_s16 }
 0x1a7   : > { %v666_v14 = vpop.permute.xlu0 %665 }
 0x1a8   : > { %v813_v13 = vpop.permute.xlu1 %812  ;;  %703 = vst.msk [vmem:[%s2203_s6 + $0x50] sm:$0xff] %vm548_vm1, %v666_v14 }
 0x1a9   : > { %1554 = vst.msk [vmem:[%s2189_s28 + $0xd8] sm:$0xff] %vm548_vm1, %v813_v13  ;;  %657 = vrot.lane.b32.xlu0 %v2089_v62, %s1801_s16 }
 0x1aa   : > { %675 = vrot.lane.b32.xlu1 %v2096_v0, %s1801_s16 }
 0x1ab   : > { %v795_v16 = vpop.permute.xlu0 %794 }
 0x1ac   : > { %v862_v15 = vpop.permute.xlu1 %861  ;;  %1545 = vst.msk [vmem:[%s2189_s28 + $0x90] sm:$0xff] %vm548_vm1, %v795_v16 }
 0x1ad   : > { %1562 = vst.msk [vmem:[%s2203_s6 + $0x98] sm:$0xff] %vm548_vm1, %v862_v15  ;;  %673 = vrot.lane.b32.xlu0 %v2105_v4, %s1801_s16 }
 0x1ae   : > { %804 = vrot.lane.b32.xlu1 %v2086_v60, %s1802_s17 }
 0x1af   : > { %v811_v18 = vpop.permute.xlu0 %810 }
 0x1b0   : > { %v878_v17 = vpop.permute.xlu1 %877  ;;  %1553 = vst.msk [vmem:[%s2189_s28 + $0xd0] sm:$0xff] %vm548_vm1, %v811_v18 }
 0x1b1   : > { %1570 = vst.msk [vmem:[%s2203_s6 + $0xd8] sm:$0xff] %vm548_vm1, %v878_v17  ;;  %802 = vrot.lane.b32.xlu0 %v2089_v62, %s1802_s17 }
 0x1b2   : > { %820 = vrot.lane.b32.xlu1 %v2096_v0, %s1802_s17 }
 0x1b3   : > { %v860_v20 = vpop.permute.xlu0 %859 }
 0x1b4   : > { %v992_v19 = vpop.permute.xlu1 %991  ;;  %1561 = vst.msk [vmem:[%s2203_s6 + $0x90] sm:$0xff] %vm548_vm1, %v860_v20 }
 0x1b5   : > { %1594 = vst.msk [vmem:[%s2189_s28 + $0x118] sm:$0xff] %vm548_vm1, %v992_v19  ;;  %818 = vrot.lane.b32.xlu0 %v2105_v4, %s1802_s17 }
 0x1b6   : > { %869 = vrot.lane.b32.xlu1 %v2086_v60, %s1803_s18 }
 0x1b7   : > { %v876_v22 = vpop.permute.xlu0 %875 }
 0x1b8   : > { %v1008_v21 = vpop.permute.xlu1 %1007  ;;  %1569 = vst.msk [vmem:[%s2203_s6 + $0xd0] sm:$0xff] %vm548_vm1, %v876_v22 }
 0x1b9   : > { %1602 = vst.msk [vmem:[%s2189_s28 + $0x158] sm:$0xff] %vm548_vm1, %v1008_v21  ;;  %867 = vrot.lane.b32.xlu0 %v2089_v62, %s1803_s18 }
 0x1ba   : > { %885 = vrot.lane.b32.xlu1 %v2096_v0, %s1803_s18 }
 0x1bb   : > { %v990_v24 = vpop.permute.xlu0 %989 }
 0x1bc   : > { %v1057_v23 = vpop.permute.xlu1 %1056  ;;  %1593 = vst.msk [vmem:[%s2189_s28 + $0x110] sm:$0xff] %vm548_vm1, %v990_v24 }
 0x1bd   : > { %1610 = vst.msk [vmem:[%s2203_s6 + $0x118] sm:$0xff] %vm548_vm1, %v1057_v23  ;;  %883 = vrot.lane.b32.xlu0 %v2105_v4, %s1803_s18 }
 0x1be   : > { %999 = vrot.lane.b32.xlu1 %v2086_v60, %s1804_s22 }
 0x1bf   : > { %v1006_v28 = vpop.permute.xlu0 %1005 }
 0x1c0   : > { %v586_v27 = vpop.permute.xlu1 %585  ;;  %1601 = vst.msk [vmem:[%s2189_s28 + $0x150] sm:$0xff] %vm548_vm1, %v1006_v28 }
 0x1c1   : > { %631 = vst.msk [vmem:[%s2189_s28 + $0x10] sm:$0xff] %vm548_vm1, %v586_v27  ;;  %997 = vrot.lane.b32.xlu0 %v2089_v62, %s1804_s22 }
 0x1c2   : > { %1015 = vrot.lane.b32.xlu1 %v2096_v0, %s1804_s22 }
 0x1c3   : > { %v1055_v35 = vpop.permute.xlu0 %1054 }
 0x1c4   : > { %v732_v33 = vpop.permute.xlu1 %731  ;;  %1609 = vst.msk [vmem:[%s2203_s6 + $0x110] sm:$0xff] %vm548_vm1, %v1055_v35 }
 0x1c5   : > { %1530 = vst.msk [vmem:[%s1935_s14 + $0x98] sm:$0xff] %vm548_vm1, %v732_v33  ;;  %1013 = vrot.lane.b32.xlu0 %v2105_v4, %s1804_s22 }
 0x1c6   : > { %1064 = vrot.lane.b32.xlu1 %v2086_v60, %s1805_s23 }
 0x1c7   : > { %v730_v40 = vpop.permute.xlu0 %729 }
 0x1c8   : > { %v748_v38 = vpop.permute.xlu1 %747  ;;  %1529 = vst.msk [vmem:[%s1935_s14 + $0x90] sm:$0xff] %vm548_vm1, %v730_v40 }
 0x1c9   : > { %1538 = vst.msk [vmem:[%s1935_s14 + $0xd8] sm:$0xff] %vm548_vm1, %v748_v38  ;;  %1062 = vrot.lane.b32.xlu0 %v2089_v62, %s1805_s23 }
 0x1ca   : > { %739 = vrot.lane.b32.xlu1 %v2099_v2, %s1806_s24 }
 0x1cb   : > { %v746_v48 = vpop.permute.xlu0 %745 }
 0x1cc   : > { %v927_v47 = vpop.permute.xlu1 %926  ;;  %1537 = vst.msk [vmem:[%s1935_s14 + $0xd0] sm:$0xff] %vm548_vm1, %v746_v48 }
 0x1cd   : > { %1578 = vst.msk [vmem:[%s1935_s14 + $0x118] sm:$0xff] %vm548_vm1, %v927_v47  ;;  %737 = vrot.lane.b32.xlu0 %v2102_v3, %s1806_s24 }
 0x1ce   : > { %755 = vrot.lane.b32.xlu1 %v2118_v5, %s1806_s24 }
 0x1cf   : > { %v925_v52 = vpop.permute.xlu0 %924 }
 0x1d0   : > { %v943_v50 = vpop.permute.xlu1 %942  ;;  %1577 = vst.msk [vmem:[%s1935_s14 + $0x110] sm:$0xff] %vm548_vm1, %v925_v52 }
 0x1d1   : > { %1586 = vst.msk [vmem:[%s1935_s14 + $0x158] sm:$0xff] %vm548_vm1, %v943_v50  ;;  %753 = vrot.lane.b32.xlu0 %v2121_v6, %s1806_s24 }
 0x1d2   : > { %934 = vrot.lane.b32.xlu1 %v2099_v2, %s1807_s25 }
 0x1d3   : > { %v941_v61 = vpop.permute.xlu0 %940 }
 0x1d4   : > { %v592_v59 = vpop.permute.xlu1 %591  ;;  %1585 = vst.msk [vmem:[%s1935_s14 + $0x150] sm:$0xff] %vm548_vm1, %v941_v61 }
 0x1d5   : > { %634 = vst.msk [vmem:[%s2189_s28 + $0x28] sm:$0xff] %vm548_vm1, %v592_v59  ;;  %932 = vrot.lane.b32.xlu0 %v2102_v3, %s1807_s25 }
 0x1d6   : > { %950 = vrot.lane.b32.xlu1 %v2118_v5, %s1807_s25 }
 0x1d7   : > { %v590_v1 = vpop.permute.xlu0 %589 }
 0x1d8   : > { %v608_v63 = vpop.permute.xlu1 %607  ;;  %633 = vst.msk [vmem:[%s2189_s28 + $0x20] sm:$0xff] %vm548_vm1, %v590_v1 }
 0x1d9   : > { %642 = vst.msk [vmem:[%s2189_s28 + $0x68] sm:$0xff] %vm548_vm1, %v608_v63  ;;  %948 = vrot.lane.b32.xlu0 %v2121_v6, %s1807_s25 }
 0x1da   : > { %1068 = vrot.lane.b32.xlu1 %v1923_v26, %s1805_s23 }
 0x1db   : > { %v606_v8 = vpop.permute.xlu0 %605 }
 0x1dc   : > { %v656_v7 = vpop.permute.xlu1 %655  ;;  %641 = vst.msk [vmem:[%s2189_s28 + $0x60] sm:$0xff] %vm548_vm1, %v606_v8 }
 0x1dd   : > { %698 = vst.msk [vmem:[%s2203_s6 + $0x28] sm:$0xff] %vm548_vm1, %v656_v7  ;;  %1070 = vrot.lane.b32.xlu0 %v1975_v42, %s1805_s23 }
 0x1de   : > { %1072 = vrot.lane.b32.xlu1 %v1963_v39, %s1805_s23 }
 0x1df   : > { %v654_v10 = vpop.permute.xlu0 %653 }
 0x1e0   : > { %v672_v9 = vpop.permute.xlu1 %671  ;;  %697 = vst.msk [vmem:[%s2203_s6 + $0x20] sm:$0xff] %vm548_vm1, %v654_v10 }
 0x1e1   : > { %706 = vst.msk [vmem:[%s2203_s6 + $0x68] sm:$0xff] %vm548_vm1, %v672_v9  ;;  %1074 = vrot.lane.b32.xlu0 %v2015_v54, %s1805_s23 }
 0x1e2   : > { %1076 = vrot.lane.b32.xlu1 %v2003_v51, %s1805_s23 }
 0x1e3   : > { %v670_v12 = vpop.permute.xlu0 %669 }
 0x1e4   : > { %v801_v11 = vpop.permute.xlu1 %800  ;;  %705 = vst.msk [vmem:[%s2203_s6 + $0x60] sm:$0xff] %vm548_vm1, %v670_v12 }
 0x1e5   : > { %1548 = vst.msk [vmem:[%s2189_s28 + $0xa8] sm:$0xff] %vm548_vm1, %v801_v11  ;;  %1078 = vrot.lane.b32.xlu0 %v2105_v4, %s1805_s23 }
 0x1e6   : > { %1080 = vrot.lane.b32.xlu1 %v2096_v0, %s1805_s23 }
 0x1e7   : > { %v799_v14 = vpop.permute.xlu0 %798 }
 0x1e8   : > { %v817_v13 = vpop.permute.xlu1 %816  ;;  %1547 = vst.msk [vmem:[%s2189_s28 + $0xa0] sm:$0xff] %vm548_vm1, %v799_v14 }
 0x1e9   : > { %1556 = vst.msk [vmem:[%s2189_s28 + $0xe8] sm:$0xff] %vm548_vm1, %v817_v13  ;;  %1115 = vrot.lane.b32.xlu0 %v1948_v34, %s1808_s7 }
 0x1ea   : > { %1117 = vrot.lane.b32.xlu1 %v1942_v31, %s1808_s7 }
 0x1eb   : > { %v815_v16 = vpop.permute.xlu0 %814 }
 0x1ec   : > { %v866_v15 = vpop.permute.xlu1 %865  ;;  %1555 = vst.msk [vmem:[%s2189_s28 + $0xe0] sm:$0xff] %vm548_vm1, %v815_v16 }
 0x1ed   : > { %1564 = vst.msk [vmem:[%s2203_s6 + $0xa8] sm:$0xff] %vm548_vm1, %v866_v15  ;;  %1119 = vrot.lane.b32.xlu0 %v1988_v45, %s1808_s7 }
 0x1ee   : > { %1121 = vrot.lane.b32.xlu1 %v1982_v43, %s1808_s7 }
 0x1ef   : > { %v864_v17 = vpop.permute.xlu0 %863 }
 0x1f0   : > { %v882_v31 = vpop.permute.xlu1 %881  ;;  %1563 = vst.msk [vmem:[%s2203_s6 + $0xa0] sm:$0xff] %vm548_vm1, %v864_v17 }
 0x1f1   : > { %1572 = vst.msk [vmem:[%s2203_s6 + $0xe8] sm:$0xff] %vm548_vm1, %v882_v31  ;;  %1123 = vrot.lane.b32.xlu0 %v2028_v57, %s1808_s7 }
 0x1f2   : > { %1125 = vrot.lane.b32.xlu1 %v2022_v55, %s1808_s7 }
 0x1f3   : > { %v880_v43 = vpop.permute.xlu0 %879 }
 0x1f4   : > { %v996_v34 = vpop.permute.xlu1 %995  ;;  %1571 = vst.msk [vmem:[%s2203_s6 + $0xe0] sm:$0xff] %vm548_vm1, %v880_v43 }
 0x1f5   : > { %1596 = vst.msk [vmem:[%s2189_s28 + $0x128] sm:$0xff] %vm548_vm1, %v996_v34  ;;  %1127 = vrot.lane.b32.xlu0 %v2102_v3, %s1808_s7 }
 0x1f6   : > { %1129 = vrot.lane.b32.xlu1 %v2099_v2, %s1808_s7 }
 0x1f7   : > { %v994_v55 = vpop.permute.xlu0 %993 }
 0x1f8   : > { %v1012_v45 = vpop.permute.xlu1 %1011  ;;  %1595 = vst.msk [vmem:[%s2189_s28 + $0x120] sm:$0xff] %vm548_vm1, %v994_v55 }
 0x1f9   : > { %1604 = vst.msk [vmem:[%s2189_s28 + $0x168] sm:$0xff] %vm548_vm1, %v1012_v45  ;;  %1131 = vrot.lane.b32.xlu0 %v1951_v36, %s1808_s7 }
 0x1fa   : > { %1133 = vrot.lane.b32.xlu1 %v1945_v32, %s1808_s7 }
 0x1fb   : > { %v1010_v2 = vpop.permute.xlu0 %1009 }
 0x1fc   : > { %v1061_v57 = vpop.permute.xlu1 %1060  ;;  %1603 = vst.msk [vmem:[%s2189_s28 + $0x160] sm:$0xff] %vm548_vm1, %v1010_v2 }
 0x1fd   : > { %1612 = vst.msk [vmem:[%s2203_s6 + $0x128] sm:$0xff] %vm548_vm1, %v1061_v57  ;;  %1135 = vrot.lane.b32.xlu0 %v1991_v46, %s1808_s7 }
 0x1fe   : > { %1137 = vrot.lane.b32.xlu1 %v1985_v44, %s1808_s7 }
 0x1ff   : > { %v1059_v3 = vpop.permute.xlu0 %1058 }
 0x200   : > { %v736_v32 = vpop.permute.xlu1 %735  ;;  %1611 = vst.msk [vmem:[%s2203_s6 + $0x120] sm:$0xff] %vm548_vm1, %v1059_v3 }
 0x201   : > { %1532 = vst.msk [vmem:[%s1935_s14 + $0xa8] sm:$0xff] %vm548_vm1, %v736_v32  ;;  %1139 = vrot.lane.b32.xlu0 %v2031_v58, %s1808_s7 }
 0x202   : > { %1141 = vrot.lane.b32.xlu1 %v2025_v56, %s1808_s7 }
 0x203   : > { %v734_v44 = vpop.permute.xlu0 %733 }
 0x204   : > { %v752_v36 = vpop.permute.xlu1 %751  ;;  %1531 = vst.msk [vmem:[%s1935_s14 + $0xa0] sm:$0xff] %vm548_vm1, %v734_v44 }
 0x205   : > { %1540 = vst.msk [vmem:[%s1935_s14 + $0xe8] sm:$0xff] %vm548_vm1, %v752_v36  ;;  %1143 = vrot.lane.b32.xlu0 %v2121_v6, %s1808_s7 }
 0x206   : > { %1145 = vrot.lane.b32.xlu1 %v2118_v5, %s1808_s7 }
 0x207   : > { %v750_v56 = vpop.permute.xlu0 %749 }
 0x208   : > { %v931_v46 = vpop.permute.xlu1 %930  ;;  %1539 = vst.msk [vmem:[%s1935_s14 + $0xe0] sm:$0xff] %vm548_vm1, %v750_v56 }
 0x209   : > { %1580 = vst.msk [vmem:[%s1935_s14 + $0x128] sm:$0xff] %vm548_vm1, %v931_v46  ;;  %1180 = vrot.lane.b32.xlu0 %v1926_v29, %s1809_s8 }
 0x20a   : > { %1182 = vrot.lane.b32.xlu1 %v1920_v25, %s1809_s8 }
 0x20b   : > { %v929_v5 = vpop.permute.xlu0 %928 }
 0x20c   : > { %v947_v58 = vpop.permute.xlu1 %946  ;;  %1579 = vst.msk [vmem:[%s1935_s14 + $0x120] sm:$0xff] %vm548_vm1, %v929_v5 }
 0x20d   : > { %1588 = vst.msk [vmem:[%s1935_s14 + $0x168] sm:$0xff] %vm548_vm1, %v947_v58  ;;  %1184 = vrot.lane.b32.xlu0 %v1969_v41, %s1809_s8 }
 0x20e   : > { %1186 = vrot.lane.b32.xlu1 %v1960_v37, %s1809_s8 }
 0x20f   : > { %v945_v18 = vpop.permute.xlu0 %944 }
 0x210   : > { %v596_v6 = vpop.permute.xlu1 %595  ;;  %1587 = vst.msk [vmem:[%s1935_s14 + $0x160] sm:$0xff] %vm548_vm1, %v945_v18 }
 0x211   : > { %636 = vst.msk [vmem:[%s2189_s28 + $0x38] sm:$0xff] %vm548_vm1, %v596_v6  ;;  %1188 = vrot.lane.b32.xlu0 %v2012_v53, %s1809_s8 }
 0x212   : > { %1190 = vrot.lane.b32.xlu1 %v2000_v49, %s1809_s8 }
 0x213   : > { %v594_v20 = vpop.permute.xlu0 %593 }
 0x214   : > { %v612_v19 = vpop.permute.xlu1 %611  ;;  %635 = vst.msk [vmem:[%s2189_s28 + $0x30] sm:$0xff] %vm548_vm1, %v594_v20 }
 0x215   : > { %644 = vst.msk [vmem:[%s2189_s28 + $0x78] sm:$0xff] %vm548_vm1, %v612_v19  ;;  %1192 = vrot.lane.b32.xlu0 %v2089_v62, %s1809_s8 }
 0x216   : > { %1194 = vrot.lane.b32.xlu1 %v2086_v60, %s1809_s8 }
 0x217   : > { %v610_v22 = vpop.permute.xlu0 %609 }
 0x218   : > { %v660_v21 = vpop.permute.xlu1 %659  ;;  %643 = vst.msk [vmem:[%s2189_s28 + $0x70] sm:$0xff] %vm548_vm1, %v610_v22 }
 0x219   : > { %700 = vst.msk [vmem:[%s2203_s6 + $0x38] sm:$0xff] %vm548_vm1, %v660_v21  ;;  %1196 = vrot.lane.b32.xlu0 %v1929_v30, %s1809_s8 }
 0x21a   : > { %1198 = vrot.lane.b32.xlu1 %v1923_v26, %s1809_s8 }
 0x21b   : > { %v658_v24 = vpop.permute.xlu0 %657 }
 0x21c   : > { %v676_v23 = vpop.permute.xlu1 %675  ;;  %699 = vst.msk [vmem:[%s2203_s6 + $0x30] sm:$0xff] %vm548_vm1, %v658_v24 }
 0x21d   : > { %708 = vst.msk [vmem:[%s2203_s6 + $0x78] sm:$0xff] %vm548_vm1, %v676_v23  ;;  %1200 = vrot.lane.b32.xlu0 %v1975_v42, %s1809_s8 }
 0x21e   : > { %1202 = vrot.lane.b32.xlu1 %v1963_v39, %s1809_s8 }
 0x21f   : > { %v674_v28 = vpop.permute.xlu0 %673 }
 0x220   : > { %v805_v27 = vpop.permute.xlu1 %804  ;;  %707 = vst.msk [vmem:[%s2203_s6 + $0x70] sm:$0xff] %vm548_vm1, %v674_v28 }
 0x221   : > { %1550 = vst.msk [vmem:[%s2189_s28 + $0xb8] sm:$0xff] %vm548_vm1, %v805_v27  ;;  %1204 = vrot.lane.b32.xlu0 %v2015_v54, %s1809_s8 }
 0x222   : > { %1206 = vrot.lane.b32.xlu1 %v2003_v51, %s1809_s8 }
 0x223   : > { %v803_v35 = vpop.permute.xlu0 %802 }
 0x224   : > { %v821_v33 = vpop.permute.xlu1 %820  ;;  %1549 = vst.msk [vmem:[%s2189_s28 + $0xb0] sm:$0xff] %vm548_vm1, %v803_v35 }
 0x225   : > { %1558 = vst.msk [vmem:[%s2189_s28 + $0xf8] sm:$0xff] %vm548_vm1, %v821_v33  ;;  %1208 = vrot.lane.b32.xlu0 %v2105_v4, %s1809_s8 }
 0x226   : > { %1210 = vrot.lane.b32.xlu1 %v2096_v0, %s1809_s8 }
 0x227   : > { %v819_v40 = vpop.permute.xlu0 %818 }
 0x228   : > { %v870_v38 = vpop.permute.xlu1 %869  ;;  %1557 = vst.msk [vmem:[%s2189_s28 + $0xf0] sm:$0xff] %vm548_vm1, %v819_v40 }
 0x229   : > { %1566 = vst.msk [vmem:[%s2203_s6 + $0xb8] sm:$0xff] %vm548_vm1, %v870_v38  ;;  %1245 = vrot.lane.b32.xlu0 %v1926_v29, %s1810_s9 }
 0x22a   : > { %1247 = vrot.lane.b32.xlu1 %v1920_v25, %s1810_s9 }
 0x22b   : > { %v868_v48 = vpop.permute.xlu0 %867 }
 0x22c   : > { %v886_v47 = vpop.permute.xlu1 %885  ;;  %1565 = vst.msk [vmem:[%s2203_s6 + $0xb0] sm:$0xff] %vm548_vm1, %v868_v48 }
 0x22d   : > { %1574 = vst.msk [vmem:[%s2203_s6 + $0xf8] sm:$0xff] %vm548_vm1, %v886_v47  ;;  %1249 = vrot.lane.b32.xlu0 %v1969_v41, %s1810_s9 }
 0x22e   : > { %1251 = vrot.lane.b32.xlu1 %v1960_v37, %s1810_s9 }
 0x22f   : > { %v884_v50 = vpop.permute.xlu0 %883 }
 0x230   : > { %v1000_v25 = vpop.permute.xlu1 %999  ;;  %1573 = vst.msk [vmem:[%s2203_s6 + $0xf0] sm:$0xff] %vm548_vm1, %v884_v50 }
 0x231   : > { %1598 = vst.msk [vmem:[%s2189_s28 + $0x138] sm:$0xff] %vm548_vm1, %v1000_v25  ;;  %1253 = vrot.lane.b32.xlu0 %v2012_v53, %s1810_s9 }
 0x232   : > { %1255 = vrot.lane.b32.xlu1 %v2000_v49, %s1810_s9 }
 0x233   : > { %v998_v37 = vpop.permute.xlu0 %997 }
 0x234   : > { %v1016_v29 = vpop.permute.xlu1 %1015  ;;  %1597 = vst.msk [vmem:[%s2189_s28 + $0x130] sm:$0xff] %vm548_vm1, %v998_v37 }
 0x235   : > { %1606 = vst.msk [vmem:[%s2189_s28 + $0x178] sm:$0xff] %vm548_vm1, %v1016_v29  ;;  %1257 = vrot.lane.b32.xlu0 %v2089_v62, %s1810_s9 }
 0x236   : > { %1259 = vrot.lane.b32.xlu1 %v2086_v60, %s1810_s9 }
 0x237   : > { %v1014_v49 = vpop.permute.xlu0 %1013 }
 0x238   : > { %v1065_v41 = vpop.permute.xlu1 %1064  ;;  %1605 = vst.msk [vmem:[%s2189_s28 + $0x170] sm:$0xff] %vm548_vm1, %v1014_v49 }
 0x239   : > { %1614 = vst.msk [vmem:[%s2203_s6 + $0x138] sm:$0xff] %vm548_vm1, %v1065_v41  ;;  %1261 = vrot.lane.b32.xlu0 %v1929_v30, %s1810_s9 }
 0x23a   : > { %1263 = vrot.lane.b32.xlu1 %v1923_v26, %s1810_s9 }
 0x23b   : > { %v1063_v60 = vpop.permute.xlu0 %1062 }
 0x23c   : > { %v740_v53 = vpop.permute.xlu1 %739  ;;  %1613 = vst.msk [vmem:[%s2203_s6 + $0x130] sm:$0xff] %vm548_vm1, %v1063_v60 }
 0x23d   : > { %1534 = vst.msk [vmem:[%s1935_s14 + $0xb8] sm:$0xff] %vm548_vm1, %v740_v53  ;;  %1265 = vrot.lane.b32.xlu0 %v1975_v42, %s1810_s9 }
 0x23e   : > { %1267 = vrot.lane.b32.xlu1 %v1963_v39, %s1810_s9 }
 0x23f   : > { %v738_v62 = vpop.permute.xlu0 %737 }
 0x240   : > { %v756_v26 = vpop.permute.xlu1 %755  ;;  %1533 = vst.msk [vmem:[%s1935_s14 + $0xb0] sm:$0xff] %vm548_vm1, %v738_v62 }
 0x241   : > { %1542 = vst.msk [vmem:[%s1935_s14 + $0xf8] sm:$0xff] %vm548_vm1, %v756_v26  ;;  %1269 = vrot.lane.b32.xlu0 %v2015_v54, %s1810_s9 }
 0x242   : > { %1271 = vrot.lane.b32.xlu1 %v2003_v51, %s1810_s9 }
 0x243   : > { %v754_v39 = vpop.permute.xlu0 %753 }
 0x244   : > { %v935_v30 = vpop.permute.xlu1 %934  ;;  %1541 = vst.msk [vmem:[%s1935_s14 + $0xf0] sm:$0xff] %vm548_vm1, %v754_v39 }
 0x245   : > { %1582 = vst.msk [vmem:[%s1935_s14 + $0x138] sm:$0xff] %vm548_vm1, %v935_v30  ;;  %1273 = vrot.lane.b32.xlu0 %v2105_v4, %s1810_s9 }
 0x246   : > { %1275 = vrot.lane.b32.xlu1 %v2096_v0, %s1810_s9 }
 0x247   : > { %v933_v51 = vpop.permute.xlu0 %932 }
 0x248   : > { %v951_v42 = vpop.permute.xlu1 %950  ;;  %1581 = vst.msk [vmem:[%s1935_s14 + $0x130] sm:$0xff] %vm548_vm1, %v933_v51 }
 0x249   : > { %1590 = vst.msk [vmem:[%s1935_s14 + $0x178] sm:$0xff] %vm548_vm1, %v951_v42 }
 0x24b   : > { %v949_v52 = vpop.permute.xlu0 %948 }
 0x24c   : > { %v1069_v54 = vpop.permute.xlu1 %1068  ;;  %1589 = vst.msk [vmem:[%s1935_s14 + $0x170] sm:$0xff] %vm548_vm1, %v949_v52 }
 0x24d   : > { %1616 = vst.msk [vmem:[%s2203_s6 + $0x148] sm:$0xff] %vm548_vm1, %v1069_v54 }
 0x24f   : > { %v1071_v59 = vpop.permute.xlu0 %1070 }
 0x250   : > { %v1073_v0 = vpop.permute.xlu1 %1072  ;;  %1617 = vst.msk [vmem:[%s2203_s6 + $0x150] sm:$0xff] %vm548_vm1, %v1071_v59 }
 0x251   : > { %1618 = vst.msk [vmem:[%s2203_s6 + $0x158] sm:$0xff] %vm548_vm1, %v1073_v0 }
 0x253   : > { %v1075_v61 = vpop.permute.xlu0 %1074 }
 0x254   : > { %v1077_v4 = vpop.permute.xlu1 %1076  ;;  %1619 = vst.msk [vmem:[%s2203_s6 + $0x160] sm:$0xff] %vm548_vm1, %v1075_v61 }
 0x255   : > { %1620 = vst.msk [vmem:[%s2203_s6 + $0x168] sm:$0xff] %vm548_vm1, %v1077_v4 }
 0x257   : > { %v1079_v1 = vpop.permute.xlu0 %1078 }
 0x258   : > { %v1081_v63 = vpop.permute.xlu1 %1080  ;;  %1621 = vst.msk [vmem:[%s2203_s6 + $0x170] sm:$0xff] %vm548_vm1, %v1079_v1 }
 0x259   : > { %1622 = vst.msk [vmem:[%s2203_s6 + $0x178] sm:$0xff] %vm548_vm1, %v1081_v63 }
 0x25b   : > { %v1116_v8 = vpop.permute.xlu0 %1115 }
 0x25c   : > { %v1118_v7 = vpop.permute.xlu1 %1117  ;;  %1623 = vst.msk [vmem:[%s1935_s14 + $0x180] sm:$0xff] %vm548_vm1, %v1116_v8 }
 0x25d   : > { %1624 = vst.msk [vmem:[%s1935_s14 + $0x188] sm:$0xff] %vm548_vm1, %v1118_v7 }
 0x25f   : > { %v1120_v10 = vpop.permute.xlu0 %1119 }
 0x260   : > { %v1122_v9 = vpop.permute.xlu1 %1121  ;;  %1625 = vst.msk [vmem:[%s1935_s14 + $0x190] sm:$0xff] %vm548_vm1, %v1120_v10 }
 0x261   : > { %1626 = vst.msk [vmem:[%s1935_s14 + $0x198] sm:$0xff] %vm548_vm1, %v1122_v9 }
 0x263   : > { %v1124_v12 = vpop.permute.xlu0 %1123 }
 0x264   : > { %v1126_v11 = vpop.permute.xlu1 %1125  ;;  %1627 = vst.msk [vmem:[%s1935_s14 + $0x1a0] sm:$0xff] %vm548_vm1, %v1124_v12 }
 0x265   : > { %1628 = vst.msk [vmem:[%s1935_s14 + $0x1a8] sm:$0xff] %vm548_vm1, %v1126_v11 }
 0x267   : > { %v1128_v14 = vpop.permute.xlu0 %1127 }
 0x268   : > { %v1130_v13 = vpop.permute.xlu1 %1129  ;;  %1629 = vst.msk [vmem:[%s1935_s14 + $0x1b0] sm:$0xff] %vm548_vm1, %v1128_v14 }
 0x269   : > { %1630 = vst.msk [vmem:[%s1935_s14 + $0x1b8] sm:$0xff] %vm548_vm1, %v1130_v13 }
 0x26b   : > { %v1132_v16 = vpop.permute.xlu0 %1131 }
 0x26c   : > { %v1134_v15 = vpop.permute.xlu1 %1133  ;;  %1631 = vst.msk [vmem:[%s1935_s14 + $0x1c0] sm:$0xff] %vm548_vm1, %v1132_v16 }
 0x26d   : > { %1632 = vst.msk [vmem:[%s1935_s14 + $0x1c8] sm:$0xff] %vm548_vm1, %v1134_v15 }
 0x26f   : > { %v1136_v17 = vpop.permute.xlu0 %1135 }
 0x270   : > { %v1138_v31 = vpop.permute.xlu1 %1137  ;;  %1633 = vst.msk [vmem:[%s1935_s14 + $0x1d0] sm:$0xff] %vm548_vm1, %v1136_v17 }
 0x271   : > { %1634 = vst.msk [vmem:[%s1935_s14 + $0x1d8] sm:$0xff] %vm548_vm1, %v1138_v31 }
 0x273   : > { %v1140_v43 = vpop.permute.xlu0 %1139 }
 0x274   : > { %v1142_v34 = vpop.permute.xlu1 %1141  ;;  %1635 = vst.msk [vmem:[%s1935_s14 + $0x1e0] sm:$0xff] %vm548_vm1, %v1140_v43 }
 0x275   : > { %1636 = vst.msk [vmem:[%s1935_s14 + $0x1e8] sm:$0xff] %vm548_vm1, %v1142_v34 }
 0x277   : > { %v1144_v55 = vpop.permute.xlu0 %1143 }
 0x278   : > { %v1146_v45 = vpop.permute.xlu1 %1145  ;;  %1637 = vst.msk [vmem:[%s1935_s14 + $0x1f0] sm:$0xff] %vm548_vm1, %v1144_v55 }
 0x279   : > { %1638 = vst.msk [vmem:[%s1935_s14 + $0x1f8] sm:$0xff] %vm548_vm1, %v1146_v45 }
 0x27b   : > { %v1181_v2 = vpop.permute.xlu0 %1180 }
 0x27c   : > { %v1183_v57 = vpop.permute.xlu1 %1182  ;;  %1639 = vst.msk [vmem:[%s2189_s28 + $0x180] sm:$0xff] %vm548_vm1, %v1181_v2 }
 0x27d   : > { %1640 = vst.msk [vmem:[%s2189_s28 + $0x188] sm:$0xff] %vm548_vm1, %v1183_v57 }
 0x27f   : > { %v1185_v3 = vpop.permute.xlu0 %1184 }
 0x280   : > { %v1187_v32 = vpop.permute.xlu1 %1186  ;;  %1641 = vst.msk [vmem:[%s2189_s28 + $0x190] sm:$0xff] %vm548_vm1, %v1185_v3 }
 0x281   : > { %1642 = vst.msk [vmem:[%s2189_s28 + $0x198] sm:$0xff] %vm548_vm1, %v1187_v32 }
 0x283   : > { %v1189_v44 = vpop.permute.xlu0 %1188 }
 0x284   : > { %v1191_v36 = vpop.permute.xlu1 %1190  ;;  %1643 = vst.msk [vmem:[%s2189_s28 + $0x1a0] sm:$0xff] %vm548_vm1, %v1189_v44 }
 0x285   : > { %1644 = vst.msk [vmem:[%s2189_s28 + $0x1a8] sm:$0xff] %vm548_vm1, %v1191_v36 }
 0x287   : > { %v1193_v56 = vpop.permute.xlu0 %1192 }
 0x288   : > { %v1195_v46 = vpop.permute.xlu1 %1194  ;;  %1645 = vst.msk [vmem:[%s2189_s28 + $0x1b0] sm:$0xff] %vm548_vm1, %v1193_v56 }
 0x289   : > { %1646 = vst.msk [vmem:[%s2189_s28 + $0x1b8] sm:$0xff] %vm548_vm1, %v1195_v46 }
 0x28b   : > { %v1197_v5 = vpop.permute.xlu0 %1196 }
 0x28c   : > { %v1199_v58 = vpop.permute.xlu1 %1198  ;;  %1647 = vst.msk [vmem:[%s2189_s28 + $0x1c0] sm:$0xff] %vm548_vm1, %v1197_v5 }
 0x28d   : > { %1648 = vst.msk [vmem:[%s2189_s28 + $0x1c8] sm:$0xff] %vm548_vm1, %v1199_v58 }
 0x28f   : > { %v1201_v18 = vpop.permute.xlu0 %1200 }
 0x290   : > { %v1203_v6 = vpop.permute.xlu1 %1202  ;;  %1649 = vst.msk [vmem:[%s2189_s28 + $0x1d0] sm:$0xff] %vm548_vm1, %v1201_v18 }
 0x291   : > { %1650 = vst.msk [vmem:[%s2189_s28 + $0x1d8] sm:$0xff] %vm548_vm1, %v1203_v6 }
 0x293   : > { %v1205_v20 = vpop.permute.xlu0 %1204 }
 0x294   : > { %v1207_v19 = vpop.permute.xlu1 %1206  ;;  %1651 = vst.msk [vmem:[%s2189_s28 + $0x1e0] sm:$0xff] %vm548_vm1, %v1205_v20 }
 0x295   : > { %1652 = vst.msk [vmem:[%s2189_s28 + $0x1e8] sm:$0xff] %vm548_vm1, %v1207_v19 }
 0x297   : > { %v1209_v22 = vpop.permute.xlu0 %1208 }
 0x298   : > { %v1211_v21 = vpop.permute.xlu1 %1210  ;;  %1653 = vst.msk [vmem:[%s2189_s28 + $0x1f0] sm:$0xff] %vm548_vm1, %v1209_v22 }
 0x299   : > { %1654 = vst.msk [vmem:[%s2189_s28 + $0x1f8] sm:$0xff] %vm548_vm1, %v1211_v21 }
 0x29b   : > { %v1246_v24 = vpop.permute.xlu0 %1245 }
 0x29c   : > { %v1248_v23 = vpop.permute.xlu1 %1247  ;;  %1655 = vst.msk [vmem:[%s2203_s6 + $0x180] sm:$0xff] %vm548_vm1, %v1246_v24 }
 0x29d   : > { %1656 = vst.msk [vmem:[%s2203_s6 + $0x188] sm:$0xff] %vm548_vm1, %v1248_v23 }
 0x29f   : > { %v1250_v28 = vpop.permute.xlu0 %1249 }
 0x2a0   : > { %v1252_v27 = vpop.permute.xlu1 %1251  ;;  %1657 = vst.msk [vmem:[%s2203_s6 + $0x190] sm:$0xff] %vm548_vm1, %v1250_v28 }
 0x2a1   : > { %1658 = vst.msk [vmem:[%s2203_s6 + $0x198] sm:$0xff] %vm548_vm1, %v1252_v27 }
 0x2a3   : > { %v1254_v35 = vpop.permute.xlu0 %1253 }
 0x2a4   : > { %v1256_v33 = vpop.permute.xlu1 %1255  ;;  %1659 = vst.msk [vmem:[%s2203_s6 + $0x1a0] sm:$0xff] %vm548_vm1, %v1254_v35 }
 0x2a5   : > { %1660 = vst.msk [vmem:[%s2203_s6 + $0x1a8] sm:$0xff] %vm548_vm1, %v1256_v33 }
 0x2a7   : > { %v1258_v40 = vpop.permute.xlu0 %1257 }
 0x2a8   : > { %v1260_v38 = vpop.permute.xlu1 %1259  ;;  %1661 = vst.msk [vmem:[%s2203_s6 + $0x1b0] sm:$0xff] %vm548_vm1, %v1258_v40 }
 0x2a9   : > { %1662 = vst.msk [vmem:[%s2203_s6 + $0x1b8] sm:$0xff] %vm548_vm1, %v1260_v38 }
 0x2ab   : > { %v1262_v48 = vpop.permute.xlu0 %1261 }
 0x2ac   : > { %v1264_v47 = vpop.permute.xlu1 %1263  ;;  %1663 = vst.msk [vmem:[%s2203_s6 + $0x1c0] sm:$0xff] %vm548_vm1, %v1262_v48 }
 0x2ad   : > { %1664 = vst.msk [vmem:[%s2203_s6 + $0x1c8] sm:$0xff] %vm548_vm1, %v1264_v47 }
 0x2af   : > { %v1266_v50 = vpop.permute.xlu0 %1265 }
 0x2b0   : > { %v1268_v25 = vpop.permute.xlu1 %1267  ;;  %1665 = vst.msk [vmem:[%s2203_s6 + $0x1d0] sm:$0xff] %vm548_vm1, %v1266_v50 }
 0x2b1   : > { %1666 = vst.msk [vmem:[%s2203_s6 + $0x1d8] sm:$0xff] %vm548_vm1, %v1268_v25 }
 0x2b3   : > { %v1270_v37 = vpop.permute.xlu0 %1269 }
 0x2b4   : > { %v1272_v29 = vpop.permute.xlu1 %1271  ;;  %1667 = vst.msk [vmem:[%s2203_s6 + $0x1e0] sm:$0xff] %vm548_vm1, %v1270_v37 }
 0x2b5   : > { %1668 = vst.msk [vmem:[%s2203_s6 + $0x1e8] sm:$0xff] %vm548_vm1, %v1272_v29 }
 0x2b7   : > { %v1274_v49 = vpop.permute.xlu0 %1273 }
 0x2b8   : > { %v1276_v41 = vpop.permute.xlu1 %1275  ;;  %1669 = vst.msk [vmem:[%s2203_s6 + $0x1f0] sm:$0xff] %vm548_vm1, %v1274_v49 }
 0x2b9   : > { %1670 = vst.msk [vmem:[%s2203_s6 + $0x1f8] sm:$0xff] %vm548_vm1, %v1276_v41 }
 0x2ba PF: > { %s16_s20 = sadd.s32 1, %s1798_s20   ;;  %s2800_s18 = smov %s1794_s19 }
 0x2bb   : > { %p13_p5 = scmp.ge.s32.totalorder %s16_s20, 4   ;;  %s2801_s19 = smov %s2803_s21 }
 0x2bd   :  { %15 = sbr.rel (!%p13_p5) target bundleno = 2 (0x2), region = 95 }

</bundles_post_ra>
